<compile_context>
chip_gen: v7x
topology: tpu7x:2x2x1
jax: 0.10.0
libtpu: 0.0.40
codegen_flags: <defaults>
</compile_context>

<pallas_src>
import math
import functools
from itertools import permutations

import numpy as np
import jax
import jax.numpy as jnp
from jax.experimental import pallas as pl
from jax.experimental.pallas import tpu as pltpu

HIDDEN_FEATURES = 100          # logical hidden width (matches PyTorch module)
HP = 128                       # padded, lane-aligned hidden width used on device
BN_EPS = 1e-5
NEG_BIG = -1e30                # additive attention bias for non-edges (f32 only)
INV_SQRT_D = 1.0 / math.sqrt(HIDDEN_FEATURES)   # TransformerConv scale (real C=100)


# ----------------------------------------------------------------------------
# Edge template / edge construction (host-side glue, mirrors the PyTorch code)
# ----------------------------------------------------------------------------
def generate_edge_template(max_num_vehicles, max_num_obstacles):
    assert max_num_vehicles >= 1
    assert max_num_obstacles >= 0
    tmpl = {}
    for nv in range(1, max_num_vehicles + 1):
        for no in range(max_num_obstacles + 1):
            ev = np.zeros((2, 0), dtype=np.int32)
            eo = np.zeros((2, 0), dtype=np.int32)
            if nv > 1:
                perms = list(permutations(range(nv), 2))
                v1, v2 = zip(*perms)
                ev = np.array([v1, v2], dtype=np.int32)
            if no > 0:
                obs = np.tile(np.arange(nv, nv + no), nv)
                veh = np.repeat(np.arange(nv), no)
                eo = np.stack([obs, veh]).astype(np.int32)
            tmpl[(nv + no, nv)] = [ev, eo]
    return tmpl


def get_edges(batches, edge_template):
    batches = np.asarray(batches)
    offsets = np.concatenate([[0], np.cumsum(batches[:, 0])[:-1]])
    ev_all = [np.zeros((2, 0), dtype=np.int64)]
    eo_all = [np.zeros((2, 0), dtype=np.int64)]
    for b in np.unique(batches, axis=0):
        index = np.all(batches == b, axis=-1)
        if np.sum(index) == 0:
            continue
        off = offsets[index]
        ev, eo = edge_template[tuple(b.tolist())]
        ev_all.append((ev[:, None, :] + off[None, :, None]).reshape(2, -1))
        eo_all.append((eo[:, None, :] + off[None, :, None]).reshape(2, -1))
    ev = np.concatenate(ev_all, axis=-1).astype(np.int32)
    eo = np.concatenate(eo_all, axis=-1).astype(np.int32)
    return ev, eo


def _ceil_to(n, m):
    return ((n + m - 1) // m) * m


def prepare_graph(marks, batches, edge_template):
    """One-time host-side prep: adjacency bias, BN mask row, in-degree guard, indices."""
    marks = np.asarray(marks)
    n = int(marks.shape[0])
    n_pad = max(8, _ceil_to(n, 8))

    ev, eo = get_edges(batches, edge_template)
    edges = np.concatenate([ev, eo], axis=-1).astype(np.int32)

    adjb = np.full((n_pad, n_pad), NEG_BIG, dtype=np.float32)   # row=target, col=source
    if edges.shape[1] > 0:
        adjb[edges[1], edges[0]] = 0.0

    # zero-in-degree guard: 1.0 for rows that have at least one incoming edge
    row_has = (adjb.max(axis=1, keepdims=True) > -0.5).astype(np.float32)   # [Np,1]

    # masked-mean weights for BatchNorm: 1/n on real nodes, 0 on padding -> one MXU dot
    mask_row = np.zeros((1, n_pad), dtype=np.float32)
    mask_row[0, :n] = 1.0 / float(n)

    veh_idx = np.nonzero(marks == 0)[0].astype(np.int32)
    obs_idx = np.nonzero(marks == 1)[0].astype(np.int32)

    return {
        "n": n,
        "n_pad": n_pad,
        "adjb": jnp.asarray(adjb),
        "row_has": jnp.asarray(row_has),
        "mask_row": jnp.asarray(mask_row),
        "edges": jnp.asarray(edges),
        "ev": jnp.asarray(ev),
        "eo": jnp.asarray(eo),
        "edge_tgt": jnp.asarray(edges[1]),
        "edge_src": jnp.asarray(edges[0]),
        "veh_idx": jnp.asarray(veh_idx),
        "obs_idx": jnp.asarray(obs_idx),
    }


# ----------------------------------------------------------------------------
# Fused Pallas kernel: MLP backbone + GNN layer + head, single invocation
# ----------------------------------------------------------------------------
def _make_fused_kernel(head_mode, n_mlp, n_conv):
    def kernel(x_ref, maskrow_ref, adjb_ref, rowhas_ref,
               mlp_w_ref, mlp_bgb_ref,
               conv_w_hbm, conv_b_hbm, conv_bn_hbm, head_w_hbm,
               head_bgb_ref, head_aux_ref,
               out_ref, alpha_ref,
               conv_w_v, conv_b_v, conv_bn_v, head_w_v, dma_sem):
        # --- kick off conv/head weight DMAs so they overlap the MLP backbone ----
        cp_cw = pltpu.make_async_copy(conv_w_hbm, conv_w_v, dma_sem.at[0])
        cp_cb = pltpu.make_async_copy(conv_b_hbm, conv_b_v, dma_sem.at[1])
        cp_cn = pltpu.make_async_copy(conv_bn_hbm, conv_bn_v, dma_sem.at[2])
        cp_hw = pltpu.make_async_copy(head_w_hbm, head_w_v, dma_sem.at[3])
        cp_cw.start(); cp_cb.start(); cp_cn.start(); cp_hw.start()

        mask_row = maskrow_ref[...]            # [1, Np], already scaled by 1/n_real

        def bn(y, gamma, beta):
            # BatchNorm1d, training-mode biased stats over the *real* nodes only.
            # Masked mean / E[x^2] ride the MXU instead of sublane reductions.
            mean = jnp.dot(mask_row, y, preferred_element_type=jnp.float32)      # [1,HP]
            ex2 = jnp.dot(mask_row, y * y, preferred_element_type=jnp.float32)   # [1,HP]
            var = jnp.maximum(ex2 - mean * mean, 0.0)
            return (y - mean) * jax.lax.rsqrt(var + BN_EPS) * gamma + beta

        def linear_bn_relu(xin, w, bgb, x0=None):
            y = jnp.dot(xin.astype(jnp.bfloat16), w,
                        preferred_element_type=jnp.float32) + bgb[0:1, :]
            y = bn(y, bgb[1:2, :], bgb[2:3, :])
            if x0 is not None:
                y = y + x0
            return jnp.maximum(y, 0.0)

        # ---- MLP backbone: block0 + 4 ResidualBlocks -------------------------
        h = linear_bn_relu(x_ref[...], mlp_w_ref[0], mlp_bgb_ref[0])
        for idx in range(1, n_mlp, 2):
            t = linear_bn_relu(h, mlp_w_ref[idx], mlp_bgb_ref[idx])
            h = linear_bn_relu(t, mlp_w_ref[idx + 1], mlp_bgb_ref[idx + 1], x0=h)

        # conv weights should have landed by now (hidden under 9 MLP matmuls)
        cp_cw.wait(); cp_cb.wait(); cp_cn.wait()

        # ---- GNN layer: 3 ConvResidualBlocks (2 TransformerConvs each) -------
        adjb = adjb_ref[...]                     # [Np, Np] additive mask (0 / -1e30)
        row_has = rowhas_ref[...]                # [Np, 1] zero-in-degree guard
        alpha_acc = jnp.zeros_like(adjb)

        def conv(xin, x0, layer, residual):
            # one wide matmul: [Np,128] x [128,512] -> Q | K | V | skip
            fused = (jnp.dot(xin.astype(jnp.bfloat16), conv_w_v[layer],
                             preferred_element_type=jnp.float32) + conv_b_v[layer])
            q = fused[:, 0:HP]                   # 1/sqrt(d) already folded into Wq, bq
            k = fused[:, HP:2 * HP]
            v = fused[:, 2 * HP:3 * HP]
            skip = fused[:, 3 * HP:4 * HP]

            s = jax.lax.dot_general(q, k, (((1,), (1,)), ((), ())),
                                    preferred_element_type=jnp.float32) + adjb
            m = jnp.max(s, axis=-1, keepdims=True)
            e = jnp.exp(s - m)                   # exp(-1e30) underflows to 0
            denom = jnp.sum(e, axis=-1, keepdims=True)
            alpha = e * (row_has * pl.reciprocal(denom, approx=True))

            y = jnp.dot(alpha, v, preferred_element_type=jnp.float32) + skip
            bnp = conv_bn_v[layer]
            y = bn(y, bnp[0:1, :], bnp[1:2, :])
            if residual:
                y = y + x0
            return jnp.maximum(y, 0.0), alpha

        for blk in range(n_conv // 2):
            x0 = h
            y1, a1 = conv(x0, x0, 2 * blk, residual=False)
            h, a2 = conv(y1, x0, 2 * blk + 1, residual=True)
            alpha_acc = alpha_acc + a1 + a2

        # ---- Head -------------------------------------------------------------
        cp_hw.wait()
        hb = head_bgb_ref[...]
        y = jnp.dot(h.astype(jnp.bfloat16), head_w_v[...],
                    preferred_element_type=jnp.float32) + hb[0:1, :]
        y = bn(y, hb[1:2, :], hb[2:3, :])
        aux = head_aux_ref[...]                  # tanh: bound row | softmax: col mask
        if head_mode == "tanh":
            y = jnp.tanh(y) * aux
        else:  # softmax over the real output columns only
            y = y + (aux - 1.0) * 1e30
            mx = jnp.max(y, axis=-1, keepdims=True)
            e = jnp.exp(y - mx) * aux
            y = e * pl.reciprocal(jnp.sum(e, axis=-1, keepdims=True), approx=True)

        out_ref[...] = y
        alpha_ref[...] = alpha_acc
        # TODO(synk): for large Np emit edge-only alpha [E,1] in-kernel (scalar
        # prefetch of edge_tgt/edge_src) instead of the dense N x N writeback.

    return kernel


_VMEM = pl.BlockSpec(memory_space=pltpu.MemorySpace.VMEM)
_ANY = pl.BlockSpec(memory_space=pl.ANY)


@functools.partial(jax.jit, static_argnames=("out_features", "head_mode"))
def _forward_device(x, mask_row, adjb, row_has, edge_tgt, edge_src, veh_idx, obs_idx,
                    packed, head_aux, *, out_features, head_mode):
    n, f = x.shape
    n_pad = adjb.shape[0]
    x_pad = jnp.zeros((n_pad, HP), jnp.float32).at[:n, :f].set(x)

    n_mlp = packed["mlp_w"].shape[0]
    n_conv = packed["conv_w"].shape[0]

    out_pad, alpha = pl.pallas_call(
        _make_fused_kernel(head_mode, n_mlp, n_conv),
        out_shape=(jax.ShapeDtypeStruct((n_pad, HP), jnp.float32),
                   jax.ShapeDtypeStruct((n_pad, n_pad), jnp.float32)),
        in_specs=[_VMEM] * 6 + [_ANY] * 4 + [_VMEM] * 2,
        out_specs=(_VMEM, _VMEM),
        scratch_shapes=[
            pltpu.VMEM(packed["conv_w"].shape, jnp.bfloat16),
            pltpu.VMEM(packed["conv_b"].shape, jnp.float32),
            pltpu.VMEM(packed["conv_bn"].shape, jnp.float32),
            pltpu.VMEM(packed["head_w"].shape, jnp.bfloat16),
            pltpu.SemaphoreType.DMA((4,)),
        ],
        compiler_params=pltpu.CompilerParams(vmem_limit_bytes=64 * 1024 * 1024),
    )(x_pad, mask_row, adjb, row_has,
      packed["mlp_w"], packed["mlp_bgb"],
      packed["conv_w"], packed["conv_b"], packed["conv_bn"], packed["head_w"],
      packed["head_bgb"], head_aux)

    out = out_pad[:n, :out_features]
    alpha_edges = alpha[edge_tgt, edge_src][:, None]     # [E, heads=1]
    return out, out[veh_idx], out[obs_idx], alpha_edges


def gnn_model_forward(x, graph, packed, output_features, bound):
    head_mode = "tanh" if bound is not None else "softmax"
    aux = np.zeros((1, HP), np.float32)
    if bound is not None:
        aux[0, :output_features] = bound          # tanh bound per real column
    else:
        aux[0, :output_features] = 1.0            # softmax column mask

    out, out_veh, out_obs, alpha_edges = _forward_device(
        x, graph["mask_row"], graph["adjb"], graph["row_has"],
        graph["edge_tgt"], graph["edge_src"],
        graph["veh_idx"], graph["obs_idx"],
        packed, jnp.asarray(aux),
        out_features=output_features, head_mode=head_mode)

    a = (graph["edges"], alpha_edges)
    return out, out_veh, out_obs, graph["ev"], graph["eo"], a


# ----------------------------------------------------------------------------
# Deterministic parameter init + padded/packed device layout
# ----------------------------------------------------------------------------
def _init_linear(key, fan_in, fan_out):
    kw, kb = jax.random.split(key)
    lim = 1.0 / math.sqrt(fan_in)
    w = jax.random.uniform(kw, (fan_in, fan_out), jnp.float32, -lim, lim)
    b = jax.random.uniform(kb, (fan_out,), jnp.float32, -lim, lim)
    return w, b


def init_params(key, input_features, output_features):
    keys = iter(jax.random.split(key, 64))

    def lin_block(fi, fo):
        w, b = _init_linear(next(keys), fi, fo)
        return (w, b,
                jnp.ones((fo,), jnp.float32),    # BN gamma
                jnp.zeros((fo,), jnp.float32))   # BN beta

    mlp = [lin_block(input_features, HIDDEN_FEATURES)]
    for _ in range(8):
        mlp.append(lin_block(HIDDEN_FEATURES, HIDDEN_FEATURES))

    gnn = []
    for _ in range(3):
        convs = []
        for _ in range(2):
            conv = []
            for _ in range(4):   # query, key, value, skip
                conv.extend(_init_linear(next(keys), HIDDEN_FEATURES, HIDDEN_FEATURES))
            bn = (jnp.ones((HIDDEN_FEATURES,), jnp.float32),
                  jnp.zeros((HIDDEN_FEATURES,), jnp.float32))
            convs.append((tuple(conv), bn))
        gnn.append((convs[0][0], convs[0][1], convs[1][0], convs[1][1]))

    head_p = lin_block(HIDDEN_FEATURES, output_features)
    return {"mlp": mlp, "gnn": gnn, "head": head_p}


def _pad_w(w, rows, cols):
    r, c = w.shape
    return jnp.pad(w, ((0, rows - r), (0, cols - c)))


def _pad_vec(v, cols, fill=0.0):
    return jnp.pad(v, (0, cols - v.shape[0]), constant_values=fill)


def pack_params(raw):
    """Zero-pad to the 128-lane layout, fold the 1/sqrt(d) attention scale into Wq/bq,
    stack per layer type, and cast matmul weights to bf16 (accumulation stays f32)."""
    mlp_w, mlp_bgb = [], []
    for (w, b, g, bt) in raw["mlp"]:
        mlp_w.append(_pad_w(w, HP, HP).astype(jnp.bfloat16))
        mlp_bgb.append(jnp.stack([_pad_vec(b, HP, 0.0),
                                  _pad_vec(g, HP, 1.0),
                                  _pad_vec(bt, HP, 0.0)]))

    conv_w, conv_b, conv_bn = [], [], []
    for (c1, b1, c2, b2) in raw["gnn"]:
        for (cp, bnp) in ((c1, b1), (c2, b2)):
            wq, bq, wk, bk, wv, bv, ws, bs = cp
            conv_w.append(jnp.concatenate(
                [_pad_w(wq * INV_SQRT_D, HP, HP), _pad_w(wk, HP, HP),
                 _pad_w(wv, HP, HP), _pad_w(ws, HP, HP)],
                axis=1).astype(jnp.bfloat16))                                  # [128, 512]
            conv_b.append(jnp.concatenate(
                [_pad_vec(bq * INV_SQRT_D, HP), _pad_vec(bk, HP),
                 _pad_vec(bv, HP), _pad_vec(bs, HP)])[None, :])                # [1, 512]
            g, bt = bnp
            conv_bn.append(jnp.stack([_pad_vec(g, HP, 1.0), _pad_vec(bt, HP, 0.0)]))

    hw, hb, hg, hbt = raw["head"]
    return {
        "mlp_w": jnp.stack(mlp_w),       # [9, 128, 128] bf16
        "mlp_bgb": jnp.stack(mlp_bgb),   # [9, 3, 128]   f32
        "conv_w": jnp.stack(conv_w),     # [6, 128, 512] bf16
        "conv_b": jnp.stack(conv_b),     # [6, 1, 512]   f32
        "conv_bn": jnp.stack(conv_bn),   # [6, 2, 128]   f32
        "head_w": _pad_w(hw, HP, HP).astype(jnp.bfloat16),   # [128, 128] bf16
        "head_bgb": jnp.stack([_pad_vec(hb, HP, 0.0),
                               _pad_vec(hg, HP, 1.0),
                               _pad_vec(hbt, HP, 0.0)]),      # [3, 128] f32
    }


# ----------------------------------------------------------------------------
# Main
# ----------------------------------------------------------------------------
if __name__ == "__main__":
    input_features = 8
    output_features = 4
    bound = 2.0

    key = jax.random.PRNGKey(0)
    kx, kp = jax.random.split(key)

    # batches[:, 0] = nodes per graph, batches[:, 1] = vehicles per graph
    batches = np.array([[4, 2], [3, 2]], dtype=np.int32)   # 7 nodes total
    n_nodes = int(batches[:, 0].sum())

    # node features: column 0 is the mark (0 = vehicle, 1 = obstacle)
    marks = np.array([0, 0, 1, 1, 0, 0, 1], dtype=np.float32)
    feats = jax.random.normal(kx, (n_nodes, input_features - 1), jnp.float32)
    x = jnp.concatenate([jnp.asarray(marks)[:, None], feats], axis=-1)

    raw_params = init_params(kp, input_features, output_features)
    packed_params = pack_params(raw_params)

    edge_template = generate_edge_template(5, 5)
    graph = prepare_graph(marks, batches, edge_template)   # host prep, once

    outputs = gnn_model_forward(x, graph, packed_params, output_features, bound)
    jax.block_until_ready(outputs)
    print("KERNEL_OK")
</pallas_src>

<mosaic_0001>
module attributes {stable_mosaic.version = 11 : i64} {
  func.func @kernel(%arg0: memref<8x128xf32, #tpu.memory_space<vmem>>, %arg1: memref<1x8xf32, #tpu.memory_space<vmem>>, %arg2: memref<8x8xf32, #tpu.memory_space<vmem>>, %arg3: memref<8x1xf32, #tpu.memory_space<vmem>>, %arg4: memref<9x128x128xbf16, #tpu.memory_space<vmem>>, %arg5: memref<9x3x128xf32, #tpu.memory_space<vmem>>, %arg6: memref<6x128x512xbf16, #tpu.memory_space<any>>, %arg7: memref<6x1x512xf32, #tpu.memory_space<any>>, %arg8: memref<6x2x128xf32, #tpu.memory_space<any>>, %arg9: memref<128x128xbf16, #tpu.memory_space<any>>, %arg10: memref<3x128xf32, #tpu.memory_space<vmem>>, %arg11: memref<1x128xf32, #tpu.memory_space<vmem>>, %arg12: memref<8x128xf32, #tpu.memory_space<vmem>>, %arg13: memref<8x8xf32, #tpu.memory_space<vmem>>, %arg14: memref<6x128x512xbf16, #tpu.memory_space<vmem>>, %arg15: memref<6x1x512xf32, #tpu.memory_space<vmem>>, %arg16: memref<6x2x128xf32, #tpu.memory_space<vmem>>, %arg17: memref<128x128xbf16, #tpu.memory_space<vmem>>, %arg18: memref<4x!tpu.dma_semaphore, #tpu.memory_space<semaphore_mem>>) attributes {dimension_semantics = [], scalar_prefetch = 0 : i64, scratch_operands = 5 : i64, tpu.core_type = #tpu.core_type<tc>} {
    %c0_i32 = arith.constant 0 : i32
    %0 = tpu.memref_slice %arg18[%c0_i32] : memref<4x!tpu.dma_semaphore, #tpu.memory_space<semaphore_mem>> -> memref<1x!tpu.dma_semaphore, #tpu.memory_space<semaphore_mem>>
    %1 = tpu.memref_squeeze %0 : memref<1x!tpu.dma_semaphore, #tpu.memory_space<semaphore_mem>> -> memref<!tpu.dma_semaphore, #tpu.memory_space<semaphore_mem>>
    tpu.enqueue_dma source(%arg6 : memref<6x128x512xbf16, #tpu.memory_space<any>>) target(%arg14 : memref<6x128x512xbf16, #tpu.memory_space<vmem>>) target_semaphore(%1 : memref<!tpu.dma_semaphore, #tpu.memory_space<semaphore_mem>>)
    %c1_i32 = arith.constant 1 : i32
    %2 = tpu.memref_slice %arg18[%c1_i32] : memref<4x!tpu.dma_semaphore, #tpu.memory_space<semaphore_mem>> -> memref<1x!tpu.dma_semaphore, #tpu.memory_space<semaphore_mem>>
    %3 = tpu.memref_squeeze %2 : memref<1x!tpu.dma_semaphore, #tpu.memory_space<semaphore_mem>> -> memref<!tpu.dma_semaphore, #tpu.memory_space<semaphore_mem>>
    tpu.enqueue_dma source(%arg7 : memref<6x1x512xf32, #tpu.memory_space<any>>) target(%arg15 : memref<6x1x512xf32, #tpu.memory_space<vmem>>) target_semaphore(%3 : memref<!tpu.dma_semaphore, #tpu.memory_space<semaphore_mem>>)
    %c2_i32 = arith.constant 2 : i32
    %4 = tpu.memref_slice %arg18[%c2_i32] : memref<4x!tpu.dma_semaphore, #tpu.memory_space<semaphore_mem>> -> memref<1x!tpu.dma_semaphore, #tpu.memory_space<semaphore_mem>>
    %5 = tpu.memref_squeeze %4 : memref<1x!tpu.dma_semaphore, #tpu.memory_space<semaphore_mem>> -> memref<!tpu.dma_semaphore, #tpu.memory_space<semaphore_mem>>
    tpu.enqueue_dma source(%arg8 : memref<6x2x128xf32, #tpu.memory_space<any>>) target(%arg16 : memref<6x2x128xf32, #tpu.memory_space<vmem>>) target_semaphore(%5 : memref<!tpu.dma_semaphore, #tpu.memory_space<semaphore_mem>>)
    %c3_i32 = arith.constant 3 : i32
    %6 = tpu.memref_slice %arg18[%c3_i32] : memref<4x!tpu.dma_semaphore, #tpu.memory_space<semaphore_mem>> -> memref<1x!tpu.dma_semaphore, #tpu.memory_space<semaphore_mem>>
    %7 = tpu.memref_squeeze %6 : memref<1x!tpu.dma_semaphore, #tpu.memory_space<semaphore_mem>> -> memref<!tpu.dma_semaphore, #tpu.memory_space<semaphore_mem>>
    tpu.enqueue_dma source(%arg9 : memref<128x128xbf16, #tpu.memory_space<any>>) target(%arg17 : memref<128x128xbf16, #tpu.memory_space<vmem>>) target_semaphore(%7 : memref<!tpu.dma_semaphore, #tpu.memory_space<semaphore_mem>>)
    %c0 = arith.constant 0 : index
    %c0_0 = arith.constant 0 : index
    %8 = vector.load %arg1[%c0, %c0_0] : memref<1x8xf32, #tpu.memory_space<vmem>>, vector<1x8xf32>
    %c0_1 = arith.constant 0 : index
    %c0_2 = arith.constant 0 : index
    %9 = vector.load %arg0[%c0_1, %c0_2] : memref<8x128xf32, #tpu.memory_space<vmem>>, vector<8x128xf32>
    %c0_3 = arith.constant 0 : index
    %c0_4 = arith.constant 0 : index
    %c0_5 = arith.constant 0 : index
    %10 = vector.load %arg4[%c0_3, %c0_4, %c0_5] : memref<9x128x128xbf16, #tpu.memory_space<vmem>>, vector<1x128x128xbf16>
    %11 = vector.shape_cast %10 : vector<1x128x128xbf16> to vector<128x128xbf16>
    %c0_6 = arith.constant 0 : index
    %c0_7 = arith.constant 0 : index
    %c0_8 = arith.constant 0 : index
    %12 = vector.load %arg5[%c0_6, %c0_7, %c0_8] : memref<9x3x128xf32, #tpu.memory_space<vmem>>, vector<1x3x128xf32>
    %13 = vector.shape_cast %12 : vector<1x3x128xf32> to vector<3x128xf32>
    %14 = arith.truncf %9 : vector<8x128xf32> to vector<8x128xbf16>
    %cst = arith.constant dense<0.000000e+00> : vector<8x128xf32>
    %15 = tpu.matmul %14, %11, %cst {dimension_numbers = #tpu.dot_dimension_numbers<[1], [0], [0], [1], [0, 0, 1, 1], [], []>} : vector<8x128xbf16>, vector<128x128xbf16>, vector<8x128xf32> -> vector<8x128xf32>
    %16 = vector.extract_strided_slice %13 {offsets = [0, 0], sizes = [1, 128], strides = [1, 1]} : vector<3x128xf32> to vector<1x128xf32>
    %17 = vector.broadcast %16 : vector<1x128xf32> to vector<8x128xf32>
    %18 = arith.addf %15, %17 : vector<8x128xf32>
    %19 = vector.extract_strided_slice %13 {offsets = [1, 0], sizes = [1, 128], strides = [1, 1]} : vector<3x128xf32> to vector<1x128xf32>
    %20 = vector.extract_strided_slice %13 {offsets = [2, 0], sizes = [1, 128], strides = [1, 1]} : vector<3x128xf32> to vector<1x128xf32>
    %cst_9 = arith.constant dense<0.000000e+00> : vector<1x128xf32>
    %21 = tpu.matmul %8, %18, %cst_9 {dimension_numbers = #tpu.dot_dimension_numbers<[1], [0], [0], [1], [0, 0, 1, 1], [], []>} : vector<1x8xf32>, vector<8x128xf32>, vector<1x128xf32> -> vector<1x128xf32>
    %22 = arith.mulf %18, %18 : vector<8x128xf32>
    %cst_10 = arith.constant dense<0.000000e+00> : vector<1x128xf32>
    %23 = tpu.matmul %8, %22, %cst_10 {dimension_numbers = #tpu.dot_dimension_numbers<[1], [0], [0], [1], [0, 0, 1, 1], [], []>} : vector<1x8xf32>, vector<8x128xf32>, vector<1x128xf32> -> vector<1x128xf32>
    %24 = arith.mulf %21, %21 : vector<1x128xf32>
    %25 = arith.subf %23, %24 : vector<1x128xf32>
    %cst_11 = arith.constant 0.000000e+00 : f32
    %26 = vector.broadcast %cst_11 : f32 to vector<1x128xf32>
    %27 = arith.maximumf %25, %26 : vector<1x128xf32>
    %28 = vector.broadcast %21 : vector<1x128xf32> to vector<8x128xf32>
    %29 = arith.subf %18, %28 : vector<8x128xf32>
    %cst_12 = arith.constant 9.99999974E-6 : f32
    %30 = vector.broadcast %cst_12 : f32 to vector<1x128xf32>
    %31 = arith.addf %27, %30 : vector<1x128xf32>
    %32 = math.rsqrt %31 : vector<1x128xf32>
    %33 = vector.broadcast %32 : vector<1x128xf32> to vector<8x128xf32>
    %34 = arith.mulf %29, %33 : vector<8x128xf32>
    %35 = vector.broadcast %19 : vector<1x128xf32> to vector<8x128xf32>
    %36 = arith.mulf %34, %35 : vector<8x128xf32>
    %37 = vector.broadcast %20 : vector<1x128xf32> to vector<8x128xf32>
    %38 = arith.addf %36, %37 : vector<8x128xf32>
    %cst_13 = arith.constant 0.000000e+00 : f32
    %39 = vector.broadcast %cst_13 : f32 to vector<8x128xf32>
    %40 = arith.maximumf %38, %39 : vector<8x128xf32>
    %c1 = arith.constant 1 : index
    %c0_14 = arith.constant 0 : index
    %c0_15 = arith.constant 0 : index
    %41 = vector.load %arg4[%c1, %c0_14, %c0_15] : memref<9x128x128xbf16, #tpu.memory_space<vmem>>, vector<1x128x128xbf16>
    %42 = vector.shape_cast %41 : vector<1x128x128xbf16> to vector<128x128xbf16>
    %c1_16 = arith.constant 1 : index
    %c0_17 = arith.constant 0 : index
    %c0_18 = arith.constant 0 : index
    %43 = vector.load %arg5[%c1_16, %c0_17, %c0_18] : memref<9x3x128xf32, #tpu.memory_space<vmem>>, vector<1x3x128xf32>
    %44 = vector.shape_cast %43 : vector<1x3x128xf32> to vector<3x128xf32>
    %45 = arith.truncf %40 : vector<8x128xf32> to vector<8x128xbf16>
    %cst_19 = arith.constant dense<0.000000e+00> : vector<8x128xf32>
    %46 = tpu.matmul %45, %42, %cst_19 {dimension_numbers = #tpu.dot_dimension_numbers<[1], [0], [0], [1], [0, 0, 1, 1], [], []>} : vector<8x128xbf16>, vector<128x128xbf16>, vector<8x128xf32> -> vector<8x128xf32>
    %47 = vector.extract_strided_slice %44 {offsets = [0, 0], sizes = [1, 128], strides = [1, 1]} : vector<3x128xf32> to vector<1x128xf32>
    %48 = vector.broadcast %47 : vector<1x128xf32> to vector<8x128xf32>
    %49 = arith.addf %46, %48 : vector<8x128xf32>
    %50 = vector.extract_strided_slice %44 {offsets = [1, 0], sizes = [1, 128], strides = [1, 1]} : vector<3x128xf32> to vector<1x128xf32>
    %51 = vector.extract_strided_slice %44 {offsets = [2, 0], sizes = [1, 128], strides = [1, 1]} : vector<3x128xf32> to vector<1x128xf32>
    %cst_20 = arith.constant dense<0.000000e+00> : vector<1x128xf32>
    %52 = tpu.matmul %8, %49, %cst_20 {dimension_numbers = #tpu.dot_dimension_numbers<[1], [0], [0], [1], [0, 0, 1, 1], [], []>} : vector<1x8xf32>, vector<8x128xf32>, vector<1x128xf32> -> vector<1x128xf32>
    %53 = arith.mulf %49, %49 : vector<8x128xf32>
    %cst_21 = arith.constant dense<0.000000e+00> : vector<1x128xf32>
    %54 = tpu.matmul %8, %53, %cst_21 {dimension_numbers = #tpu.dot_dimension_numbers<[1], [0], [0], [1], [0, 0, 1, 1], [], []>} : vector<1x8xf32>, vector<8x128xf32>, vector<1x128xf32> -> vector<1x128xf32>
    %55 = arith.mulf %52, %52 : vector<1x128xf32>
    %56 = arith.subf %54, %55 : vector<1x128xf32>
    %cst_22 = arith.constant 0.000000e+00 : f32
    %57 = vector.broadcast %cst_22 : f32 to vector<1x128xf32>
    %58 = arith.maximumf %56, %57 : vector<1x128xf32>
    %59 = vector.broadcast %52 : vector<1x128xf32> to vector<8x128xf32>
    %60 = arith.subf %49, %59 : vector<8x128xf32>
    %cst_23 = arith.constant 9.99999974E-6 : f32
    %61 = vector.broadcast %cst_23 : f32 to vector<1x128xf32>
    %62 = arith.addf %58, %61 : vector<1x128xf32>
    %63 = math.rsqrt %62 : vector<1x128xf32>
    %64 = vector.broadcast %63 : vector<1x128xf32> to vector<8x128xf32>
    %65 = arith.mulf %60, %64 : vector<8x128xf32>
    %66 = vector.broadcast %50 : vector<1x128xf32> to vector<8x128xf32>
    %67 = arith.mulf %65, %66 : vector<8x128xf32>
    %68 = vector.broadcast %51 : vector<1x128xf32> to vector<8x128xf32>
    %69 = arith.addf %67, %68 : vector<8x128xf32>
    %cst_24 = arith.constant 0.000000e+00 : f32
    %70 = vector.broadcast %cst_24 : f32 to vector<8x128xf32>
    %71 = arith.maximumf %69, %70 : vector<8x128xf32>
    %c2 = arith.constant 2 : index
    %c0_25 = arith.constant 0 : index
    %c0_26 = arith.constant 0 : index
    %72 = vector.load %arg4[%c2, %c0_25, %c0_26] : memref<9x128x128xbf16, #tpu.memory_space<vmem>>, vector<1x128x128xbf16>
    %73 = vector.shape_cast %72 : vector<1x128x128xbf16> to vector<128x128xbf16>
    %c2_27 = arith.constant 2 : index
    %c0_28 = arith.constant 0 : index
    %c0_29 = arith.constant 0 : index
    %74 = vector.load %arg5[%c2_27, %c0_28, %c0_29] : memref<9x3x128xf32, #tpu.memory_space<vmem>>, vector<1x3x128xf32>
    %75 = vector.shape_cast %74 : vector<1x3x128xf32> to vector<3x128xf32>
    %76 = arith.truncf %71 : vector<8x128xf32> to vector<8x128xbf16>
    %cst_30 = arith.constant dense<0.000000e+00> : vector<8x128xf32>
    %77 = tpu.matmul %76, %73, %cst_30 {dimension_numbers = #tpu.dot_dimension_numbers<[1], [0], [0], [1], [0, 0, 1, 1], [], []>} : vector<8x128xbf16>, vector<128x128xbf16>, vector<8x128xf32> -> vector<8x128xf32>
    %78 = vector.extract_strided_slice %75 {offsets = [0, 0], sizes = [1, 128], strides = [1, 1]} : vector<3x128xf32> to vector<1x128xf32>
    %79 = vector.broadcast %78 : vector<1x128xf32> to vector<8x128xf32>
    %80 = arith.addf %77, %79 : vector<8x128xf32>
    %81 = vector.extract_strided_slice %75 {offsets = [1, 0], sizes = [1, 128], strides = [1, 1]} : vector<3x128xf32> to vector<1x128xf32>
    %82 = vector.extract_strided_slice %75 {offsets = [2, 0], sizes = [1, 128], strides = [1, 1]} : vector<3x128xf32> to vector<1x128xf32>
    %cst_31 = arith.constant dense<0.000000e+00> : vector<1x128xf32>
    %83 = tpu.matmul %8, %80, %cst_31 {dimension_numbers = #tpu.dot_dimension_numbers<[1], [0], [0], [1], [0, 0, 1, 1], [], []>} : vector<1x8xf32>, vector<8x128xf32>, vector<1x128xf32> -> vector<1x128xf32>
    %84 = arith.mulf %80, %80 : vector<8x128xf32>
    %cst_32 = arith.constant dense<0.000000e+00> : vector<1x128xf32>
    %85 = tpu.matmul %8, %84, %cst_32 {dimension_numbers = #tpu.dot_dimension_numbers<[1], [0], [0], [1], [0, 0, 1, 1], [], []>} : vector<1x8xf32>, vector<8x128xf32>, vector<1x128xf32> -> vector<1x128xf32>
    %86 = arith.mulf %83, %83 : vector<1x128xf32>
    %87 = arith.subf %85, %86 : vector<1x128xf32>
    %cst_33 = arith.constant 0.000000e+00 : f32
    %88 = vector.broadcast %cst_33 : f32 to vector<1x128xf32>
    %89 = arith.maximumf %87, %88 : vector<1x128xf32>
    %90 = vector.broadcast %83 : vector<1x128xf32> to vector<8x128xf32>
    %91 = arith.subf %80, %90 : vector<8x128xf32>
    %cst_34 = arith.constant 9.99999974E-6 : f32
    %92 = vector.broadcast %cst_34 : f32 to vector<1x128xf32>
    %93 = arith.addf %89, %92 : vector<1x128xf32>
    %94 = math.rsqrt %93 : vector<1x128xf32>
    %95 = vector.broadcast %94 : vector<1x128xf32> to vector<8x128xf32>
    %96 = arith.mulf %91, %95 : vector<8x128xf32>
    %97 = vector.broadcast %81 : vector<1x128xf32> to vector<8x128xf32>
    %98 = arith.mulf %96, %97 : vector<8x128xf32>
    %99 = vector.broadcast %82 : vector<1x128xf32> to vector<8x128xf32>
    %100 = arith.addf %98, %99 : vector<8x128xf32>
    %101 = arith.addf %100, %40 : vector<8x128xf32>
    %cst_35 = arith.constant 0.000000e+00 : f32
    %102 = vector.broadcast %cst_35 : f32 to vector<8x128xf32>
    %103 = arith.maximumf %101, %102 : vector<8x128xf32>
    %c3 = arith.constant 3 : index
    %c0_36 = arith.constant 0 : index
    %c0_37 = arith.constant 0 : index
    %104 = vector.load %arg4[%c3, %c0_36, %c0_37] : memref<9x128x128xbf16, #tpu.memory_space<vmem>>, vector<1x128x128xbf16>
    %105 = vector.shape_cast %104 : vector<1x128x128xbf16> to vector<128x128xbf16>
    %c3_38 = arith.constant 3 : index
    %c0_39 = arith.constant 0 : index
    %c0_40 = arith.constant 0 : index
    %106 = vector.load %arg5[%c3_38, %c0_39, %c0_40] : memref<9x3x128xf32, #tpu.memory_space<vmem>>, vector<1x3x128xf32>
    %107 = vector.shape_cast %106 : vector<1x3x128xf32> to vector<3x128xf32>
    %108 = arith.truncf %103 : vector<8x128xf32> to vector<8x128xbf16>
    %cst_41 = arith.constant dense<0.000000e+00> : vector<8x128xf32>
    %109 = tpu.matmul %108, %105, %cst_41 {dimension_numbers = #tpu.dot_dimension_numbers<[1], [0], [0], [1], [0, 0, 1, 1], [], []>} : vector<8x128xbf16>, vector<128x128xbf16>, vector<8x128xf32> -> vector<8x128xf32>
    %110 = vector.extract_strided_slice %107 {offsets = [0, 0], sizes = [1, 128], strides = [1, 1]} : vector<3x128xf32> to vector<1x128xf32>
    %111 = vector.broadcast %110 : vector<1x128xf32> to vector<8x128xf32>
    %112 = arith.addf %109, %111 : vector<8x128xf32>
    %113 = vector.extract_strided_slice %107 {offsets = [1, 0], sizes = [1, 128], strides = [1, 1]} : vector<3x128xf32> to vector<1x128xf32>
    %114 = vector.extract_strided_slice %107 {offsets = [2, 0], sizes = [1, 128], strides = [1, 1]} : vector<3x128xf32> to vector<1x128xf32>
    %cst_42 = arith.constant dense<0.000000e+00> : vector<1x128xf32>
    %115 = tpu.matmul %8, %112, %cst_42 {dimension_numbers = #tpu.dot_dimension_numbers<[1], [0], [0], [1], [0, 0, 1, 1], [], []>} : vector<1x8xf32>, vector<8x128xf32>, vector<1x128xf32> -> vector<1x128xf32>
    %116 = arith.mulf %112, %112 : vector<8x128xf32>
    %cst_43 = arith.constant dense<0.000000e+00> : vector<1x128xf32>
    %117 = tpu.matmul %8, %116, %cst_43 {dimension_numbers = #tpu.dot_dimension_numbers<[1], [0], [0], [1], [0, 0, 1, 1], [], []>} : vector<1x8xf32>, vector<8x128xf32>, vector<1x128xf32> -> vector<1x128xf32>
    %118 = arith.mulf %115, %115 : vector<1x128xf32>
    %119 = arith.subf %117, %118 : vector<1x128xf32>
    %cst_44 = arith.constant 0.000000e+00 : f32
    %120 = vector.broadcast %cst_44 : f32 to vector<1x128xf32>
    %121 = arith.maximumf %119, %120 : vector<1x128xf32>
    %122 = vector.broadcast %115 : vector<1x128xf32> to vector<8x128xf32>
    %123 = arith.subf %112, %122 : vector<8x128xf32>
    %cst_45 = arith.constant 9.99999974E-6 : f32
    %124 = vector.broadcast %cst_45 : f32 to vector<1x128xf32>
    %125 = arith.addf %121, %124 : vector<1x128xf32>
    %126 = math.rsqrt %125 : vector<1x128xf32>
    %127 = vector.broadcast %126 : vector<1x128xf32> to vector<8x128xf32>
    %128 = arith.mulf %123, %127 : vector<8x128xf32>
    %129 = vector.broadcast %113 : vector<1x128xf32> to vector<8x128xf32>
    %130 = arith.mulf %128, %129 : vector<8x128xf32>
    %131 = vector.broadcast %114 : vector<1x128xf32> to vector<8x128xf32>
    %132 = arith.addf %130, %131 : vector<8x128xf32>
    %cst_46 = arith.constant 0.000000e+00 : f32
    %133 = vector.broadcast %cst_46 : f32 to vector<8x128xf32>
    %134 = arith.maximumf %132, %133 : vector<8x128xf32>
    %c4 = arith.constant 4 : index
    %c0_47 = arith.constant 0 : index
    %c0_48 = arith.constant 0 : index
    %135 = vector.load %arg4[%c4, %c0_47, %c0_48] : memref<9x128x128xbf16, #tpu.memory_space<vmem>>, vector<1x128x128xbf16>
    %136 = vector.shape_cast %135 : vector<1x128x128xbf16> to vector<128x128xbf16>
    %c4_49 = arith.constant 4 : index
    %c0_50 = arith.constant 0 : index
    %c0_51 = arith.constant 0 : index
    %137 = vector.load %arg5[%c4_49, %c0_50, %c0_51] : memref<9x3x128xf32, #tpu.memory_space<vmem>>, vector<1x3x128xf32>
    %138 = vector.shape_cast %137 : vector<1x3x128xf32> to vector<3x128xf32>
    %139 = arith.truncf %134 : vector<8x128xf32> to vector<8x128xbf16>
    %cst_52 = arith.constant dense<0.000000e+00> : vector<8x128xf32>
    %140 = tpu.matmul %139, %136, %cst_52 {dimension_numbers = #tpu.dot_dimension_numbers<[1], [0], [0], [1], [0, 0, 1, 1], [], []>} : vector<8x128xbf16>, vector<128x128xbf16>, vector<8x128xf32> -> vector<8x128xf32>
    %141 = vector.extract_strided_slice %138 {offsets = [0, 0], sizes = [1, 128], strides = [1, 1]} : vector<3x128xf32> to vector<1x128xf32>
    %142 = vector.broadcast %141 : vector<1x128xf32> to vector<8x128xf32>
    %143 = arith.addf %140, %142 : vector<8x128xf32>
    %144 = vector.extract_strided_slice %138 {offsets = [1, 0], sizes = [1, 128], strides = [1, 1]} : vector<3x128xf32> to vector<1x128xf32>
    %145 = vector.extract_strided_slice %138 {offsets = [2, 0], sizes = [1, 128], strides = [1, 1]} : vector<3x128xf32> to vector<1x128xf32>
    %cst_53 = arith.constant dense<0.000000e+00> : vector<1x128xf32>
    %146 = tpu.matmul %8, %143, %cst_53 {dimension_numbers = #tpu.dot_dimension_numbers<[1], [0], [0], [1], [0, 0, 1, 1], [], []>} : vector<1x8xf32>, vector<8x128xf32>, vector<1x128xf32> -> vector<1x128xf32>
    %147 = arith.mulf %143, %143 : vector<8x128xf32>
    %cst_54 = arith.constant dense<0.000000e+00> : vector<1x128xf32>
    %148 = tpu.matmul %8, %147, %cst_54 {dimension_numbers = #tpu.dot_dimension_numbers<[1], [0], [0], [1], [0, 0, 1, 1], [], []>} : vector<1x8xf32>, vector<8x128xf32>, vector<1x128xf32> -> vector<1x128xf32>
    %149 = arith.mulf %146, %146 : vector<1x128xf32>
    %150 = arith.subf %148, %149 : vector<1x128xf32>
    %cst_55 = arith.constant 0.000000e+00 : f32
    %151 = vector.broadcast %cst_55 : f32 to vector<1x128xf32>
    %152 = arith.maximumf %150, %151 : vector<1x128xf32>
    %153 = vector.broadcast %146 : vector<1x128xf32> to vector<8x128xf32>
    %154 = arith.subf %143, %153 : vector<8x128xf32>
    %cst_56 = arith.constant 9.99999974E-6 : f32
    %155 = vector.broadcast %cst_56 : f32 to vector<1x128xf32>
    %156 = arith.addf %152, %155 : vector<1x128xf32>
    %157 = math.rsqrt %156 : vector<1x128xf32>
    %158 = vector.broadcast %157 : vector<1x128xf32> to vector<8x128xf32>
    %159 = arith.mulf %154, %158 : vector<8x128xf32>
    %160 = vector.broadcast %144 : vector<1x128xf32> to vector<8x128xf32>
    %161 = arith.mulf %159, %160 : vector<8x128xf32>
    %162 = vector.broadcast %145 : vector<1x128xf32> to vector<8x128xf32>
    %163 = arith.addf %161, %162 : vector<8x128xf32>
    %164 = arith.addf %163, %103 : vector<8x128xf32>
    %cst_57 = arith.constant 0.000000e+00 : f32
    %165 = vector.broadcast %cst_57 : f32 to vector<8x128xf32>
    %166 = arith.maximumf %164, %165 : vector<8x128xf32>
    %c5 = arith.constant 5 : index
    %c0_58 = arith.constant 0 : index
    %c0_59 = arith.constant 0 : index
    %167 = vector.load %arg4[%c5, %c0_58, %c0_59] : memref<9x128x128xbf16, #tpu.memory_space<vmem>>, vector<1x128x128xbf16>
    %168 = vector.shape_cast %167 : vector<1x128x128xbf16> to vector<128x128xbf16>
    %c5_60 = arith.constant 5 : index
    %c0_61 = arith.constant 0 : index
    %c0_62 = arith.constant 0 : index
    %169 = vector.load %arg5[%c5_60, %c0_61, %c0_62] : memref<9x3x128xf32, #tpu.memory_space<vmem>>, vector<1x3x128xf32>
    %170 = vector.shape_cast %169 : vector<1x3x128xf32> to vector<3x128xf32>
    %171 = arith.truncf %166 : vector<8x128xf32> to vector<8x128xbf16>
    %cst_63 = arith.constant dense<0.000000e+00> : vector<8x128xf32>
    %172 = tpu.matmul %171, %168, %cst_63 {dimension_numbers = #tpu.dot_dimension_numbers<[1], [0], [0], [1], [0, 0, 1, 1], [], []>} : vector<8x128xbf16>, vector<128x128xbf16>, vector<8x128xf32> -> vector<8x128xf32>
    %173 = vector.extract_strided_slice %170 {offsets = [0, 0], sizes = [1, 128], strides = [1, 1]} : vector<3x128xf32> to vector<1x128xf32>
    %174 = vector.broadcast %173 : vector<1x128xf32> to vector<8x128xf32>
    %175 = arith.addf %172, %174 : vector<8x128xf32>
    %176 = vector.extract_strided_slice %170 {offsets = [1, 0], sizes = [1, 128], strides = [1, 1]} : vector<3x128xf32> to vector<1x128xf32>
    %177 = vector.extract_strided_slice %170 {offsets = [2, 0], sizes = [1, 128], strides = [1, 1]} : vector<3x128xf32> to vector<1x128xf32>
    %cst_64 = arith.constant dense<0.000000e+00> : vector<1x128xf32>
    %178 = tpu.matmul %8, %175, %cst_64 {dimension_numbers = #tpu.dot_dimension_numbers<[1], [0], [0], [1], [0, 0, 1, 1], [], []>} : vector<1x8xf32>, vector<8x128xf32>, vector<1x128xf32> -> vector<1x128xf32>
    %179 = arith.mulf %175, %175 : vector<8x128xf32>
    %cst_65 = arith.constant dense<0.000000e+00> : vector<1x128xf32>
    %180 = tpu.matmul %8, %179, %cst_65 {dimension_numbers = #tpu.dot_dimension_numbers<[1], [0], [0], [1], [0, 0, 1, 1], [], []>} : vector<1x8xf32>, vector<8x128xf32>, vector<1x128xf32> -> vector<1x128xf32>
    %181 = arith.mulf %178, %178 : vector<1x128xf32>
    %182 = arith.subf %180, %181 : vector<1x128xf32>
    %cst_66 = arith.constant 0.000000e+00 : f32
    %183 = vector.broadcast %cst_66 : f32 to vector<1x128xf32>
    %184 = arith.maximumf %182, %183 : vector<1x128xf32>
    %185 = vector.broadcast %178 : vector<1x128xf32> to vector<8x128xf32>
    %186 = arith.subf %175, %185 : vector<8x128xf32>
    %cst_67 = arith.constant 9.99999974E-6 : f32
    %187 = vector.broadcast %cst_67 : f32 to vector<1x128xf32>
    %188 = arith.addf %184, %187 : vector<1x128xf32>
    %189 = math.rsqrt %188 : vector<1x128xf32>
    %190 = vector.broadcast %189 : vector<1x128xf32> to vector<8x128xf32>
    %191 = arith.mulf %186, %190 : vector<8x128xf32>
    %192 = vector.broadcast %176 : vector<1x128xf32> to vector<8x128xf32>
    %193 = arith.mulf %191, %192 : vector<8x128xf32>
    %194 = vector.broadcast %177 : vector<1x128xf32> to vector<8x128xf32>
    %195 = arith.addf %193, %194 : vector<8x128xf32>
    %cst_68 = arith.constant 0.000000e+00 : f32
    %196 = vector.broadcast %cst_68 : f32 to vector<8x128xf32>
    %197 = arith.maximumf %195, %196 : vector<8x128xf32>
    %c6 = arith.constant 6 : index
    %c0_69 = arith.constant 0 : index
    %c0_70 = arith.constant 0 : index
    %198 = vector.load %arg4[%c6, %c0_69, %c0_70] : memref<9x128x128xbf16, #tpu.memory_space<vmem>>, vector<1x128x128xbf16>
    %199 = vector.shape_cast %198 : vector<1x128x128xbf16> to vector<128x128xbf16>
    %c6_71 = arith.constant 6 : index
    %c0_72 = arith.constant 0 : index
    %c0_73 = arith.constant 0 : index
    %200 = vector.load %arg5[%c6_71, %c0_72, %c0_73] : memref<9x3x128xf32, #tpu.memory_space<vmem>>, vector<1x3x128xf32>
    %201 = vector.shape_cast %200 : vector<1x3x128xf32> to vector<3x128xf32>
    %202 = arith.truncf %197 : vector<8x128xf32> to vector<8x128xbf16>
    %cst_74 = arith.constant dense<0.000000e+00> : vector<8x128xf32>
    %203 = tpu.matmul %202, %199, %cst_74 {dimension_numbers = #tpu.dot_dimension_numbers<[1], [0], [0], [1], [0, 0, 1, 1], [], []>} : vector<8x128xbf16>, vector<128x128xbf16>, vector<8x128xf32> -> vector<8x128xf32>
    %204 = vector.extract_strided_slice %201 {offsets = [0, 0], sizes = [1, 128], strides = [1, 1]} : vector<3x128xf32> to vector<1x128xf32>
    %205 = vector.broadcast %204 : vector<1x128xf32> to vector<8x128xf32>
    %206 = arith.addf %203, %205 : vector<8x128xf32>
    %207 = vector.extract_strided_slice %201 {offsets = [1, 0], sizes = [1, 128], strides = [1, 1]} : vector<3x128xf32> to vector<1x128xf32>
    %208 = vector.extract_strided_slice %201 {offsets = [2, 0], sizes = [1, 128], strides = [1, 1]} : vector<3x128xf32> to vector<1x128xf32>
    %cst_75 = arith.constant dense<0.000000e+00> : vector<1x128xf32>
    %209 = tpu.matmul %8, %206, %cst_75 {dimension_numbers = #tpu.dot_dimension_numbers<[1], [0], [0], [1], [0, 0, 1, 1], [], []>} : vector<1x8xf32>, vector<8x128xf32>, vector<1x128xf32> -> vector<1x128xf32>
    %210 = arith.mulf %206, %206 : vector<8x128xf32>
    %cst_76 = arith.constant dense<0.000000e+00> : vector<1x128xf32>
    %211 = tpu.matmul %8, %210, %cst_76 {dimension_numbers = #tpu.dot_dimension_numbers<[1], [0], [0], [1], [0, 0, 1, 1], [], []>} : vector<1x8xf32>, vector<8x128xf32>, vector<1x128xf32> -> vector<1x128xf32>
    %212 = arith.mulf %209, %209 : vector<1x128xf32>
    %213 = arith.subf %211, %212 : vector<1x128xf32>
    %cst_77 = arith.constant 0.000000e+00 : f32
    %214 = vector.broadcast %cst_77 : f32 to vector<1x128xf32>
    %215 = arith.maximumf %213, %214 : vector<1x128xf32>
    %216 = vector.broadcast %209 : vector<1x128xf32> to vector<8x128xf32>
    %217 = arith.subf %206, %216 : vector<8x128xf32>
    %cst_78 = arith.constant 9.99999974E-6 : f32
    %218 = vector.broadcast %cst_78 : f32 to vector<1x128xf32>
    %219 = arith.addf %215, %218 : vector<1x128xf32>
    %220 = math.rsqrt %219 : vector<1x128xf32>
    %221 = vector.broadcast %220 : vector<1x128xf32> to vector<8x128xf32>
    %222 = arith.mulf %217, %221 : vector<8x128xf32>
    %223 = vector.broadcast %207 : vector<1x128xf32> to vector<8x128xf32>
    %224 = arith.mulf %222, %223 : vector<8x128xf32>
    %225 = vector.broadcast %208 : vector<1x128xf32> to vector<8x128xf32>
    %226 = arith.addf %224, %225 : vector<8x128xf32>
    %227 = arith.addf %226, %166 : vector<8x128xf32>
    %cst_79 = arith.constant 0.000000e+00 : f32
    %228 = vector.broadcast %cst_79 : f32 to vector<8x128xf32>
    %229 = arith.maximumf %227, %228 : vector<8x128xf32>
    %c7 = arith.constant 7 : index
    %c0_80 = arith.constant 0 : index
    %c0_81 = arith.constant 0 : index
    %230 = vector.load %arg4[%c7, %c0_80, %c0_81] : memref<9x128x128xbf16, #tpu.memory_space<vmem>>, vector<1x128x128xbf16>
    %231 = vector.shape_cast %230 : vector<1x128x128xbf16> to vector<128x128xbf16>
    %c7_82 = arith.constant 7 : index
    %c0_83 = arith.constant 0 : index
    %c0_84 = arith.constant 0 : index
    %232 = vector.load %arg5[%c7_82, %c0_83, %c0_84] : memref<9x3x128xf32, #tpu.memory_space<vmem>>, vector<1x3x128xf32>
    %233 = vector.shape_cast %232 : vector<1x3x128xf32> to vector<3x128xf32>
    %234 = arith.truncf %229 : vector<8x128xf32> to vector<8x128xbf16>
    %cst_85 = arith.constant dense<0.000000e+00> : vector<8x128xf32>
    %235 = tpu.matmul %234, %231, %cst_85 {dimension_numbers = #tpu.dot_dimension_numbers<[1], [0], [0], [1], [0, 0, 1, 1], [], []>} : vector<8x128xbf16>, vector<128x128xbf16>, vector<8x128xf32> -> vector<8x128xf32>
    %236 = vector.extract_strided_slice %233 {offsets = [0, 0], sizes = [1, 128], strides = [1, 1]} : vector<3x128xf32> to vector<1x128xf32>
    %237 = vector.broadcast %236 : vector<1x128xf32> to vector<8x128xf32>
    %238 = arith.addf %235, %237 : vector<8x128xf32>
    %239 = vector.extract_strided_slice %233 {offsets = [1, 0], sizes = [1, 128], strides = [1, 1]} : vector<3x128xf32> to vector<1x128xf32>
    %240 = vector.extract_strided_slice %233 {offsets = [2, 0], sizes = [1, 128], strides = [1, 1]} : vector<3x128xf32> to vector<1x128xf32>
    %cst_86 = arith.constant dense<0.000000e+00> : vector<1x128xf32>
    %241 = tpu.matmul %8, %238, %cst_86 {dimension_numbers = #tpu.dot_dimension_numbers<[1], [0], [0], [1], [0, 0, 1, 1], [], []>} : vector<1x8xf32>, vector<8x128xf32>, vector<1x128xf32> -> vector<1x128xf32>
    %242 = arith.mulf %238, %238 : vector<8x128xf32>
    %cst_87 = arith.constant dense<0.000000e+00> : vector<1x128xf32>
    %243 = tpu.matmul %8, %242, %cst_87 {dimension_numbers = #tpu.dot_dimension_numbers<[1], [0], [0], [1], [0, 0, 1, 1], [], []>} : vector<1x8xf32>, vector<8x128xf32>, vector<1x128xf32> -> vector<1x128xf32>
    %244 = arith.mulf %241, %241 : vector<1x128xf32>
    %245 = arith.subf %243, %244 : vector<1x128xf32>
    %cst_88 = arith.constant 0.000000e+00 : f32
    %246 = vector.broadcast %cst_88 : f32 to vector<1x128xf32>
    %247 = arith.maximumf %245, %246 : vector<1x128xf32>
    %248 = vector.broadcast %241 : vector<1x128xf32> to vector<8x128xf32>
    %249 = arith.subf %238, %248 : vector<8x128xf32>
    %cst_89 = arith.constant 9.99999974E-6 : f32
    %250 = vector.broadcast %cst_89 : f32 to vector<1x128xf32>
    %251 = arith.addf %247, %250 : vector<1x128xf32>
    %252 = math.rsqrt %251 : vector<1x128xf32>
    %253 = vector.broadcast %252 : vector<1x128xf32> to vector<8x128xf32>
    %254 = arith.mulf %249, %253 : vector<8x128xf32>
    %255 = vector.broadcast %239 : vector<1x128xf32> to vector<8x128xf32>
    %256 = arith.mulf %254, %255 : vector<8x128xf32>
    %257 = vector.broadcast %240 : vector<1x128xf32> to vector<8x128xf32>
    %258 = arith.addf %256, %257 : vector<8x128xf32>
    %cst_90 = arith.constant 0.000000e+00 : f32
    %259 = vector.broadcast %cst_90 : f32 to vector<8x128xf32>
    %260 = arith.maximumf %258, %259 : vector<8x128xf32>
    %c8 = arith.constant 8 : index
    %c0_91 = arith.constant 0 : index
    %c0_92 = arith.constant 0 : index
    %261 = vector.load %arg4[%c8, %c0_91, %c0_92] : memref<9x128x128xbf16, #tpu.memory_space<vmem>>, vector<1x128x128xbf16>
    %262 = vector.shape_cast %261 : vector<1x128x128xbf16> to vector<128x128xbf16>
    %c8_93 = arith.constant 8 : index
    %c0_94 = arith.constant 0 : index
    %c0_95 = arith.constant 0 : index
    %263 = vector.load %arg5[%c8_93, %c0_94, %c0_95] : memref<9x3x128xf32, #tpu.memory_space<vmem>>, vector<1x3x128xf32>
    %264 = vector.shape_cast %263 : vector<1x3x128xf32> to vector<3x128xf32>
    %265 = arith.truncf %260 : vector<8x128xf32> to vector<8x128xbf16>
    %cst_96 = arith.constant dense<0.000000e+00> : vector<8x128xf32>
    %266 = tpu.matmul %265, %262, %cst_96 {dimension_numbers = #tpu.dot_dimension_numbers<[1], [0], [0], [1], [0, 0, 1, 1], [], []>} : vector<8x128xbf16>, vector<128x128xbf16>, vector<8x128xf32> -> vector<8x128xf32>
    %267 = vector.extract_strided_slice %264 {offsets = [0, 0], sizes = [1, 128], strides = [1, 1]} : vector<3x128xf32> to vector<1x128xf32>
    %268 = vector.broadcast %267 : vector<1x128xf32> to vector<8x128xf32>
    %269 = arith.addf %266, %268 : vector<8x128xf32>
    %270 = vector.extract_strided_slice %264 {offsets = [1, 0], sizes = [1, 128], strides = [1, 1]} : vector<3x128xf32> to vector<1x128xf32>
    %271 = vector.extract_strided_slice %264 {offsets = [2, 0], sizes = [1, 128], strides = [1, 1]} : vector<3x128xf32> to vector<1x128xf32>
    %cst_97 = arith.constant dense<0.000000e+00> : vector<1x128xf32>
    %272 = tpu.matmul %8, %269, %cst_97 {dimension_numbers = #tpu.dot_dimension_numbers<[1], [0], [0], [1], [0, 0, 1, 1], [], []>} : vector<1x8xf32>, vector<8x128xf32>, vector<1x128xf32> -> vector<1x128xf32>
    %273 = arith.mulf %269, %269 : vector<8x128xf32>
    %cst_98 = arith.constant dense<0.000000e+00> : vector<1x128xf32>
    %274 = tpu.matmul %8, %273, %cst_98 {dimension_numbers = #tpu.dot_dimension_numbers<[1], [0], [0], [1], [0, 0, 1, 1], [], []>} : vector<1x8xf32>, vector<8x128xf32>, vector<1x128xf32> -> vector<1x128xf32>
    %275 = arith.mulf %272, %272 : vector<1x128xf32>
    %276 = arith.subf %274, %275 : vector<1x128xf32>
    %cst_99 = arith.constant 0.000000e+00 : f32
    %277 = vector.broadcast %cst_99 : f32 to vector<1x128xf32>
    %278 = arith.maximumf %276, %277 : vector<1x128xf32>
    %279 = vector.broadcast %272 : vector<1x128xf32> to vector<8x128xf32>
    %280 = arith.subf %269, %279 : vector<8x128xf32>
    %cst_100 = arith.constant 9.99999974E-6 : f32
    %281 = vector.broadcast %cst_100 : f32 to vector<1x128xf32>
    %282 = arith.addf %278, %281 : vector<1x128xf32>
    %283 = math.rsqrt %282 : vector<1x128xf32>
    %284 = vector.broadcast %283 : vector<1x128xf32> to vector<8x128xf32>
    %285 = arith.mulf %280, %284 : vector<8x128xf32>
    %286 = vector.broadcast %270 : vector<1x128xf32> to vector<8x128xf32>
    %287 = arith.mulf %285, %286 : vector<8x128xf32>
    %288 = vector.broadcast %271 : vector<1x128xf32> to vector<8x128xf32>
    %289 = arith.addf %287, %288 : vector<8x128xf32>
    %290 = arith.addf %289, %229 : vector<8x128xf32>
    %cst_101 = arith.constant 0.000000e+00 : f32
    %291 = vector.broadcast %cst_101 : f32 to vector<8x128xf32>
    %292 = arith.maximumf %290, %291 : vector<8x128xf32>
    %c0_i32_102 = arith.constant 0 : i32
    %293 = tpu.memref_slice %arg18[%c0_i32_102] : memref<4x!tpu.dma_semaphore, #tpu.memory_space<semaphore_mem>> -> memref<1x!tpu.dma_semaphore, #tpu.memory_space<semaphore_mem>>
    %294 = tpu.memref_squeeze %293 : memref<1x!tpu.dma_semaphore, #tpu.memory_space<semaphore_mem>> -> memref<!tpu.dma_semaphore, #tpu.memory_space<semaphore_mem>>
    tpu.wait_dma2 semaphore(%294 : memref<!tpu.dma_semaphore, #tpu.memory_space<semaphore_mem>>) src(%arg6 : memref<6x128x512xbf16, #tpu.memory_space<any>>) dst(%arg14 : memref<6x128x512xbf16, #tpu.memory_space<vmem>>)
    %c1_i32_103 = arith.constant 1 : i32
    %295 = tpu.memref_slice %arg18[%c1_i32_103] : memref<4x!tpu.dma_semaphore, #tpu.memory_space<semaphore_mem>> -> memref<1x!tpu.dma_semaphore, #tpu.memory_space<semaphore_mem>>
    %296 = tpu.memref_squeeze %295 : memref<1x!tpu.dma_semaphore, #tpu.memory_space<semaphore_mem>> -> memref<!tpu.dma_semaphore, #tpu.memory_space<semaphore_mem>>
    tpu.wait_dma2 semaphore(%296 : memref<!tpu.dma_semaphore, #tpu.memory_space<semaphore_mem>>) src(%arg7 : memref<6x1x512xf32, #tpu.memory_space<any>>) dst(%arg15 : memref<6x1x512xf32, #tpu.memory_space<vmem>>)
    %c2_i32_104 = arith.constant 2 : i32
    %297 = tpu.memref_slice %arg18[%c2_i32_104] : memref<4x!tpu.dma_semaphore, #tpu.memory_space<semaphore_mem>> -> memref<1x!tpu.dma_semaphore, #tpu.memory_space<semaphore_mem>>
    %298 = tpu.memref_squeeze %297 : memref<1x!tpu.dma_semaphore, #tpu.memory_space<semaphore_mem>> -> memref<!tpu.dma_semaphore, #tpu.memory_space<semaphore_mem>>
    tpu.wait_dma2 semaphore(%298 : memref<!tpu.dma_semaphore, #tpu.memory_space<semaphore_mem>>) src(%arg8 : memref<6x2x128xf32, #tpu.memory_space<any>>) dst(%arg16 : memref<6x2x128xf32, #tpu.memory_space<vmem>>)
    %c0_105 = arith.constant 0 : index
    %c0_106 = arith.constant 0 : index
    %299 = vector.load %arg2[%c0_105, %c0_106] : memref<8x8xf32, #tpu.memory_space<vmem>>, vector<8x8xf32>
    %c0_107 = arith.constant 0 : index
    %c0_108 = arith.constant 0 : index
    %300 = vector.load %arg3[%c0_107, %c0_108] : memref<8x1xf32, #tpu.memory_space<vmem>>, vector<8x1xf32>
    %cst_109 = arith.constant 0.000000e+00 : f32
    %301 = vector.broadcast %cst_109 : f32 to vector<8x8xf32>
    %302 = arith.truncf %292 : vector<8x128xf32> to vector<8x128xbf16>
    %c0_110 = arith.constant 0 : index
    %c0_111 = arith.constant 0 : index
    %c0_112 = arith.constant 0 : index
    %303 = vector.load %arg14[%c0_110, %c0_111, %c0_112] : memref<6x128x512xbf16, #tpu.memory_space<vmem>>, vector<1x128x512xbf16>
    %304 = vector.shape_cast %303 : vector<1x128x512xbf16> to vector<128x512xbf16>
    %cst_113 = arith.constant dense<0.000000e+00> : vector<8x512xf32>
    %305 = tpu.matmul %302, %304, %cst_113 {dimension_numbers = #tpu.dot_dimension_numbers<[1], [0], [0], [1], [0, 0, 1, 1], [], []>} : vector<8x128xbf16>, vector<128x512xbf16>, vector<8x512xf32> -> vector<8x512xf32>
    %c0_114 = arith.constant 0 : index
    %c0_115 = arith.constant 0 : index
    %c0_116 = arith.constant 0 : index
    %306 = vector.load %arg15[%c0_114, %c0_115, %c0_116] : memref<6x1x512xf32, #tpu.memory_space<vmem>>, vector<1x1x512xf32>
    %307 = vector.shape_cast %306 : vector<1x1x512xf32> to vector<1x512xf32>
    %308 = vector.broadcast %307 : vector<1x512xf32> to vector<8x512xf32>
    %309 = arith.addf %305, %308 : vector<8x512xf32>
    %310 = vector.extract_strided_slice %309 {offsets = [0, 0], sizes = [8, 128], strides = [1, 1]} : vector<8x512xf32> to vector<8x128xf32>
    %311 = vector.extract_strided_slice %309 {offsets = [0, 128], sizes = [8, 128], strides = [1, 1]} : vector<8x512xf32> to vector<8x128xf32>
    %312 = vector.extract_strided_slice %309 {offsets = [0, 256], sizes = [8, 128], strides = [1, 1]} : vector<8x512xf32> to vector<8x128xf32>
    %313 = vector.extract_strided_slice %309 {offsets = [0, 384], sizes = [8, 128], strides = [1, 1]} : vector<8x512xf32> to vector<8x128xf32>
    %cst_117 = arith.constant dense<0.000000e+00> : vector<8x8xf32>
    %314 = tpu.matmul %310, %311, %cst_117 {dimension_numbers = #tpu.dot_dimension_numbers<[1], [1], [0], [0], [0, 0, 1, 0], [], []>} : vector<8x128xf32>, vector<8x128xf32>, vector<8x8xf32> -> vector<8x8xf32>
    %315 = arith.addf %314, %299 : vector<8x8xf32>
    %cst_118 = arith.constant dense<0xFF800000> : vector<8xf32>
    %316 = vector.multi_reduction <maximumf>, %315, %cst_118 [1] : vector<8x8xf32> to vector<8xf32>
    %317 = vector.shape_cast %316 : vector<8xf32> to vector<8x1xf32>
    %318 = vector.broadcast %317 : vector<8x1xf32> to vector<8x8xf32>
    %319 = arith.subf %315, %318 : vector<8x8xf32>
    %320 = math.exp %319 : vector<8x8xf32>
    %cst_119 = arith.constant dense<0.000000e+00> : vector<8xf32>
    %321 = vector.multi_reduction <add>, %320, %cst_119 [1] : vector<8x8xf32> to vector<8xf32>
    %322 = vector.shape_cast %321 : vector<8xf32> to vector<8x1xf32>
    %323 = tpu.reciprocal %322 {approx = true} : vector<8x1xf32> -> vector<8x1xf32>
    %324 = arith.mulf %300, %323 : vector<8x1xf32>
    %325 = vector.broadcast %324 : vector<8x1xf32> to vector<8x8xf32>
    %326 = arith.mulf %320, %325 : vector<8x8xf32>
    %cst_120 = arith.constant dense<0.000000e+00> : vector<8x128xf32>
    %327 = tpu.matmul %326, %312, %cst_120 {dimension_numbers = #tpu.dot_dimension_numbers<[1], [0], [0], [1], [0, 0, 1, 1], [], []>} : vector<8x8xf32>, vector<8x128xf32>, vector<8x128xf32> -> vector<8x128xf32>
    %328 = arith.addf %327, %313 : vector<8x128xf32>
    %c0_121 = arith.constant 0 : index
    %c0_122 = arith.constant 0 : index
    %c0_123 = arith.constant 0 : index
    %329 = vector.load %arg16[%c0_121, %c0_122, %c0_123] : memref<6x2x128xf32, #tpu.memory_space<vmem>>, vector<1x2x128xf32>
    %330 = vector.shape_cast %329 : vector<1x2x128xf32> to vector<2x128xf32>
    %331 = vector.extract_strided_slice %330 {offsets = [0, 0], sizes = [1, 128], strides = [1, 1]} : vector<2x128xf32> to vector<1x128xf32>
    %332 = vector.extract_strided_slice %330 {offsets = [1, 0], sizes = [1, 128], strides = [1, 1]} : vector<2x128xf32> to vector<1x128xf32>
    %cst_124 = arith.constant dense<0.000000e+00> : vector<1x128xf32>
    %333 = tpu.matmul %8, %328, %cst_124 {dimension_numbers = #tpu.dot_dimension_numbers<[1], [0], [0], [1], [0, 0, 1, 1], [], []>} : vector<1x8xf32>, vector<8x128xf32>, vector<1x128xf32> -> vector<1x128xf32>
    %334 = arith.mulf %328, %328 : vector<8x128xf32>
    %cst_125 = arith.constant dense<0.000000e+00> : vector<1x128xf32>
    %335 = tpu.matmul %8, %334, %cst_125 {dimension_numbers = #tpu.dot_dimension_numbers<[1], [0], [0], [1], [0, 0, 1, 1], [], []>} : vector<1x8xf32>, vector<8x128xf32>, vector<1x128xf32> -> vector<1x128xf32>
    %336 = arith.mulf %333, %333 : vector<1x128xf32>
    %337 = arith.subf %335, %336 : vector<1x128xf32>
    %cst_126 = arith.constant 0.000000e+00 : f32
    %338 = vector.broadcast %cst_126 : f32 to vector<1x128xf32>
    %339 = arith.maximumf %337, %338 : vector<1x128xf32>
    %340 = vector.broadcast %333 : vector<1x128xf32> to vector<8x128xf32>
    %341 = arith.subf %328, %340 : vector<8x128xf32>
    %cst_127 = arith.constant 9.99999974E-6 : f32
    %342 = vector.broadcast %cst_127 : f32 to vector<1x128xf32>
    %343 = arith.addf %339, %342 : vector<1x128xf32>
    %344 = math.rsqrt %343 : vector<1x128xf32>
    %345 = vector.broadcast %344 : vector<1x128xf32> to vector<8x128xf32>
    %346 = arith.mulf %341, %345 : vector<8x128xf32>
    %347 = vector.broadcast %331 : vector<1x128xf32> to vector<8x128xf32>
    %348 = arith.mulf %346, %347 : vector<8x128xf32>
    %349 = vector.broadcast %332 : vector<1x128xf32> to vector<8x128xf32>
    %350 = arith.addf %348, %349 : vector<8x128xf32>
    %cst_128 = arith.constant 0.000000e+00 : f32
    %351 = vector.broadcast %cst_128 : f32 to vector<8x128xf32>
    %352 = arith.maximumf %350, %351 : vector<8x128xf32>
    %353 = arith.truncf %352 : vector<8x128xf32> to vector<8x128xbf16>
    %c1_129 = arith.constant 1 : index
    %c0_130 = arith.constant 0 : index
    %c0_131 = arith.constant 0 : index
    %354 = vector.load %arg14[%c1_129, %c0_130, %c0_131] : memref<6x128x512xbf16, #tpu.memory_space<vmem>>, vector<1x128x512xbf16>
    %355 = vector.shape_cast %354 : vector<1x128x512xbf16> to vector<128x512xbf16>
    %cst_132 = arith.constant dense<0.000000e+00> : vector<8x512xf32>
    %356 = tpu.matmul %353, %355, %cst_132 {dimension_numbers = #tpu.dot_dimension_numbers<[1], [0], [0], [1], [0, 0, 1, 1], [], []>} : vector<8x128xbf16>, vector<128x512xbf16>, vector<8x512xf32> -> vector<8x512xf32>
    %c1_133 = arith.constant 1 : index
    %c0_134 = arith.constant 0 : index
    %c0_135 = arith.constant 0 : index
    %357 = vector.load %arg15[%c1_133, %c0_134, %c0_135] : memref<6x1x512xf32, #tpu.memory_space<vmem>>, vector<1x1x512xf32>
    %358 = vector.shape_cast %357 : vector<1x1x512xf32> to vector<1x512xf32>
    %359 = vector.broadcast %358 : vector<1x512xf32> to vector<8x512xf32>
    %360 = arith.addf %356, %359 : vector<8x512xf32>
    %361 = vector.extract_strided_slice %360 {offsets = [0, 0], sizes = [8, 128], strides = [1, 1]} : vector<8x512xf32> to vector<8x128xf32>
    %362 = vector.extract_strided_slice %360 {offsets = [0, 128], sizes = [8, 128], strides = [1, 1]} : vector<8x512xf32> to vector<8x128xf32>
    %363 = vector.extract_strided_slice %360 {offsets = [0, 256], sizes = [8, 128], strides = [1, 1]} : vector<8x512xf32> to vector<8x128xf32>
    %364 = vector.extract_strided_slice %360 {offsets = [0, 384], sizes = [8, 128], strides = [1, 1]} : vector<8x512xf32> to vector<8x128xf32>
    %cst_136 = arith.constant dense<0.000000e+00> : vector<8x8xf32>
    %365 = tpu.matmul %361, %362, %cst_136 {dimension_numbers = #tpu.dot_dimension_numbers<[1], [1], [0], [0], [0, 0, 1, 0], [], []>} : vector<8x128xf32>, vector<8x128xf32>, vector<8x8xf32> -> vector<8x8xf32>
    %366 = arith.addf %365, %299 : vector<8x8xf32>
    %cst_137 = arith.constant dense<0xFF800000> : vector<8xf32>
    %367 = vector.multi_reduction <maximumf>, %366, %cst_137 [1] : vector<8x8xf32> to vector<8xf32>
    %368 = vector.shape_cast %367 : vector<8xf32> to vector<8x1xf32>
    %369 = vector.broadcast %368 : vector<8x1xf32> to vector<8x8xf32>
    %370 = arith.subf %366, %369 : vector<8x8xf32>
    %371 = math.exp %370 : vector<8x8xf32>
    %cst_138 = arith.constant dense<0.000000e+00> : vector<8xf32>
    %372 = vector.multi_reduction <add>, %371, %cst_138 [1] : vector<8x8xf32> to vector<8xf32>
    %373 = vector.shape_cast %372 : vector<8xf32> to vector<8x1xf32>
    %374 = tpu.reciprocal %373 {approx = true} : vector<8x1xf32> -> vector<8x1xf32>
    %375 = arith.mulf %300, %374 : vector<8x1xf32>
    %376 = vector.broadcast %375 : vector<8x1xf32> to vector<8x8xf32>
    %377 = arith.mulf %371, %376 : vector<8x8xf32>
    %cst_139 = arith.constant dense<0.000000e+00> : vector<8x128xf32>
    %378 = tpu.matmul %377, %363, %cst_139 {dimension_numbers = #tpu.dot_dimension_numbers<[1], [0], [0], [1], [0, 0, 1, 1], [], []>} : vector<8x8xf32>, vector<8x128xf32>, vector<8x128xf32> -> vector<8x128xf32>
    %379 = arith.addf %378, %364 : vector<8x128xf32>
    %c1_140 = arith.constant 1 : index
    %c0_141 = arith.constant 0 : index
    %c0_142 = arith.constant 0 : index
    %380 = vector.load %arg16[%c1_140, %c0_141, %c0_142] : memref<6x2x128xf32, #tpu.memory_space<vmem>>, vector<1x2x128xf32>
    %381 = vector.shape_cast %380 : vector<1x2x128xf32> to vector<2x128xf32>
    %382 = vector.extract_strided_slice %381 {offsets = [0, 0], sizes = [1, 128], strides = [1, 1]} : vector<2x128xf32> to vector<1x128xf32>
    %383 = vector.extract_strided_slice %381 {offsets = [1, 0], sizes = [1, 128], strides = [1, 1]} : vector<2x128xf32> to vector<1x128xf32>
    %cst_143 = arith.constant dense<0.000000e+00> : vector<1x128xf32>
    %384 = tpu.matmul %8, %379, %cst_143 {dimension_numbers = #tpu.dot_dimension_numbers<[1], [0], [0], [1], [0, 0, 1, 1], [], []>} : vector<1x8xf32>, vector<8x128xf32>, vector<1x128xf32> -> vector<1x128xf32>
    %385 = arith.mulf %379, %379 : vector<8x128xf32>
    %cst_144 = arith.constant dense<0.000000e+00> : vector<1x128xf32>
    %386 = tpu.matmul %8, %385, %cst_144 {dimension_numbers = #tpu.dot_dimension_numbers<[1], [0], [0], [1], [0, 0, 1, 1], [], []>} : vector<1x8xf32>, vector<8x128xf32>, vector<1x128xf32> -> vector<1x128xf32>
    %387 = arith.mulf %384, %384 : vector<1x128xf32>
    %388 = arith.subf %386, %387 : vector<1x128xf32>
    %cst_145 = arith.constant 0.000000e+00 : f32
    %389 = vector.broadcast %cst_145 : f32 to vector<1x128xf32>
    %390 = arith.maximumf %388, %389 : vector<1x128xf32>
    %391 = vector.broadcast %384 : vector<1x128xf32> to vector<8x128xf32>
    %392 = arith.subf %379, %391 : vector<8x128xf32>
    %cst_146 = arith.constant 9.99999974E-6 : f32
    %393 = vector.broadcast %cst_146 : f32 to vector<1x128xf32>
    %394 = arith.addf %390, %393 : vector<1x128xf32>
    %395 = math.rsqrt %394 : vector<1x128xf32>
    %396 = vector.broadcast %395 : vector<1x128xf32> to vector<8x128xf32>
    %397 = arith.mulf %392, %396 : vector<8x128xf32>
    %398 = vector.broadcast %382 : vector<1x128xf32> to vector<8x128xf32>
    %399 = arith.mulf %397, %398 : vector<8x128xf32>
    %400 = vector.broadcast %383 : vector<1x128xf32> to vector<8x128xf32>
    %401 = arith.addf %399, %400 : vector<8x128xf32>
    %402 = arith.addf %401, %292 : vector<8x128xf32>
    %cst_147 = arith.constant 0.000000e+00 : f32
    %403 = vector.broadcast %cst_147 : f32 to vector<8x128xf32>
    %404 = arith.maximumf %402, %403 : vector<8x128xf32>
    %405 = arith.addf %301, %326 : vector<8x8xf32>
    %406 = arith.addf %405, %377 : vector<8x8xf32>
    %407 = arith.truncf %404 : vector<8x128xf32> to vector<8x128xbf16>
    %c2_148 = arith.constant 2 : index
    %c0_149 = arith.constant 0 : index
    %c0_150 = arith.constant 0 : index
    %408 = vector.load %arg14[%c2_148, %c0_149, %c0_150] : memref<6x128x512xbf16, #tpu.memory_space<vmem>>, vector<1x128x512xbf16>
    %409 = vector.shape_cast %408 : vector<1x128x512xbf16> to vector<128x512xbf16>
    %cst_151 = arith.constant dense<0.000000e+00> : vector<8x512xf32>
    %410 = tpu.matmul %407, %409, %cst_151 {dimension_numbers = #tpu.dot_dimension_numbers<[1], [0], [0], [1], [0, 0, 1, 1], [], []>} : vector<8x128xbf16>, vector<128x512xbf16>, vector<8x512xf32> -> vector<8x512xf32>
    %c2_152 = arith.constant 2 : index
    %c0_153 = arith.constant 0 : index
    %c0_154 = arith.constant 0 : index
    %411 = vector.load %arg15[%c2_152, %c0_153, %c0_154] : memref<6x1x512xf32, #tpu.memory_space<vmem>>, vector<1x1x512xf32>
    %412 = vector.shape_cast %411 : vector<1x1x512xf32> to vector<1x512xf32>
    %413 = vector.broadcast %412 : vector<1x512xf32> to vector<8x512xf32>
    %414 = arith.addf %410, %413 : vector<8x512xf32>
    %415 = vector.extract_strided_slice %414 {offsets = [0, 0], sizes = [8, 128], strides = [1, 1]} : vector<8x512xf32> to vector<8x128xf32>
    %416 = vector.extract_strided_slice %414 {offsets = [0, 128], sizes = [8, 128], strides = [1, 1]} : vector<8x512xf32> to vector<8x128xf32>
    %417 = vector.extract_strided_slice %414 {offsets = [0, 256], sizes = [8, 128], strides = [1, 1]} : vector<8x512xf32> to vector<8x128xf32>
    %418 = vector.extract_strided_slice %414 {offsets = [0, 384], sizes = [8, 128], strides = [1, 1]} : vector<8x512xf32> to vector<8x128xf32>
    %cst_155 = arith.constant dense<0.000000e+00> : vector<8x8xf32>
    %419 = tpu.matmul %415, %416, %cst_155 {dimension_numbers = #tpu.dot_dimension_numbers<[1], [1], [0], [0], [0, 0, 1, 0], [], []>} : vector<8x128xf32>, vector<8x128xf32>, vector<8x8xf32> -> vector<8x8xf32>
    %420 = arith.addf %419, %299 : vector<8x8xf32>
    %cst_156 = arith.constant dense<0xFF800000> : vector<8xf32>
    %421 = vector.multi_reduction <maximumf>, %420, %cst_156 [1] : vector<8x8xf32> to vector<8xf32>
    %422 = vector.shape_cast %421 : vector<8xf32> to vector<8x1xf32>
    %423 = vector.broadcast %422 : vector<8x1xf32> to vector<8x8xf32>
    %424 = arith.subf %420, %423 : vector<8x8xf32>
    %425 = math.exp %424 : vector<8x8xf32>
    %cst_157 = arith.constant dense<0.000000e+00> : vector<8xf32>
    %426 = vector.multi_reduction <add>, %425, %cst_157 [1] : vector<8x8xf32> to vector<8xf32>
    %427 = vector.shape_cast %426 : vector<8xf32> to vector<8x1xf32>
    %428 = tpu.reciprocal %427 {approx = true} : vector<8x1xf32> -> vector<8x1xf32>
    %429 = arith.mulf %300, %428 : vector<8x1xf32>
    %430 = vector.broadcast %429 : vector<8x1xf32> to vector<8x8xf32>
    %431 = arith.mulf %425, %430 : vector<8x8xf32>
    %cst_158 = arith.constant dense<0.000000e+00> : vector<8x128xf32>
    %432 = tpu.matmul %431, %417, %cst_158 {dimension_numbers = #tpu.dot_dimension_numbers<[1], [0], [0], [1], [0, 0, 1, 1], [], []>} : vector<8x8xf32>, vector<8x128xf32>, vector<8x128xf32> -> vector<8x128xf32>
    %433 = arith.addf %432, %418 : vector<8x128xf32>
    %c2_159 = arith.constant 2 : index
    %c0_160 = arith.constant 0 : index
    %c0_161 = arith.constant 0 : index
    %434 = vector.load %arg16[%c2_159, %c0_160, %c0_161] : memref<6x2x128xf32, #tpu.memory_space<vmem>>, vector<1x2x128xf32>
    %435 = vector.shape_cast %434 : vector<1x2x128xf32> to vector<2x128xf32>
    %436 = vector.extract_strided_slice %435 {offsets = [0, 0], sizes = [1, 128], strides = [1, 1]} : vector<2x128xf32> to vector<1x128xf32>
    %437 = vector.extract_strided_slice %435 {offsets = [1, 0], sizes = [1, 128], strides = [1, 1]} : vector<2x128xf32> to vector<1x128xf32>
    %cst_162 = arith.constant dense<0.000000e+00> : vector<1x128xf32>
    %438 = tpu.matmul %8, %433, %cst_162 {dimension_numbers = #tpu.dot_dimension_numbers<[1], [0], [0], [1], [0, 0, 1, 1], [], []>} : vector<1x8xf32>, vector<8x128xf32>, vector<1x128xf32> -> vector<1x128xf32>
    %439 = arith.mulf %433, %433 : vector<8x128xf32>
    %cst_163 = arith.constant dense<0.000000e+00> : vector<1x128xf32>
    %440 = tpu.matmul %8, %439, %cst_163 {dimension_numbers = #tpu.dot_dimension_numbers<[1], [0], [0], [1], [0, 0, 1, 1], [], []>} : vector<1x8xf32>, vector<8x128xf32>, vector<1x128xf32> -> vector<1x128xf32>
    %441 = arith.mulf %438, %438 : vector<1x128xf32>
    %442 = arith.subf %440, %441 : vector<1x128xf32>
    %cst_164 = arith.constant 0.000000e+00 : f32
    %443 = vector.broadcast %cst_164 : f32 to vector<1x128xf32>
    %444 = arith.maximumf %442, %443 : vector<1x128xf32>
    %445 = vector.broadcast %438 : vector<1x128xf32> to vector<8x128xf32>
    %446 = arith.subf %433, %445 : vector<8x128xf32>
    %cst_165 = arith.constant 9.99999974E-6 : f32
    %447 = vector.broadcast %cst_165 : f32 to vector<1x128xf32>
    %448 = arith.addf %444, %447 : vector<1x128xf32>
    %449 = math.rsqrt %448 : vector<1x128xf32>
    %450 = vector.broadcast %449 : vector<1x128xf32> to vector<8x128xf32>
    %451 = arith.mulf %446, %450 : vector<8x128xf32>
    %452 = vector.broadcast %436 : vector<1x128xf32> to vector<8x128xf32>
    %453 = arith.mulf %451, %452 : vector<8x128xf32>
    %454 = vector.broadcast %437 : vector<1x128xf32> to vector<8x128xf32>
    %455 = arith.addf %453, %454 : vector<8x128xf32>
    %cst_166 = arith.constant 0.000000e+00 : f32
    %456 = vector.broadcast %cst_166 : f32 to vector<8x128xf32>
    %457 = arith.maximumf %455, %456 : vector<8x128xf32>
    %458 = arith.truncf %457 : vector<8x128xf32> to vector<8x128xbf16>
    %c3_167 = arith.constant 3 : index
    %c0_168 = arith.constant 0 : index
    %c0_169 = arith.constant 0 : index
    %459 = vector.load %arg14[%c3_167, %c0_168, %c0_169] : memref<6x128x512xbf16, #tpu.memory_space<vmem>>, vector<1x128x512xbf16>
    %460 = vector.shape_cast %459 : vector<1x128x512xbf16> to vector<128x512xbf16>
    %cst_170 = arith.constant dense<0.000000e+00> : vector<8x512xf32>
    %461 = tpu.matmul %458, %460, %cst_170 {dimension_numbers = #tpu.dot_dimension_numbers<[1], [0], [0], [1], [0, 0, 1, 1], [], []>} : vector<8x128xbf16>, vector<128x512xbf16>, vector<8x512xf32> -> vector<8x512xf32>
    %c3_171 = arith.constant 3 : index
    %c0_172 = arith.constant 0 : index
    %c0_173 = arith.constant 0 : index
    %462 = vector.load %arg15[%c3_171, %c0_172, %c0_173] : memref<6x1x512xf32, #tpu.memory_space<vmem>>, vector<1x1x512xf32>
    %463 = vector.shape_cast %462 : vector<1x1x512xf32> to vector<1x512xf32>
    %464 = vector.broadcast %463 : vector<1x512xf32> to vector<8x512xf32>
    %465 = arith.addf %461, %464 : vector<8x512xf32>
    %466 = vector.extract_strided_slice %465 {offsets = [0, 0], sizes = [8, 128], strides = [1, 1]} : vector<8x512xf32> to vector<8x128xf32>
    %467 = vector.extract_strided_slice %465 {offsets = [0, 128], sizes = [8, 128], strides = [1, 1]} : vector<8x512xf32> to vector<8x128xf32>
    %468 = vector.extract_strided_slice %465 {offsets = [0, 256], sizes = [8, 128], strides = [1, 1]} : vector<8x512xf32> to vector<8x128xf32>
    %469 = vector.extract_strided_slice %465 {offsets = [0, 384], sizes = [8, 128], strides = [1, 1]} : vector<8x512xf32> to vector<8x128xf32>
    %cst_174 = arith.constant dense<0.000000e+00> : vector<8x8xf32>
    %470 = tpu.matmul %466, %467, %cst_174 {dimension_numbers = #tpu.dot_dimension_numbers<[1], [1], [0], [0], [0, 0, 1, 0], [], []>} : vector<8x128xf32>, vector<8x128xf32>, vector<8x8xf32> -> vector<8x8xf32>
    %471 = arith.addf %470, %299 : vector<8x8xf32>
    %cst_175 = arith.constant dense<0xFF800000> : vector<8xf32>
    %472 = vector.multi_reduction <maximumf>, %471, %cst_175 [1] : vector<8x8xf32> to vector<8xf32>
    %473 = vector.shape_cast %472 : vector<8xf32> to vector<8x1xf32>
    %474 = vector.broadcast %473 : vector<8x1xf32> to vector<8x8xf32>
    %475 = arith.subf %471, %474 : vector<8x8xf32>
    %476 = math.exp %475 : vector<8x8xf32>
    %cst_176 = arith.constant dense<0.000000e+00> : vector<8xf32>
    %477 = vector.multi_reduction <add>, %476, %cst_176 [1] : vector<8x8xf32> to vector<8xf32>
    %478 = vector.shape_cast %477 : vector<8xf32> to vector<8x1xf32>
    %479 = tpu.reciprocal %478 {approx = true} : vector<8x1xf32> -> vector<8x1xf32>
    %480 = arith.mulf %300, %479 : vector<8x1xf32>
    %481 = vector.broadcast %480 : vector<8x1xf32> to vector<8x8xf32>
    %482 = arith.mulf %476, %481 : vector<8x8xf32>
    %cst_177 = arith.constant dense<0.000000e+00> : vector<8x128xf32>
    %483 = tpu.matmul %482, %468, %cst_177 {dimension_numbers = #tpu.dot_dimension_numbers<[1], [0], [0], [1], [0, 0, 1, 1], [], []>} : vector<8x8xf32>, vector<8x128xf32>, vector<8x128xf32> -> vector<8x128xf32>
    %484 = arith.addf %483, %469 : vector<8x128xf32>
    %c3_178 = arith.constant 3 : index
    %c0_179 = arith.constant 0 : index
    %c0_180 = arith.constant 0 : index
    %485 = vector.load %arg16[%c3_178, %c0_179, %c0_180] : memref<6x2x128xf32, #tpu.memory_space<vmem>>, vector<1x2x128xf32>
    %486 = vector.shape_cast %485 : vector<1x2x128xf32> to vector<2x128xf32>
    %487 = vector.extract_strided_slice %486 {offsets = [0, 0], sizes = [1, 128], strides = [1, 1]} : vector<2x128xf32> to vector<1x128xf32>
    %488 = vector.extract_strided_slice %486 {offsets = [1, 0], sizes = [1, 128], strides = [1, 1]} : vector<2x128xf32> to vector<1x128xf32>
    %cst_181 = arith.constant dense<0.000000e+00> : vector<1x128xf32>
    %489 = tpu.matmul %8, %484, %cst_181 {dimension_numbers = #tpu.dot_dimension_numbers<[1], [0], [0], [1], [0, 0, 1, 1], [], []>} : vector<1x8xf32>, vector<8x128xf32>, vector<1x128xf32> -> vector<1x128xf32>
    %490 = arith.mulf %484, %484 : vector<8x128xf32>
    %cst_182 = arith.constant dense<0.000000e+00> : vector<1x128xf32>
    %491 = tpu.matmul %8, %490, %cst_182 {dimension_numbers = #tpu.dot_dimension_numbers<[1], [0], [0], [1], [0, 0, 1, 1], [], []>} : vector<1x8xf32>, vector<8x128xf32>, vector<1x128xf32> -> vector<1x128xf32>
    %492 = arith.mulf %489, %489 : vector<1x128xf32>
    %493 = arith.subf %491, %492 : vector<1x128xf32>
    %cst_183 = arith.constant 0.000000e+00 : f32
    %494 = vector.broadcast %cst_183 : f32 to vector<1x128xf32>
    %495 = arith.maximumf %493, %494 : vector<1x128xf32>
    %496 = vector.broadcast %489 : vector<1x128xf32> to vector<8x128xf32>
    %497 = arith.subf %484, %496 : vector<8x128xf32>
    %cst_184 = arith.constant 9.99999974E-6 : f32
    %498 = vector.broadcast %cst_184 : f32 to vector<1x128xf32>
    %499 = arith.addf %495, %498 : vector<1x128xf32>
    %500 = math.rsqrt %499 : vector<1x128xf32>
    %501 = vector.broadcast %500 : vector<1x128xf32> to vector<8x128xf32>
    %502 = arith.mulf %497, %501 : vector<8x128xf32>
    %503 = vector.broadcast %487 : vector<1x128xf32> to vector<8x128xf32>
    %504 = arith.mulf %502, %503 : vector<8x128xf32>
    %505 = vector.broadcast %488 : vector<1x128xf32> to vector<8x128xf32>
    %506 = arith.addf %504, %505 : vector<8x128xf32>
    %507 = arith.addf %506, %404 : vector<8x128xf32>
    %cst_185 = arith.constant 0.000000e+00 : f32
    %508 = vector.broadcast %cst_185 : f32 to vector<8x128xf32>
    %509 = arith.maximumf %507, %508 : vector<8x128xf32>
    %510 = arith.addf %406, %431 : vector<8x8xf32>
    %511 = arith.addf %510, %482 : vector<8x8xf32>
    %512 = arith.truncf %509 : vector<8x128xf32> to vector<8x128xbf16>
    %c4_186 = arith.constant 4 : index
    %c0_187 = arith.constant 0 : index
    %c0_188 = arith.constant 0 : index
    %513 = vector.load %arg14[%c4_186, %c0_187, %c0_188] : memref<6x128x512xbf16, #tpu.memory_space<vmem>>, vector<1x128x512xbf16>
    %514 = vector.shape_cast %513 : vector<1x128x512xbf16> to vector<128x512xbf16>
    %cst_189 = arith.constant dense<0.000000e+00> : vector<8x512xf32>
    %515 = tpu.matmul %512, %514, %cst_189 {dimension_numbers = #tpu.dot_dimension_numbers<[1], [0], [0], [1], [0, 0, 1, 1], [], []>} : vector<8x128xbf16>, vector<128x512xbf16>, vector<8x512xf32> -> vector<8x512xf32>
    %c4_190 = arith.constant 4 : index
    %c0_191 = arith.constant 0 : index
    %c0_192 = arith.constant 0 : index
    %516 = vector.load %arg15[%c4_190, %c0_191, %c0_192] : memref<6x1x512xf32, #tpu.memory_space<vmem>>, vector<1x1x512xf32>
    %517 = vector.shape_cast %516 : vector<1x1x512xf32> to vector<1x512xf32>
    %518 = vector.broadcast %517 : vector<1x512xf32> to vector<8x512xf32>
    %519 = arith.addf %515, %518 : vector<8x512xf32>
    %520 = vector.extract_strided_slice %519 {offsets = [0, 0], sizes = [8, 128], strides = [1, 1]} : vector<8x512xf32> to vector<8x128xf32>
    %521 = vector.extract_strided_slice %519 {offsets = [0, 128], sizes = [8, 128], strides = [1, 1]} : vector<8x512xf32> to vector<8x128xf32>
    %522 = vector.extract_strided_slice %519 {offsets = [0, 256], sizes = [8, 128], strides = [1, 1]} : vector<8x512xf32> to vector<8x128xf32>
    %523 = vector.extract_strided_slice %519 {offsets = [0, 384], sizes = [8, 128], strides = [1, 1]} : vector<8x512xf32> to vector<8x128xf32>
    %cst_193 = arith.constant dense<0.000000e+00> : vector<8x8xf32>
    %524 = tpu.matmul %520, %521, %cst_193 {dimension_numbers = #tpu.dot_dimension_numbers<[1], [1], [0], [0], [0, 0, 1, 0], [], []>} : vector<8x128xf32>, vector<8x128xf32>, vector<8x8xf32> -> vector<8x8xf32>
    %525 = arith.addf %524, %299 : vector<8x8xf32>
    %cst_194 = arith.constant dense<0xFF800000> : vector<8xf32>
    %526 = vector.multi_reduction <maximumf>, %525, %cst_194 [1] : vector<8x8xf32> to vector<8xf32>
    %527 = vector.shape_cast %526 : vector<8xf32> to vector<8x1xf32>
    %528 = vector.broadcast %527 : vector<8x1xf32> to vector<8x8xf32>
    %529 = arith.subf %525, %528 : vector<8x8xf32>
    %530 = math.exp %529 : vector<8x8xf32>
    %cst_195 = arith.constant dense<0.000000e+00> : vector<8xf32>
    %531 = vector.multi_reduction <add>, %530, %cst_195 [1] : vector<8x8xf32> to vector<8xf32>
    %532 = vector.shape_cast %531 : vector<8xf32> to vector<8x1xf32>
    %533 = tpu.reciprocal %532 {approx = true} : vector<8x1xf32> -> vector<8x1xf32>
    %534 = arith.mulf %300, %533 : vector<8x1xf32>
    %535 = vector.broadcast %534 : vector<8x1xf32> to vector<8x8xf32>
    %536 = arith.mulf %530, %535 : vector<8x8xf32>
    %cst_196 = arith.constant dense<0.000000e+00> : vector<8x128xf32>
    %537 = tpu.matmul %536, %522, %cst_196 {dimension_numbers = #tpu.dot_dimension_numbers<[1], [0], [0], [1], [0, 0, 1, 1], [], []>} : vector<8x8xf32>, vector<8x128xf32>, vector<8x128xf32> -> vector<8x128xf32>
    %538 = arith.addf %537, %523 : vector<8x128xf32>
    %c4_197 = arith.constant 4 : index
    %c0_198 = arith.constant 0 : index
    %c0_199 = arith.constant 0 : index
    %539 = vector.load %arg16[%c4_197, %c0_198, %c0_199] : memref<6x2x128xf32, #tpu.memory_space<vmem>>, vector<1x2x128xf32>
    %540 = vector.shape_cast %539 : vector<1x2x128xf32> to vector<2x128xf32>
    %541 = vector.extract_strided_slice %540 {offsets = [0, 0], sizes = [1, 128], strides = [1, 1]} : vector<2x128xf32> to vector<1x128xf32>
    %542 = vector.extract_strided_slice %540 {offsets = [1, 0], sizes = [1, 128], strides = [1, 1]} : vector<2x128xf32> to vector<1x128xf32>
    %cst_200 = arith.constant dense<0.000000e+00> : vector<1x128xf32>
    %543 = tpu.matmul %8, %538, %cst_200 {dimension_numbers = #tpu.dot_dimension_numbers<[1], [0], [0], [1], [0, 0, 1, 1], [], []>} : vector<1x8xf32>, vector<8x128xf32>, vector<1x128xf32> -> vector<1x128xf32>
    %544 = arith.mulf %538, %538 : vector<8x128xf32>
    %cst_201 = arith.constant dense<0.000000e+00> : vector<1x128xf32>
    %545 = tpu.matmul %8, %544, %cst_201 {dimension_numbers = #tpu.dot_dimension_numbers<[1], [0], [0], [1], [0, 0, 1, 1], [], []>} : vector<1x8xf32>, vector<8x128xf32>, vector<1x128xf32> -> vector<1x128xf32>
    %546 = arith.mulf %543, %543 : vector<1x128xf32>
    %547 = arith.subf %545, %546 : vector<1x128xf32>
    %cst_202 = arith.constant 0.000000e+00 : f32
    %548 = vector.broadcast %cst_202 : f32 to vector<1x128xf32>
    %549 = arith.maximumf %547, %548 : vector<1x128xf32>
    %550 = vector.broadcast %543 : vector<1x128xf32> to vector<8x128xf32>
    %551 = arith.subf %538, %550 : vector<8x128xf32>
    %cst_203 = arith.constant 9.99999974E-6 : f32
    %552 = vector.broadcast %cst_203 : f32 to vector<1x128xf32>
    %553 = arith.addf %549, %552 : vector<1x128xf32>
    %554 = math.rsqrt %553 : vector<1x128xf32>
    %555 = vector.broadcast %554 : vector<1x128xf32> to vector<8x128xf32>
    %556 = arith.mulf %551, %555 : vector<8x128xf32>
    %557 = vector.broadcast %541 : vector<1x128xf32> to vector<8x128xf32>
    %558 = arith.mulf %556, %557 : vector<8x128xf32>
    %559 = vector.broadcast %542 : vector<1x128xf32> to vector<8x128xf32>
    %560 = arith.addf %558, %559 : vector<8x128xf32>
    %cst_204 = arith.constant 0.000000e+00 : f32
    %561 = vector.broadcast %cst_204 : f32 to vector<8x128xf32>
    %562 = arith.maximumf %560, %561 : vector<8x128xf32>
    %563 = arith.truncf %562 : vector<8x128xf32> to vector<8x128xbf16>
    %c5_205 = arith.constant 5 : index
    %c0_206 = arith.constant 0 : index
    %c0_207 = arith.constant 0 : index
    %564 = vector.load %arg14[%c5_205, %c0_206, %c0_207] : memref<6x128x512xbf16, #tpu.memory_space<vmem>>, vector<1x128x512xbf16>
    %565 = vector.shape_cast %564 : vector<1x128x512xbf16> to vector<128x512xbf16>
    %cst_208 = arith.constant dense<0.000000e+00> : vector<8x512xf32>
    %566 = tpu.matmul %563, %565, %cst_208 {dimension_numbers = #tpu.dot_dimension_numbers<[1], [0], [0], [1], [0, 0, 1, 1], [], []>} : vector<8x128xbf16>, vector<128x512xbf16>, vector<8x512xf32> -> vector<8x512xf32>
    %c5_209 = arith.constant 5 : index
    %c0_210 = arith.constant 0 : index
    %c0_211 = arith.constant 0 : index
    %567 = vector.load %arg15[%c5_209, %c0_210, %c0_211] : memref<6x1x512xf32, #tpu.memory_space<vmem>>, vector<1x1x512xf32>
    %568 = vector.shape_cast %567 : vector<1x1x512xf32> to vector<1x512xf32>
    %569 = vector.broadcast %568 : vector<1x512xf32> to vector<8x512xf32>
    %570 = arith.addf %566, %569 : vector<8x512xf32>
    %571 = vector.extract_strided_slice %570 {offsets = [0, 0], sizes = [8, 128], strides = [1, 1]} : vector<8x512xf32> to vector<8x128xf32>
    %572 = vector.extract_strided_slice %570 {offsets = [0, 128], sizes = [8, 128], strides = [1, 1]} : vector<8x512xf32> to vector<8x128xf32>
    %573 = vector.extract_strided_slice %570 {offsets = [0, 256], sizes = [8, 128], strides = [1, 1]} : vector<8x512xf32> to vector<8x128xf32>
    %574 = vector.extract_strided_slice %570 {offsets = [0, 384], sizes = [8, 128], strides = [1, 1]} : vector<8x512xf32> to vector<8x128xf32>
    %cst_212 = arith.constant dense<0.000000e+00> : vector<8x8xf32>
    %575 = tpu.matmul %571, %572, %cst_212 {dimension_numbers = #tpu.dot_dimension_numbers<[1], [1], [0], [0], [0, 0, 1, 0], [], []>} : vector<8x128xf32>, vector<8x128xf32>, vector<8x8xf32> -> vector<8x8xf32>
    %576 = arith.addf %575, %299 : vector<8x8xf32>
    %cst_213 = arith.constant dense<0xFF800000> : vector<8xf32>
    %577 = vector.multi_reduction <maximumf>, %576, %cst_213 [1] : vector<8x8xf32> to vector<8xf32>
    %578 = vector.shape_cast %577 : vector<8xf32> to vector<8x1xf32>
    %579 = vector.broadcast %578 : vector<8x1xf32> to vector<8x8xf32>
    %580 = arith.subf %576, %579 : vector<8x8xf32>
    %581 = math.exp %580 : vector<8x8xf32>
    %cst_214 = arith.constant dense<0.000000e+00> : vector<8xf32>
    %582 = vector.multi_reduction <add>, %581, %cst_214 [1] : vector<8x8xf32> to vector<8xf32>
    %583 = vector.shape_cast %582 : vector<8xf32> to vector<8x1xf32>
    %584 = tpu.reciprocal %583 {approx = true} : vector<8x1xf32> -> vector<8x1xf32>
    %585 = arith.mulf %300, %584 : vector<8x1xf32>
    %586 = vector.broadcast %585 : vector<8x1xf32> to vector<8x8xf32>
    %587 = arith.mulf %581, %586 : vector<8x8xf32>
    %cst_215 = arith.constant dense<0.000000e+00> : vector<8x128xf32>
    %588 = tpu.matmul %587, %573, %cst_215 {dimension_numbers = #tpu.dot_dimension_numbers<[1], [0], [0], [1], [0, 0, 1, 1], [], []>} : vector<8x8xf32>, vector<8x128xf32>, vector<8x128xf32> -> vector<8x128xf32>
    %589 = arith.addf %588, %574 : vector<8x128xf32>
    %c5_216 = arith.constant 5 : index
    %c0_217 = arith.constant 0 : index
    %c0_218 = arith.constant 0 : index
    %590 = vector.load %arg16[%c5_216, %c0_217, %c0_218] : memref<6x2x128xf32, #tpu.memory_space<vmem>>, vector<1x2x128xf32>
    %591 = vector.shape_cast %590 : vector<1x2x128xf32> to vector<2x128xf32>
    %592 = vector.extract_strided_slice %591 {offsets = [0, 0], sizes = [1, 128], strides = [1, 1]} : vector<2x128xf32> to vector<1x128xf32>
    %593 = vector.extract_strided_slice %591 {offsets = [1, 0], sizes = [1, 128], strides = [1, 1]} : vector<2x128xf32> to vector<1x128xf32>
    %cst_219 = arith.constant dense<0.000000e+00> : vector<1x128xf32>
    %594 = tpu.matmul %8, %589, %cst_219 {dimension_numbers = #tpu.dot_dimension_numbers<[1], [0], [0], [1], [0, 0, 1, 1], [], []>} : vector<1x8xf32>, vector<8x128xf32>, vector<1x128xf32> -> vector<1x128xf32>
    %595 = arith.mulf %589, %589 : vector<8x128xf32>
    %cst_220 = arith.constant dense<0.000000e+00> : vector<1x128xf32>
    %596 = tpu.matmul %8, %595, %cst_220 {dimension_numbers = #tpu.dot_dimension_numbers<[1], [0], [0], [1], [0, 0, 1, 1], [], []>} : vector<1x8xf32>, vector<8x128xf32>, vector<1x128xf32> -> vector<1x128xf32>
    %597 = arith.mulf %594, %594 : vector<1x128xf32>
    %598 = arith.subf %596, %597 : vector<1x128xf32>
    %cst_221 = arith.constant 0.000000e+00 : f32
    %599 = vector.broadcast %cst_221 : f32 to vector<1x128xf32>
    %600 = arith.maximumf %598, %599 : vector<1x128xf32>
    %601 = vector.broadcast %594 : vector<1x128xf32> to vector<8x128xf32>
    %602 = arith.subf %589, %601 : vector<8x128xf32>
    %cst_222 = arith.constant 9.99999974E-6 : f32
    %603 = vector.broadcast %cst_222 : f32 to vector<1x128xf32>
    %604 = arith.addf %600, %603 : vector<1x128xf32>
    %605 = math.rsqrt %604 : vector<1x128xf32>
    %606 = vector.broadcast %605 : vector<1x128xf32> to vector<8x128xf32>
    %607 = arith.mulf %602, %606 : vector<8x128xf32>
    %608 = vector.broadcast %592 : vector<1x128xf32> to vector<8x128xf32>
    %609 = arith.mulf %607, %608 : vector<8x128xf32>
    %610 = vector.broadcast %593 : vector<1x128xf32> to vector<8x128xf32>
    %611 = arith.addf %609, %610 : vector<8x128xf32>
    %612 = arith.addf %611, %509 : vector<8x128xf32>
    %cst_223 = arith.constant 0.000000e+00 : f32
    %613 = vector.broadcast %cst_223 : f32 to vector<8x128xf32>
    %614 = arith.maximumf %612, %613 : vector<8x128xf32>
    %615 = arith.addf %511, %536 : vector<8x8xf32>
    %616 = arith.addf %615, %587 : vector<8x8xf32>
    %c3_i32_224 = arith.constant 3 : i32
    %617 = tpu.memref_slice %arg18[%c3_i32_224] : memref<4x!tpu.dma_semaphore, #tpu.memory_space<semaphore_mem>> -> memref<1x!tpu.dma_semaphore, #tpu.memory_space<semaphore_mem>>
    %618 = tpu.memref_squeeze %617 : memref<1x!tpu.dma_semaphore, #tpu.memory_space<semaphore_mem>> -> memref<!tpu.dma_semaphore, #tpu.memory_space<semaphore_mem>>
    tpu.wait_dma2 semaphore(%618 : memref<!tpu.dma_semaphore, #tpu.memory_space<semaphore_mem>>) src(%arg9 : memref<128x128xbf16, #tpu.memory_space<any>>) dst(%arg17 : memref<128x128xbf16, #tpu.memory_space<vmem>>)
    %c0_225 = arith.constant 0 : index
    %c0_226 = arith.constant 0 : index
    %619 = vector.load %arg10[%c0_225, %c0_226] : memref<3x128xf32, #tpu.memory_space<vmem>>, vector<3x128xf32>
    %620 = arith.truncf %614 : vector<8x128xf32> to vector<8x128xbf16>
    %c0_227 = arith.constant 0 : index
    %c0_228 = arith.constant 0 : index
    %621 = vector.load %arg17[%c0_227, %c0_228] : memref<128x128xbf16, #tpu.memory_space<vmem>>, vector<128x128xbf16>
    %cst_229 = arith.constant dense<0.000000e+00> : vector<8x128xf32>
    %622 = tpu.matmul %620, %621, %cst_229 {dimension_numbers = #tpu.dot_dimension_numbers<[1], [0], [0], [1], [0, 0, 1, 1], [], []>} : vector<8x128xbf16>, vector<128x128xbf16>, vector<8x128xf32> -> vector<8x128xf32>
    %623 = vector.extract_strided_slice %619 {offsets = [0, 0], sizes = [1, 128], strides = [1, 1]} : vector<3x128xf32> to vector<1x128xf32>
    %624 = vector.broadcast %623 : vector<1x128xf32> to vector<8x128xf32>
    %625 = arith.addf %622, %624 : vector<8x128xf32>
    %626 = vector.extract_strided_slice %619 {offsets = [1, 0], sizes = [1, 128], strides = [1, 1]} : vector<3x128xf32> to vector<1x128xf32>
    %627 = vector.extract_strided_slice %619 {offsets = [2, 0], sizes = [1, 128], strides = [1, 1]} : vector<3x128xf32> to vector<1x128xf32>
    %cst_230 = arith.constant dense<0.000000e+00> : vector<1x128xf32>
    %628 = tpu.matmul %8, %625, %cst_230 {dimension_numbers = #tpu.dot_dimension_numbers<[1], [0], [0], [1], [0, 0, 1, 1], [], []>} : vector<1x8xf32>, vector<8x128xf32>, vector<1x128xf32> -> vector<1x128xf32>
    %629 = arith.mulf %625, %625 : vector<8x128xf32>
    %cst_231 = arith.constant dense<0.000000e+00> : vector<1x128xf32>
    %630 = tpu.matmul %8, %629, %cst_231 {dimension_numbers = #tpu.dot_dimension_numbers<[1], [0], [0], [1], [0, 0, 1, 1], [], []>} : vector<1x8xf32>, vector<8x128xf32>, vector<1x128xf32> -> vector<1x128xf32>
    %631 = arith.mulf %628, %628 : vector<1x128xf32>
    %632 = arith.subf %630, %631 : vector<1x128xf32>
    %cst_232 = arith.constant 0.000000e+00 : f32
    %633 = vector.broadcast %cst_232 : f32 to vector<1x128xf32>
    %634 = arith.maximumf %632, %633 : vector<1x128xf32>
    %635 = vector.broadcast %628 : vector<1x128xf32> to vector<8x128xf32>
    %636 = arith.subf %625, %635 : vector<8x128xf32>
    %cst_233 = arith.constant 9.99999974E-6 : f32
    %637 = vector.broadcast %cst_233 : f32 to vector<1x128xf32>
    %638 = arith.addf %634, %637 : vector<1x128xf32>
    %639 = math.rsqrt %638 : vector<1x128xf32>
    %640 = vector.broadcast %639 : vector<1x128xf32> to vector<8x128xf32>
    %641 = arith.mulf %636, %640 : vector<8x128xf32>
    %642 = vector.broadcast %626 : vector<1x128xf32> to vector<8x128xf32>
    %643 = arith.mulf %641, %642 : vector<8x128xf32>
    %644 = vector.broadcast %627 : vector<1x128xf32> to vector<8x128xf32>
    %645 = arith.addf %643, %644 : vector<8x128xf32>
    %c0_234 = arith.constant 0 : index
    %c0_235 = arith.constant 0 : index
    %646 = vector.load %arg11[%c0_234, %c0_235] : memref<1x128xf32, #tpu.memory_space<vmem>>, vector<1x128xf32>
    %647 = math.tanh %645 : vector<8x128xf32>
    %648 = vector.broadcast %646 : vector<1x128xf32> to vector<8x128xf32>
    %649 = arith.mulf %647, %648 : vector<8x128xf32>
    %c0_236 = arith.constant 0 : index
    %c0_237 = arith.constant 0 : index
    %650 = vector.load %arg12[%c0_236, %c0_237] : memref<8x128xf32, #tpu.memory_space<vmem>>, vector<8x128xf32>
    tpu.vector_store %arg12[%c0_236, %c0_237], %649 {strides = array<i32>} : memref<8x128xf32, #tpu.memory_space<vmem>>, vector<8x128xf32>,
    %c0_238 = arith.constant 0 : index
    %c0_239 = arith.constant 0 : index
    %651 = vector.load %arg13[%c0_238, %c0_239] : memref<8x8xf32, #tpu.memory_space<vmem>>, vector<8x8xf32>
    tpu.vector_store %arg13[%c0_238, %c0_239], %616 {strides = array<i32>} : memref<8x8xf32, #tpu.memory_space<vmem>>, vector<8x8xf32>,
    return
  }
}

</mosaic_0001>

<bundles_post_ra>
// kernel: _forward_device.1
= control target key start
LH: loop header
LB: loop body
LE: loop exit
PB: predicated region body
PF: predicated region fallthrough
CT: control target
= control target key end

     0   :  { %19 = vsyncpa [#allocation8], 0  ;;  %s7864_s0 = inlined_call_operand.hbm [shape: f32[8,128], index: 0, kind: input, shape index: {}]   ;;  %s7865_s1 = inlined_call_operand.hbm [shape: f32[1,8], index: 1, kind: input, shape index: {}]   ;;  %s7866_s2 = inlined_call_operand.hbm [shape: f32[8,8], index: 2, kind: input, shape index: {}]   ;;  %s7867_s3 = inlined_call_operand.hbm [shape: f32[8,1], index: 3, kind: input, shape index: {}]   ;;  %s7868_s4 = inlined_call_operand.hbm [shape: bf16[9,128,128], index: 4, kind: input, shape index: {}]   ;;  %s7869_s5 = inlined_call_operand.hbm [shape: f32[9,3,128], index: 5, kind: input, shape index: {}]   ;;  %s7870_s6 = inlined_call_operand.hbm [shape: bf16[6,128,512], index: 6, kind: input, shape index: {}]   ;;  %s7871_s7 = inlined_call_operand.hbm [shape: f32[6,1,512], index: 7, kind: input, shape index: {}]   ;;  %s7872_s8 = inlined_call_operand.hbm [shape: f32[6,2,128], index: 8, kind: input, shape index: {}]   ;;  %s7873_s9 = inlined_call_operand.hbm [shape: bf16[128,128], index: 9, kind: input, shape index: {}]   ;;  %s7874_s10 = inlined_call_operand.hbm [shape: f32[3,128], index: 10, kind: input, shape index: {}]   ;;  %s7875_s11 = inlined_call_operand.hbm [shape: f32[1,128], index: 11, kind: input, shape index: {}]   ;;  %s7876_s12 = inlined_call_operand.hbm [shape: f32[8,128], index: 12, kind: output, shape index: {0}]   ;;  %s7877_s13 = inlined_call_operand.hbm [shape: f32[8,8], index: 13, kind: output, shape index: {1}]  }
   0x1   :  { %20 = vsyncpa [#allocation11], 0 }
   0x2   :  { %21 = vsyncpa [#allocation14], 0 }
   0x3   :  { %22 = vsyncpa [#allocation17], 0 }
   0x4   :  { %23 = vsyncpa [#allocation20], 0 }
   0x5   :  { %24 = vsyncpa [#allocation9], 0 }
   0x6   :  { %25 = vsyncpa [#allocation23], 0  ;;  %s7031_s25 = smov [#allocation10]   ;;  %s7032_s27 = smov [#allocation13]  }
   0x7   :  { %s42_s26 = sshll.u32 %s7031_s25, 4  ;;  %s62_s28 = sshll.u32 %s7032_s27, 4  ;;  %s43_s26 = int_to_ptr.vmem [resolvable:$true] %s42_s26  ;;  %s63_s28 = int_to_ptr.vmem [resolvable:$true] %s62_s28 }
   0x8   :  { %s6723_s14 = scalar_lea.hbm %s7865_s1, 16 }
   0x9   :  { %p6724_p0 = scmp.ne.s32.totalorder %s7865_s1, %s6723_s14  ;;  %p6727_p1 = scmp.lt.u32.totalorder %s6723_s14, %s7865_s1 }
   0xb   :  { %p6729_p2 = pnand %p6727_p1, %p6724_p0 }
   0xd   :  { %6732 = shalt.err (!%p6729_p2)
}
   0xe   :  { %s6733_s19 = scalar_lea.vmem %s43_s26, 16  ;;  %s6737_s20 = scalar_lea.vmem %s43_s26, 32 }
   0xf   :  { %p6734_p3 = scmp.ne.s32.totalorder %s43_s26, %s6733_s19  ;;  %p6738_p4 = scmp.lt.s32.totalorder %s43_s26, %s43_s26 }
  0x10   :  { %p6739_p5 = scmp.lt.s32.totalorder %s6737_s20, %s6733_s19 }
  0x12   :  { %p6740_p6 = por %p6739_p5, %p6738_p4 }
  0x14   :  { %p6741_p7 = pnand %p6740_p6, %p6734_p3 }
  0x16   :  { %6744 = shalt.err (!%p6741_p7)
}
  0x17   :  { %45 = dma.hbm_to_vmem [thread:$0]  %s7865_s1, 16, %s43_s26, [#allocation11]  }
  0x18   :  { %s6745_s25 = scalar_lea.hbm %s7867_s3, 128 }
  0x19   :  { %p6746_p8 = scmp.ne.s32.totalorder %s7867_s3, %s6745_s25  ;;  %p6749_p9 = scmp.lt.u32.totalorder %s6745_s25, %s7867_s3 }
  0x1b   :  { %p6751_p10 = pnand %p6749_p9, %p6746_p8 }
  0x1d   :  { %6754 = shalt.err (!%p6751_p10)
}
  0x1e   :  { %s6755_s15 = scalar_lea.vmem %s63_s28, 128  ;;  %p6760_p12 = scmp.lt.s32.totalorder %s63_s28, %s63_s28 }
  0x1f   :  { %p6756_p11 = scmp.ne.s32.totalorder %s63_s28, %s6755_s15  ;;  %p6761_p13 = scmp.lt.s32.totalorder %s6755_s15, %s6755_s15 }
  0x21   :  { %p6762_p0 = por %p6761_p13, %p6760_p12 }
  0x23   :  { %p6763_p1 = pnand %p6762_p0, %p6756_p11 }
  0x25   :  { %6766 = shalt.err (!%p6763_p1)
}
  0x26   :  { %65 = dma.hbm_to_vmem [thread:$0]  %s7867_s3, 128, %s63_s28, [#allocation14]  }
  0x27   :  { %s7033_s16 = smov [#allocation16]   ;;  %s7034_s18 = smov [#allocation7]  }
  0x28   :  { %s83_s17 = sshll.u32 %s7033_s16, 4  ;;  %s32_s19 = sshll.u32 %s7034_s18, 4  ;;  %s84_s17 = int_to_ptr.vmem [resolvable:$true] %s83_s17  ;;  %s33_s19 = int_to_ptr.vmem [resolvable:$true] %s32_s19 }
  0x29   :  { %s6767_s22 = scalar_lea.hbm %s7869_s5, 576 }
  0x2a   :  { %p6768_p2 = scmp.ne.s32.totalorder %s7869_s5, %s6767_s22  ;;  %p6771_p3 = scmp.lt.u32.totalorder %s6767_s22, %s7869_s5 }
  0x2c   :  { %p6773_p4 = pnand %p6771_p3, %p6768_p2 }
  0x2e   :  { %6776 = shalt.err (!%p6773_p4)
}
  0x2f   :  { %s6777_s3 = scalar_lea.vmem %s84_s17, 576  ;;  %p6782_p6 = scmp.lt.s32.totalorder %s84_s17, %s84_s17 }
  0x30   :  { %p6778_p5 = scmp.ne.s32.totalorder %s84_s17, %s6777_s3  ;;  %p6783_p7 = scmp.lt.s32.totalorder %s6777_s3, %s6777_s3 }
  0x32   :  { %p6784_p8 = por %p6783_p7, %p6782_p6 }
  0x34   :  { %p6785_p9 = pnand %p6784_p8, %p6778_p5 }
  0x36   :  { %6788 = shalt.err (!%p6785_p9)
}
  0x37   :  { %s7035_s28 = smov 64   ;;  %s7036_s29 = smov 4  }
  0x38   :  { %89 = dma.hbm_to_vmem [thread:$0]  %s7869_s5, 576, %s84_s17, [#allocation17], %s7035_s28, %s7035_s28, %s7036_s29  }
  0x39   :  { %s6789_s26 = scalar_lea.hbm %s7864_s0, 128 }
  0x3a   :  { %p6790_p10 = scmp.ne.s32.totalorder %s7864_s0, %s6789_s26  ;;  %p6793_p11 = scmp.lt.u32.totalorder %s6789_s26, %s7864_s0 }
  0x3c   :  { %p6795_p12 = pnand %p6793_p11, %p6790_p10 }
  0x3e   :  { %6798 = shalt.err (!%p6795_p12)
}
  0x3f   :  { %s6799_s22 = scalar_lea.vmem %s33_s19, 128  ;;  %p6804_p0 = scmp.lt.s32.totalorder %s33_s19, %s33_s19 }
  0x40   :  { %p6800_p13 = scmp.ne.s32.totalorder %s33_s19, %s6799_s22  ;;  %p6805_p1 = scmp.lt.s32.totalorder %s6799_s22, %s6799_s22 }
  0x42   :  { %p6806_p2 = por %p6805_p1, %p6804_p0 }
  0x44   :  { %p6807_p3 = pnand %p6806_p2, %p6800_p13 }
  0x46   :  { %6810 = shalt.err (!%p6807_p3)
}
  0x47   :  { %35 = dma.hbm_to_vmem [thread:$0]  %s7864_s0, 128, %s33_s19, [#allocation8]  }
  0x48   :  { %s7037_s23 = smov [#allocation12]   ;;  %s7038_s25 = smov [#allocation15]  }
  0x49   :  { %s52_s24 = sshll.u32 %s7037_s23, 4  ;;  %s71_s27 = sshll.u32 %s7038_s25, 4  ;;  %s53_s24 = int_to_ptr.vmem [resolvable:$true] %s52_s24  ;;  %s7177_s27 = int_to_ptr.vmem [resolvable:$true] %s71_s27 }
  0x4a   :  { %s6811_s14 = scalar_lea.hbm %s7866_s2, 128 }
  0x4b   :  { %p6812_p4 = scmp.ne.s32.totalorder %s7866_s2, %s6811_s14  ;;  %p6815_p5 = scmp.lt.u32.totalorder %s6811_s14, %s7866_s2 }
  0x4d   :  { %p6817_p6 = pnand %p6815_p5, %p6812_p4 }
  0x4f   :  { %6820 = shalt.err (!%p6817_p6)
}
  0x50   :  { %s6821_s0 = scalar_lea.vmem %s53_s24, 128  ;;  %p6826_p8 = scmp.lt.s32.totalorder %s53_s24, %s53_s24 }
  0x51   :  { %p6822_p7 = scmp.ne.s32.totalorder %s53_s24, %s6821_s0  ;;  %p6827_p9 = scmp.lt.s32.totalorder %s6821_s0, %s6821_s0 }
  0x53   :  { %p6828_p10 = por %p6827_p9, %p6826_p8 }
  0x55   :  { %p6829_p11 = pnand %p6828_p10, %p6822_p7 }
  0x57   :  { %6832 = shalt.err (!%p6829_p11)
}
  0x58   :  { %55 = dma.hbm_to_vmem [thread:$0]  %s7866_s2, 128, %s53_s24, [#allocation11]  }
  0x59   :  { %s6833_s22 = scalar_lea.hbm %s7868_s4, 9216 }
  0x5a   :  { %p6834_p12 = scmp.ne.s32.totalorder %s7868_s4, %s6833_s22  ;;  %p6837_p13 = scmp.lt.u32.totalorder %s6833_s22, %s7868_s4 }
  0x5c   :  { %p6839_p0 = pnand %p6837_p13, %p6834_p12 }
  0x5e   :  { %6842 = shalt.err (!%p6839_p0)
}
  0x5f   :  { %s6843_s3 = scalar_lea.vmem %s7177_s27, 9216  ;;  %p6848_p2 = scmp.lt.s32.totalorder %s7177_s27, %s7177_s27 }
  0x60   :  { %p6844_p1 = scmp.ne.s32.totalorder %s7177_s27, %s6843_s3  ;;  %p6849_p3 = scmp.lt.s32.totalorder %s6843_s3, %s6843_s3 }
  0x62   :  { %p6850_p4 = por %p6849_p3, %p6848_p2 }
  0x64   :  { %p6851_p5 = pnand %p6850_p4, %p6844_p1 }
  0x66   :  { %6854 = shalt.err (!%p6851_p5)
}
  0x67   :  { %77 = dma.hbm_to_vmem [thread:$0]  %s7868_s4, 9216, %s7177_s27, [#allocation14], %s7035_s28, %s7035_s28, %s7036_s29  }
  0x68   :  { %s7039_s30 = smov [#allocation18]   ;;  %s7040_s15 = smov [#allocation19]  }
  0x69   :  { %s96_s14 = sshll.u32 %s7039_s30, 4  ;;  %s106_s1 = sshll.u32 %s7040_s15, 4  ;;  %s97_s14 = int_to_ptr.vmem [resolvable:$true] %s96_s14  ;;  %s107_s1 = int_to_ptr.vmem [resolvable:$true] %s106_s1 }
  0x6a   :  { %s6855_s0 = scalar_lea.hbm %s7874_s10, 64 }
  0x6b   :  { %p6856_p6 = scmp.ne.s32.totalorder %s7874_s10, %s6855_s0  ;;  %p6859_p7 = scmp.lt.u32.totalorder %s6855_s0, %s7874_s10 }
  0x6d   :  { %p6861_p8 = pnand %p6859_p7, %p6856_p6 }
  0x6f   :  { %6864 = shalt.err (!%p6861_p8)
}
  0x70   :  { %s6865_s4 = scalar_lea.vmem %s97_s14, 64  ;;  %p6870_p10 = scmp.lt.s32.totalorder %s97_s14, %s97_s14 }
  0x71   :  { %p6866_p9 = scmp.ne.s32.totalorder %s97_s14, %s6865_s4  ;;  %p6871_p11 = scmp.lt.s32.totalorder %s6865_s4, %s6865_s4 }
  0x73   :  { %p6872_p12 = por %p6871_p11, %p6870_p10 }
  0x75   :  { %p6873_p13 = pnand %p6872_p12, %p6866_p9 }
  0x77   :  { %6876 = shalt.err (!%p6873_p13)
}
  0x78   :  { %99 = dma.hbm_to_vmem [thread:$0]  %s7874_s10, 64, %s97_s14, [#allocation17]  }
  0x79   :  { %s6877_s23 = scalar_lea.hbm %s7875_s11, 16 }
  0x7a   :  { %p6878_p0 = scmp.ne.s32.totalorder %s7875_s11, %s6877_s23  ;;  %p6881_p1 = scmp.lt.u32.totalorder %s6877_s23, %s7875_s11 }
  0x7c   :  { %p6883_p2 = pnand %p6881_p1, %p6878_p0 }
  0x7e   :  { %6886 = shalt.err (!%p6883_p2)
}
  0x7f   :  { %s6887_s30 = scalar_lea.vmem %s107_s1, 16  ;;  %s6891_s15 = scalar_lea.vmem %s107_s1, 32 }
  0x80   :  { %p6888_p3 = scmp.ne.s32.totalorder %s107_s1, %s6887_s30  ;;  %p6892_p4 = scmp.lt.s32.totalorder %s107_s1, %s107_s1 }
  0x81   :  { %p6893_p5 = scmp.lt.s32.totalorder %s6891_s15, %s6887_s30 }
  0x83   :  { %p6894_p6 = por %p6893_p5, %p6892_p4 }
  0x85   :  { %p6895_p7 = pnand %p6894_p6, %p6888_p3 }
  0x87   :  { %6898 = shalt.err (!%p6895_p7)
}
  0x88   :  { %109 = dma.hbm_to_vmem [thread:$0]  %s7875_s11, 16, %s107_s1, [#allocation20]  }
  0x89   :  { %7009 = dma.done.wait [#allocation8], 128  }
  0x8a   :  { %7010 = vsyncadd [#allocation8], 4294967168 }
  0x8b   :  { %7011 = dma.done.wait [#allocation11], 144  }
  0x8c   :  { %7012 = vsyncadd [#allocation11], 4294967152 }
  0x8d   :  { %7013 = dma.done.wait [#allocation14], 9344  }
  0x8e   :  { %7014 = vsyncadd [#allocation14], 4294957952 }
  0x8f   :  { %7015 = dma.done.wait [#allocation17], 640  }
  0x90   :  { %7016 = vsyncadd [#allocation17], 4294966656 }
  0x91   :  { %7017 = dma.done.wait [#allocation20], 16  }
  0x92   :  { %7018 = vsyncadd [#allocation20], 4294967280  ;;  %s139_s26 = sld [smem:[#allocation0]]   ;;  %s7041_s16 = smov 512   ;;  %v7042_v0 = vmov 0.0   ;;  %vm7043_vm0 = vmmov 0   ;;  %v226_v11 = vlaneseq }
  0x93   :  { %151 = sst [smem:[#allocation25]] %s7041_s16  ;;  %6144 = vmatprep.subr.bf16.mxu0 %v7042_v0  ;;  %6160 = vmatprep.mubr.msk.bf16.mxu0 %vm7043_vm0, %v7042_v0  ;;  %s7044_s11 = smov 128   ;;  %vm318_vm1 = vcmask 64512  }
  0x94   :  { %153 = sst [smem:[#allocation25 + $0x1]] %s7041_s16  ;;  %6169 = vmatprep.subr.mxu1 %v7042_v0  ;;  %6171 = vmatprep.mubr.msk.f32.mxu1 %vm7043_vm0, %v7042_v0  ;;  %s7045_s1 = smov [#allocation2]   ;;  %v7258_v12 = vshrl.u32 %v226_v11, 7 }
  0x95   :  { %155 = sst [smem:[#allocation25 + $0x2]] %s7036_s29  ;;  %s147_s0 = sshll.u32 %s7045_s1, 4  ;;  %s148_s0 = int_to_ptr.vmem [resolvable:$true] %s147_s0 }
  0x96   :  { %157 = sst [smem:[#allocation25 + $0x3]] %s7035_s28  ;;  %s7046_s19 = smov 2   ;;  %v7261_v13 = vsub.s32 0, %v7258_v12  ;;  %v7285_v39 = vsub.s32 1, %v7258_v12  ;;  %v7289_v41 = vsub.s32 2, %v7258_v12 }
  0x97   :  { %159 = sst [smem:[#allocation25 + $0x4]] %s7044_s11  ;;  %s7047_s20 = smov 256  }
  0x98   :  { %161 = sst [smem:[#allocation25 + $0x5]] %s7046_s19  ;;  %s5849_s18 = sshll.u32 %s139_s26, 26 }
  0x99   :  { %163 = sst [smem:[#allocation25 + $0x6]] %s7047_s20  ;;  %s5850_s21 = sadd.s32 134217728, %s5849_s18 }
  0x9a   :  { %165 = sst [smem:[#allocation25 + $0x7]] %s7035_s28  ;;  %s7048_s4 = smov [#allocation6]  }
  0x9b   :  { %167 = sst [smem:[#allocation25 + $0x8]] %s7036_s29  ;;  %s7049_s27 = smov [#allocation24]  }
  0x9c   :  { %169 = dma.general %s7870_s6, 24576, %s148_s0, %s7048_s4, %s7049_s27, [#allocation25], %s5850_s21, 0  }
  0x9d   :  { %v6589_v1 = vld [vmem:[#allocation15] sm:$0xff]   ;;  %v6590_v2 = vld [vmem:[#allocation15 + $0x8] sm:$0xff]   ;;  %v6591_v3 = vld [vmem:[#allocation15 + $0x10] sm:$0xff]   ;;  %s7050_s6 = smov [#allocation3]   ;;  %s7051_s29 = smov [#allocation4]  }
  0x9e   :  { %6145 = vmatpush3.bf16.msra.mxu0 %v6589_v1  ;;  %v6592_v4 = vld [vmem:[#allocation15 + $0x18] sm:$0xff]   ;;  %v6593_v5 = vld [vmem:[#allocation15 + $0x20] sm:$0xff]   ;;  %v6594_v6 = vld [vmem:[#allocation15 + $0x28] sm:$0xff]   ;;  %s178_s28 = sshll.u32 %s7050_s6, 4  ;;  %s190_s17 = sshll.u32 %s7051_s29, 4  ;;  %s179_s28 = int_to_ptr.vmem [resolvable:$true] %s178_s28  ;;  %s191_s17 = int_to_ptr.vmem [resolvable:$true] %s190_s17 }
  0x9f   :  { %6146 = vmatprep.subr.bf16.mxu0 %v7042_v0  ;;  %v6595_v7 = vld [vmem:[#allocation15 + $0x30] sm:$0xff]   ;;  %v6596_v8 = vld [vmem:[#allocation15 + $0x38] sm:$0xff]   ;;  %v207_v9 = vld [vmem:[#allocation7] sm:$0xff]  ;;  %s6899_s3 = scalar_lea.hbm %s7871_s7, 384 }
  0xa0   :  { %v225_v10 = vpack.c.bf16 %v207_v9, %v207_v9  ;;  %v224_v14 = vld [vmem:[#allocation16] sm:$0x7]  ;;  %v7264_v19 = vld [vmem:[#allocation10] sm:$0x1]  ;;  %v6599_v25 = vld [vmem:[#allocation15 + $0x50] sm:$0xff]   ;;  %p6900_p8 = scmp.ne.s32.totalorder %s7871_s7, %s6899_s3  ;;  %p6903_p9 = scmp.lt.u32.totalorder %s6899_s3, %s7871_s7 }
  0xa1   :  { %v229_v15 = vrot.slane %v224_v14, %v7261_v13  ;;  %v6597_v23 = vld [vmem:[#allocation15 + $0x40] sm:$0xff]   ;;  %v6598_v24 = vld [vmem:[#allocation15 + $0x48] sm:$0xff]   ;;  %v6600_v26 = vld [vmem:[#allocation15 + $0x58] sm:$0xff]   ;;  %v481_v43 = vrot.slane %v224_v14, %v7285_v39  ;;  %v486_v46 = vrot.slane %v224_v14, %v7289_v41 }
  0xa2   :  { %6147 = vmatpush3.bf16.msra.mxu0 %v6590_v2  ;;  %v6601_v27 = vld [vmem:[#allocation15 + $0x60] sm:$0xff]   ;;  %v6602_v28 = vld [vmem:[#allocation15 + $0x68] sm:$0xff]   ;;  %v6603_v29 = vld [vmem:[#allocation15 + $0x70] sm:$0xff]   ;;  %p6905_p10 = pnand %p6903_p9, %p6900_p8 }
  0xa3   :  { %6148 = vmatprep.subr.bf16.mxu0 %v7042_v0  ;;  %v6604_v30 = vld [vmem:[#allocation15 + $0x78] sm:$0xff]   ;;  %v507_v52 = vld [vmem:[#allocation16 + $0x4] sm:$0x7]  ;;  %v6606_v61 = vld [vmem:[#allocation15 + $0x88] sm:$0xff]  }
  0xa4   :  { %v512_v53 = vrot.slane %v507_v52, %v7261_v13  ;;  %v6605_v60 = vld [vmem:[#allocation15 + $0x80] sm:$0xff]   ;;  %v6607_v62 = vld [vmem:[#allocation15 + $0x90] sm:$0xff]   ;;  %v6608_v63 = vld [vmem:[#allocation15 + $0x98] sm:$0xff]  }
  0xa5   :  { %v6609_v1 = vld [vmem:[#allocation15 + $0xa0] sm:$0xff]   ;;  %v6610_v2 = vld [vmem:[#allocation15 + $0xa8] sm:$0xff]  }
  0xa6   :  { %6149 = vmatpush3.bf16.msra.mxu0 %v6591_v3  ;;  %v6611_v3 = vld [vmem:[#allocation15 + $0xb0] sm:$0xff]  }
  0xa7   :  { %6150 = vmatprep.subr.bf16.mxu0 %v7042_v0 }
  0xaa   :  { %6151 = vmatpush3.bf16.msra.mxu0 %v6592_v4  ;;  %v6612_v4 = vld [vmem:[#allocation15 + $0xb8] sm:$0xff]  }
  0xab   :  { %6152 = vmatprep.subr.bf16.mxu0 %v7042_v0 }
  0xae   :  { %6153 = vmatpush3.bf16.msra.mxu0 %v6593_v5 }
  0xaf   :  { %6154 = vmatprep.subr.bf16.mxu0 %v7042_v0 }
  0xb2   :  { %6155 = vmatpush3.bf16.msra.mxu0 %v6594_v6 }
  0xb3   :  { %6156 = vmatprep.subr.bf16.mxu0 %v7042_v0 }
  0xb6   :  { %6157 = vmatpush3.bf16.msra.mxu0 %v6595_v7 }
  0xb7   :  { %6158 = vmatprep.subr.bf16.mxu0 %v7042_v0 }
  0xba   :  { %6159 = vmatpush3.bf16.msra.mxu0 %v6596_v8 }
  0xbb   :  { %6164 = vmatprep.subr.mxu0 %v7042_v0 }
  0xbd   :  { %6161 = vmatmul.mubr.bf16.vlgmr.msra.gmra.mrb[0].mxu0 %v225_v10 }
  0xbe   :  { %6166 = vmatprep.mubr.msk.f32.mxu0 %vm7043_vm0, %v7042_v0 }
 0x190   :  { %v312_v16 = vpop.f32.mrb[0].mxu0 }
 0x191   :  { %v313_v17 = vadd.f32 %v312_v16, %v229_v15  ;;  %v6162_v18 = vpop.f32.mrb[1].mxu0 }
 0x192   :  { %v315_v20 = vpop.f32.mrb[2].mxu0 }
 0x193   :  { %v6163_v21 = vpop.f32.mrb[3].mxu0  ;;  %6165 = vmatpush3.msra.mxu0 %v313_v17  ;;  %v392_v22 = vmul.f32 %v313_v17, %v313_v17 }
 0x194   :  { %6167 = vmatmul.mubr.msk.f32.vlgmr.msra.gmra.mrb[4].mxu0 %vm318_vm1, %v7264_v19  ;;  %6194 = vmatprep.subr.mxu0 %v7042_v0  ;;  %v765_v21 = vrot.slane %v507_v52, %v7289_v41 }
 0x195   :  { %6170 = vmatpush3.msra.mxu1 %v392_v22  ;;  %6196 = vmatprep.mubr.msk.f32.mxu0 %vm7043_vm0, %v7042_v0 }
 0x196   :  { %6172 = vmatmul.mubr.msk.f32.vlgmr.msra.gmra.mrb[0].mxu1 %vm318_vm1, %v7264_v19  ;;  %6174 = vmatprep.subr.bf16.mxu1 %v7042_v0 }
 0x197   :  { %6190 = vmatprep.mubr.msk.bf16.mxu1 %vm7043_vm0, %v7042_v0  ;;  %6175 = vmatpush3.bf16.msra.mxu1 %v6597_v23 }
 0x198   :  { %6176 = vmatprep.subr.bf16.mxu1 %v7042_v0 }
 0x19b   :  { %6177 = vmatpush3.bf16.msra.mxu1 %v6598_v24 }
 0x19c   :  { %6178 = vmatprep.subr.bf16.mxu1 %v7042_v0 }
 0x19f   :  { %6179 = vmatpush3.bf16.msra.mxu1 %v6599_v25 }
 0x1a0   :  { %6180 = vmatprep.subr.bf16.mxu1 %v7042_v0 }
 0x1a3   :  { %6181 = vmatpush3.bf16.msra.mxu1 %v6600_v26 }
 0x1a4   :  { %6182 = vmatprep.subr.bf16.mxu1 %v7042_v0 }
 0x1a7   :  { %6183 = vmatpush3.bf16.msra.mxu1 %v6601_v27  ;;  %v786_v27 = vld [vmem:[#allocation16 + $0x8] sm:$0x7] }
 0x1a8   :  { %6184 = vmatprep.subr.bf16.mxu1 %v7042_v0 }
 0x1ab   :  { %6185 = vmatpush3.bf16.msra.mxu1 %v6602_v28  ;;  %v791_v28 = vrot.slane %v786_v27, %v7261_v13 }
 0x1ac   :  { %6186 = vmatprep.subr.bf16.mxu1 %v7042_v0 }
 0x1af   :  { %6187 = vmatpush3.bf16.msra.mxu1 %v6603_v29 }
 0x1b0   :  { %6188 = vmatprep.subr.bf16.mxu1 %v7042_v0 }
 0x1b3   :  { %6189 = vmatpush3.bf16.msra.mxu1 %v6604_v30 }
 0x1b4   :  { %6204 = vmatprep.subr.bf16.mxu1 %v7042_v0 }
 0x267   :  { %v388_v31 = vpop.f32.mrb[4].mxu0 }
 0x268   :  { %v463_v32 = vmul.f32 %v388_v31, %v388_v31  ;;  %v6168_v33 = vpop.f32.mrb[5].mxu0  ;;  %v469_v40 = vrot.slane %v388_v31, %v7261_v13 }
 0x269   :  { %v459_v34 = vpop.f32.mrb[0].mxu1 }
 0x26a   :  { %v464_v35 = vsub.f32 %v459_v34, %v463_v32  ;;  %v6173_v36 = vpop.f32.mrb[1].mxu1  ;;  %v470_v44 = vsub.f32 %v313_v17, %v469_v40  ;;  %v760_v17 = vrot.slane %v507_v52, %v7285_v39  ;;  %v6617_v40 = vld [vmem:[#allocation15 + $0xe0] sm:$0xff]  }
 0x26b   :  { %v6614_v36 = vld [vmem:[#allocation15 + $0xc8] sm:$0xff]  }
 0x26c   :  { %v465_v37 = vmax.f32 %v464_v35, 0.0  ;;  %v6613_v35 = vld [vmem:[#allocation15 + $0xc0] sm:$0xff]  }
 0x26e   :  { %v471_v38 = vadd.f32 1e-05, %v465_v37  ;;  %v6615_v37 = vld [vmem:[#allocation15 + $0xd0] sm:$0xff]  }
 0x270   :  { %6661 = vrsqrt.f32 %v471_v38  ;;  %v6616_v38 = vld [vmem:[#allocation15 + $0xd8] sm:$0xff]  }
 0x27a   :  { %v6662_v42 = vpop.eup %6661 }
 0x27b   :  { %v476_v45 = vrot.slane %v6662_v42, %v7261_v13  ;;  %v6618_v42 = vld [vmem:[#allocation15 + $0xe8] sm:$0xff]  }
 0x27d   :  { %v477_v47 = vmul.f32 %v476_v45, %v470_v44  ;;  %v6620_v44 = vld [vmem:[#allocation15 + $0xf8] sm:$0xff]  }
 0x27f   :  { %v482_v48 = vmul.f32 %v481_v43, %v477_v47  ;;  %v6619_v43 = vld [vmem:[#allocation15 + $0xf0] sm:$0xff]  }
 0x281   :  { %v487_v49 = vadd.f32 %v486_v46, %v482_v48 }
 0x283   :  { %v7294_v50 = vmax.f32 %v487_v49, 0.0 }
 0x285   :  { %v508_v51 = vpack.c.bf16 %v7294_v50, %v7294_v50 }
 0x287   :  { %6191 = vmatmul.mubr.bf16.vlgmr.msra.gmra.mrb[4].mxu1 %v508_v51 }
 0x288   :  { %6220 = vmatprep.mubr.msk.bf16.mxu1 %vm7043_vm0, %v7042_v0  ;;  %6205 = vmatpush3.bf16.msra.mxu1 %v6605_v60 }
 0x289   :  { %6206 = vmatprep.subr.bf16.mxu1 %v7042_v0 }
 0x28c   :  { %6207 = vmatpush3.bf16.msra.mxu1 %v6606_v61 }
 0x28d   :  { %6208 = vmatprep.subr.bf16.mxu1 %v7042_v0 }
 0x290   :  { %6209 = vmatpush3.bf16.msra.mxu1 %v6607_v62 }
 0x291   :  { %6210 = vmatprep.subr.bf16.mxu1 %v7042_v0 }
 0x294   :  { %6211 = vmatpush3.bf16.msra.mxu1 %v6608_v63 }
 0x295   :  { %6212 = vmatprep.subr.bf16.mxu1 %v7042_v0 }
 0x298   :  { %6213 = vmatpush3.bf16.msra.mxu1 %v6609_v1 }
 0x299   :  { %6214 = vmatprep.subr.bf16.mxu1 %v7042_v0 }
 0x29c   :  { %6215 = vmatpush3.bf16.msra.mxu1 %v6610_v2 }
 0x29d   :  { %6216 = vmatprep.subr.bf16.mxu1 %v7042_v0 }
 0x2a0   :  { %6217 = vmatpush3.bf16.msra.mxu1 %v6611_v3  ;;  %v1066_v3 = vld [vmem:[#allocation16 + $0xc] sm:$0x7] }
 0x2a1   :  { %6218 = vmatprep.subr.bf16.mxu1 %v7042_v0 }
 0x2a4   :  { %6219 = vmatpush3.bf16.msra.mxu1 %v6612_v4  ;;  %v1071_v4 = vrot.slane %v1066_v3, %v7261_v13 }
 0x2a5   :  { %6264 = vmatprep.subr.bf16.mxu1 %v7042_v0 }
 0x35a   :  { %v595_v54 = vpop.f32.mrb[4].mxu1 }
 0x35b   :  { %v596_v55 = vadd.f32 %v595_v54, %v512_v53  ;;  %v6192_v56 = vpop.f32.mrb[5].mxu1 }
 0x35c   :  { %v598_v57 = vpop.f32.mrb[6].mxu1  ;;  %v1039_v56 = vrot.slane %v786_v27, %v7285_v39 }
 0x35d   :  { %v671_v58 = vmul.f32 %v596_v55, %v596_v55  ;;  %v6193_v59 = vpop.f32.mrb[7].mxu1  ;;  %6195 = vmatpush3.msra.mxu0 %v596_v55 }
 0x35e   :  { %6197 = vmatmul.mubr.msk.f32.vlgmr.msra.gmra.mrb[6].mxu0 %vm318_vm1, %v7264_v19  ;;  %6199 = vmatprep.subr.mxu0 %v7042_v0  ;;  %v1044_v59 = vrot.slane %v786_v27, %v7289_v41 }
 0x35f   :  { %6200 = vmatpush3.msra.mxu0 %v671_v58  ;;  %6201 = vmatprep.mubr.msk.f32.mxu0 %vm7043_vm0, %v7042_v0 }
 0x360   :  { %6224 = vmatprep.subr.mxu0 %v7042_v0 }
 0x362   :  { %6202 = vmatmul.mubr.msk.f32.vlgmr.msra.gmra.mrb[8].mxu0 %vm318_vm1, %v7264_v19 }
 0x363   :  { %6226 = vmatprep.mubr.msk.f32.mxu0 %vm7043_vm0, %v7042_v0 }
 0x431   :  { %v667_v5 = vpop.f32.mrb[6].mxu0 }
 0x432   :  { %v6198_v6 = vpop.f32.mrb[7].mxu0  ;;  %v742_v7 = vmul.f32 %v667_v5, %v667_v5  ;;  %v748_v15 = vrot.slane %v667_v5, %v7261_v13 }
 0x434   :  { %v749_v18 = vsub.f32 %v596_v55, %v748_v15  ;;  %v6624_v15 = vld [vmem:[#allocation15 + $0x118] sm:$0xff]  }
 0x435   :  { %v738_v8 = vpop.f32.mrb[8].mxu0 }
 0x436   :  { %v743_v9 = vsub.f32 %v738_v8, %v742_v7  ;;  %v6203_v10 = vpop.f32.mrb[9].mxu0 }
 0x438   :  { %v744_v11 = vmax.f32 %v743_v9, 0.0 }
 0x43a   :  { %v750_v14 = vadd.f32 1e-05, %v744_v11  ;;  %v6622_v11 = vld [vmem:[#allocation15 + $0x108] sm:$0xff]  }
 0x43c   :  { %6663 = vrsqrt.f32 %v750_v14  ;;  %v6623_v14 = vld [vmem:[#allocation15 + $0x110] sm:$0xff]  }
 0x446   :  { %v6664_v16 = vpop.eup %6663 }
 0x447   :  { %v755_v20 = vrot.slane %v6664_v16, %v7261_v13  ;;  %v6625_v16 = vld [vmem:[#allocation15 + $0x120] sm:$0xff]  }
 0x449   :  { %v756_v22 = vmul.f32 %v755_v20, %v749_v18  ;;  %v6627_v18 = vld [vmem:[#allocation15 + $0x130] sm:$0xff]   ;;  %v6628_v20 = vld [vmem:[#allocation15 + $0x138] sm:$0xff]  }
 0x44b   :  { %v761_v23 = vmul.f32 %v760_v17, %v756_v22  ;;  %v6626_v17 = vld [vmem:[#allocation15 + $0x128] sm:$0xff]  }
 0x44d   :  { %v766_v24 = vadd.f32 %v765_v21, %v761_v23 }
 0x44f   :  { %v767_v25 = vmax.f32 %v766_v24, 0.0 }
 0x451   :  { %v787_v26 = vpack.c.bf16 %v767_v25, %v767_v25 }
 0x453   :  { %6221 = vmatmul.mubr.bf16.vlgmr.msra.gmra.mrb[8].mxu1 %v787_v26 }
 0x454   :  { %6280 = vmatprep.mubr.msk.bf16.mxu1 %vm7043_vm0, %v7042_v0 }
 0x526   :  { %v874_v29 = vpop.f32.mrb[8].mxu1 }
 0x527   :  { %v875_v30 = vadd.f32 %v874_v29, %v791_v28  ;;  %v6222_v31 = vpop.f32.mrb[9].mxu1 }
 0x528   :  { %v877_v32 = vpop.f32.mrb[10].mxu1  ;;  %v1319_v31 = vrot.slane %v1066_v3, %v7285_v39 }
 0x529   :  { %v950_v33 = vmul.f32 %v875_v30, %v875_v30  ;;  %v6223_v34 = vpop.f32.mrb[11].mxu1  ;;  %6225 = vmatpush3.msra.mxu0 %v875_v30 }
 0x52a   :  { %6227 = vmatmul.mubr.msk.f32.vlgmr.msra.gmra.mrb[10].mxu0 %vm318_vm1, %v7264_v19  ;;  %6229 = vmatprep.subr.mxu0 %v7042_v0  ;;  %v1324_v34 = vrot.slane %v1066_v3, %v7289_v41 }
 0x52b   :  { %6230 = vmatpush3.msra.mxu0 %v950_v33  ;;  %6231 = vmatprep.mubr.msk.f32.mxu0 %vm7043_vm0, %v7042_v0 }
 0x52c   :  { %6234 = vmatprep.subr.bf16.mxu0 %v7042_v0 }
 0x52e   :  { %6232 = vmatmul.mubr.msk.f32.vlgmr.msra.gmra.mrb[12].mxu0 %vm318_vm1, %v7264_v19 }
 0x52f   :  { %6250 = vmatprep.mubr.msk.bf16.mxu0 %vm7043_vm0, %v7042_v0  ;;  %6235 = vmatpush3.bf16.msra.mxu0 %v6613_v35 }
 0x530   :  { %6236 = vmatprep.subr.bf16.mxu0 %v7042_v0 }
 0x533   :  { %6237 = vmatpush3.bf16.msra.mxu0 %v6614_v36 }
 0x534   :  { %6238 = vmatprep.subr.bf16.mxu0 %v7042_v0 }
 0x537   :  { %6239 = vmatpush3.bf16.msra.mxu0 %v6615_v37 }
 0x538   :  { %6240 = vmatprep.subr.bf16.mxu0 %v7042_v0 }
 0x53b   :  { %6241 = vmatpush3.bf16.msra.mxu0 %v6616_v38 }
 0x53c   :  { %6242 = vmatprep.subr.bf16.mxu0 %v7042_v0 }
 0x53f   :  { %6243 = vmatpush3.bf16.msra.mxu0 %v6617_v40 }
 0x540   :  { %6244 = vmatprep.subr.bf16.mxu0 %v7042_v0 }
 0x543   :  { %6245 = vmatpush3.bf16.msra.mxu0 %v6618_v42  ;;  %v1345_v42 = vld [vmem:[#allocation16 + $0x10] sm:$0x7] }
 0x544   :  { %6246 = vmatprep.subr.bf16.mxu0 %v7042_v0 }
 0x547   :  { %6247 = vmatpush3.bf16.msra.mxu0 %v6619_v43  ;;  %v1350_v43 = vrot.slane %v1345_v42, %v7261_v13 }
 0x548   :  { %6248 = vmatprep.subr.bf16.mxu0 %v7042_v0 }
 0x54b   :  { %6249 = vmatpush3.bf16.msra.mxu0 %v6620_v44 }
 0x54c   :  { %6254 = vmatprep.subr.mxu0 %v7042_v0 }
 0x5fd   :  { %v946_v45 = vpop.f32.mrb[10].mxu0 }
 0x5fe   :  { %v6228_v46 = vpop.f32.mrb[11].mxu0  ;;  %v1021_v47 = vmul.f32 %v946_v45, %v946_v45  ;;  %v1027_v54 = vrot.slane %v946_v45, %v7261_v13 }
 0x600   :  { %v1028_v57 = vsub.f32 %v875_v30, %v1027_v54  ;;  %v6632_v54 = vld [vmem:[#allocation15 + $0x158] sm:$0xff]  }
 0x601   :  { %v1017_v48 = vpop.f32.mrb[12].mxu0 }
 0x602   :  { %v1022_v49 = vsub.f32 %v1017_v48, %v1021_v47  ;;  %v6233_v51 = vpop.f32.mrb[13].mxu0 }
 0x603   :  { %v6629_v51 = vld [vmem:[#allocation15 + $0x140] sm:$0xff]  }
 0x604   :  { %v1023_v52 = vmax.f32 %v1022_v49, 0.0 }
 0x606   :  { %v1029_v53 = vadd.f32 1e-05, %v1023_v52  ;;  %v6630_v52 = vld [vmem:[#allocation15 + $0x148] sm:$0xff]  }
 0x608   :  { %6665 = vrsqrt.f32 %v1029_v53  ;;  %v6631_v53 = vld [vmem:[#allocation15 + $0x150] sm:$0xff]  }
 0x612   :  { %v6666_v55 = vpop.eup %6665 }
 0x613   :  { %v1034_v58 = vrot.slane %v6666_v55, %v7261_v13  ;;  %v6633_v55 = vld [vmem:[#allocation15 + $0x160] sm:$0xff]  }
 0x615   :  { %v1035_v60 = vmul.f32 %v1034_v58, %v1028_v57  ;;  %v6635_v57 = vld [vmem:[#allocation15 + $0x170] sm:$0xff]   ;;  %v6636_v58 = vld [vmem:[#allocation15 + $0x178] sm:$0xff]  }
 0x617   :  { %v1040_v61 = vmul.f32 %v1039_v56, %v1035_v60  ;;  %v6634_v56 = vld [vmem:[#allocation15 + $0x168] sm:$0xff]  }
 0x619   :  { %v1045_v62 = vadd.f32 %v1044_v59, %v1040_v61 }
 0x61b   :  { %v1046_v63 = vadd.f32 %v1045_v62, %v7294_v50  ;;  %v6621_v50 = vld [vmem:[#allocation15 + $0x100] sm:$0xff]  }
 0x61c   :  { %6265 = vmatpush3.bf16.msra.mxu1 %v6621_v50 }
 0x61d   :  { %v7349_v1 = vmax.f32 %v1046_v63, 0.0  ;;  %6266 = vmatprep.subr.bf16.mxu1 %v7042_v0 }
 0x61f   :  { %v1067_v2 = vpack.c.bf16 %v7349_v1, %v7349_v1 }
 0x620   :  { %6267 = vmatpush3.bf16.msra.mxu1 %v6622_v11 }
 0x621   :  { %6251 = vmatmul.mubr.bf16.vlgmr.msra.gmra.mrb[16].mxu0 %v1067_v2  ;;  %6268 = vmatprep.subr.bf16.mxu1 %v7042_v0 }
 0x622   :  { %6256 = vmatprep.mubr.msk.f32.mxu0 %vm7043_vm0, %v7042_v0 }
 0x624   :  { %6269 = vmatpush3.bf16.msra.mxu1 %v6623_v14 }
 0x625   :  { %6270 = vmatprep.subr.bf16.mxu1 %v7042_v0 }
 0x628   :  { %6271 = vmatpush3.bf16.msra.mxu1 %v6624_v15 }
 0x629   :  { %6272 = vmatprep.subr.bf16.mxu1 %v7042_v0 }
 0x62c   :  { %6273 = vmatpush3.bf16.msra.mxu1 %v6625_v16 }
 0x62d   :  { %6274 = vmatprep.subr.bf16.mxu1 %v7042_v0 }
 0x630   :  { %6275 = vmatpush3.bf16.msra.mxu1 %v6626_v17 }
 0x631   :  { %6276 = vmatprep.subr.bf16.mxu1 %v7042_v0 }
 0x634   :  { %6277 = vmatpush3.bf16.msra.mxu1 %v6627_v18  ;;  %v1625_v18 = vld [vmem:[#allocation16 + $0x14] sm:$0x7] }
 0x635   :  { %6278 = vmatprep.subr.bf16.mxu1 %v7042_v0 }
 0x638   :  { %6279 = vmatpush3.bf16.msra.mxu1 %v6628_v20  ;;  %v1630_v20 = vrot.slane %v1625_v18, %v7261_v13 }
 0x639   :  { %6314 = vmatprep.subr.mxu1 %v7042_v0 }
 0x6f4   :  { %v1154_v5 = vpop.f32.mrb[16].mxu0 }
 0x6f5   :  { %v1155_v6 = vadd.f32 %v1154_v5, %v1071_v4  ;;  %v6252_v7 = vpop.f32.mrb[17].mxu0 }
 0x6f6   :  { %v1157_v8 = vpop.f32.mrb[18].mxu0  ;;  %v1598_v7 = vrot.slane %v1345_v42, %v7285_v39 }
 0x6f7   :  { %v1230_v9 = vmul.f32 %v1155_v6, %v1155_v6  ;;  %v6253_v10 = vpop.f32.mrb[19].mxu0  ;;  %6255 = vmatpush3.msra.mxu0 %v1155_v6 }
 0x6f8   :  { %6257 = vmatmul.mubr.msk.f32.vlgmr.msra.gmra.mrb[14].mxu0 %vm318_vm1, %v7264_v19  ;;  %6259 = vmatprep.subr.mxu0 %v7042_v0  ;;  %v1603_v10 = vrot.slane %v1345_v42, %v7289_v41 }
 0x6f9   :  { %6260 = vmatpush3.msra.mxu0 %v1230_v9  ;;  %6261 = vmatprep.mubr.msk.f32.mxu0 %vm7043_vm0, %v7042_v0 }
 0x6fa   :  { %6284 = vmatprep.subr.mxu0 %v7042_v0 }
 0x6fc   :  { %6262 = vmatmul.mubr.msk.f32.vlgmr.msra.gmra.mrb[20].mxu0 %vm318_vm1, %v7264_v19 }
 0x6fd   :  { %6286 = vmatprep.mubr.msk.f32.mxu0 %vm7043_vm0, %v7042_v0 }
 0x7cb   :  { %v1226_v21 = vpop.f32.mrb[14].mxu0 }
 0x7cc   :  { %v6258_v22 = vpop.f32.mrb[15].mxu0  ;;  %v1301_v23 = vmul.f32 %v1226_v21, %v1226_v21  ;;  %v1307_v29 = vrot.slane %v1226_v21, %v7261_v13 }
 0x7ce   :  { %v1308_v32 = vsub.f32 %v1155_v6, %v1307_v29  ;;  %v6640_v29 = vld [vmem:[#allocation15 + $0x198] sm:$0xff]  }
 0x7cf   :  { %v1297_v24 = vpop.f32.mrb[20].mxu0 }
 0x7d0   :  { %v1302_v25 = vsub.f32 %v1297_v24, %v1301_v23  ;;  %v6263_v26 = vpop.f32.mrb[21].mxu0 }
 0x7d2   :  { %v1303_v27 = vmax.f32 %v1302_v25, 0.0 }
 0x7d4   :  { %v1309_v28 = vadd.f32 1e-05, %v1303_v27  ;;  %v6638_v27 = vld [vmem:[#allocation15 + $0x188] sm:$0xff]  }
 0x7d6   :  { %6667 = vrsqrt.f32 %v1309_v28  ;;  %v6639_v28 = vld [vmem:[#allocation15 + $0x190] sm:$0xff]  }
 0x7e0   :  { %v6668_v30 = vpop.eup %6667 }
 0x7e1   :  { %v1314_v33 = vrot.slane %v6668_v30, %v7261_v13  ;;  %v6641_v30 = vld [vmem:[#allocation15 + $0x1a0] sm:$0xff]  }
 0x7e3   :  { %v1315_v35 = vmul.f32 %v1314_v33, %v1308_v32  ;;  %v6643_v32 = vld [vmem:[#allocation15 + $0x1b0] sm:$0xff]   ;;  %v6644_v33 = vld [vmem:[#allocation15 + $0x1b8] sm:$0xff]  }
 0x7e5   :  { %v1320_v36 = vmul.f32 %v1319_v31, %v1315_v35  ;;  %v6642_v31 = vld [vmem:[#allocation15 + $0x1a8] sm:$0xff]  }
 0x7e7   :  { %v1325_v37 = vadd.f32 %v1324_v34, %v1320_v36 }
 0x7e9   :  { %v1326_v38 = vmax.f32 %v1325_v37, 0.0 }
 0x7eb   :  { %v1346_v40 = vpack.c.bf16 %v1326_v38, %v1326_v38 }
 0x7ed   :  { %6281 = vmatmul.mubr.bf16.vlgmr.msra.gmra.mrb[12].mxu1 %v1346_v40 }
 0x7ee   :  { %6316 = vmatprep.mubr.msk.f32.mxu1 %vm7043_vm0, %v7042_v0 }
 0x8c0   :  { %v1433_v44 = vpop.f32.mrb[12].mxu1 }
 0x8c1   :  { %v1434_v45 = vadd.f32 %v1433_v44, %v1350_v43  ;;  %v6282_v46 = vpop.f32.mrb[13].mxu1 }
 0x8c2   :  { %v1436_v47 = vpop.f32.mrb[14].mxu1  ;;  %v1878_v46 = vrot.slane %v1625_v18, %v7285_v39 }
 0x8c3   :  { %v1509_v48 = vmul.f32 %v1434_v45, %v1434_v45  ;;  %v6283_v49 = vpop.f32.mrb[15].mxu1  ;;  %6285 = vmatpush3.msra.mxu0 %v1434_v45 }
 0x8c4   :  { %6287 = vmatmul.mubr.msk.f32.vlgmr.msra.gmra.mrb[22].mxu0 %vm318_vm1, %v7264_v19  ;;  %6289 = vmatprep.subr.mxu0 %v7042_v0  ;;  %v1883_v49 = vrot.slane %v1625_v18, %v7289_v41 }
 0x8c5   :  { %6290 = vmatpush3.msra.mxu0 %v1509_v48  ;;  %6291 = vmatprep.mubr.msk.f32.mxu0 %vm7043_vm0, %v7042_v0 }
 0x8c6   :  { %6294 = vmatprep.subr.bf16.mxu0 %v7042_v0 }
 0x8c8   :  { %6292 = vmatmul.mubr.msk.f32.vlgmr.msra.gmra.mrb[24].mxu0 %vm318_vm1, %v7264_v19 }
 0x8c9   :  { %6310 = vmatprep.mubr.msk.bf16.mxu0 %vm7043_vm0, %v7042_v0  ;;  %6295 = vmatpush3.bf16.msra.mxu0 %v6629_v51 }
 0x8ca   :  { %6296 = vmatprep.subr.bf16.mxu0 %v7042_v0 }
 0x8cd   :  { %6297 = vmatpush3.bf16.msra.mxu0 %v6630_v52 }
 0x8ce   :  { %6298 = vmatprep.subr.bf16.mxu0 %v7042_v0 }
 0x8d1   :  { %6299 = vmatpush3.bf16.msra.mxu0 %v6631_v53 }
 0x8d2   :  { %6300 = vmatprep.subr.bf16.mxu0 %v7042_v0 }
 0x8d5   :  { %6301 = vmatpush3.bf16.msra.mxu0 %v6632_v54 }
 0x8d6   :  { %6302 = vmatprep.subr.bf16.mxu0 %v7042_v0 }
 0x8d9   :  { %6303 = vmatpush3.bf16.msra.mxu0 %v6633_v55 }
 0x8da   :  { %6304 = vmatprep.subr.bf16.mxu0 %v7042_v0 }
 0x8dd   :  { %6305 = vmatpush3.bf16.msra.mxu0 %v6634_v56  ;;  %v1904_v56 = vld [vmem:[#allocation16 + $0x18] sm:$0x7] }
 0x8de   :  { %6306 = vmatprep.subr.bf16.mxu0 %v7042_v0 }
 0x8e1   :  { %6307 = vmatpush3.bf16.msra.mxu0 %v6635_v57  ;;  %v1909_v57 = vrot.slane %v1904_v56, %v7261_v13 }
 0x8e2   :  { %6308 = vmatprep.subr.bf16.mxu0 %v7042_v0 }
 0x8e5   :  { %6309 = vmatpush3.bf16.msra.mxu0 %v6636_v58 }
 0x8e6   :  { %6344 = vmatprep.subr.mxu0 %v7042_v0 }
 0x997   :  { %v1505_v59 = vpop.f32.mrb[22].mxu0 }
 0x998   :  { %v6288_v60 = vpop.f32.mrb[23].mxu0  ;;  %v1580_v61 = vmul.f32 %v1505_v59, %v1505_v59  ;;  %v1586_v5 = vrot.slane %v1505_v59, %v7261_v13 }
 0x99a   :  { %v1587_v8 = vsub.f32 %v1434_v45, %v1586_v5  ;;  %v6648_v5 = vld [vmem:[#allocation15 + $0x1d8] sm:$0xff]  }
 0x99b   :  { %v1576_v62 = vpop.f32.mrb[24].mxu0 }
 0x99c   :  { %v1581_v63 = vsub.f32 %v1576_v62, %v1580_v61  ;;  %v6293_v2 = vpop.f32.mrb[25].mxu0 }
 0x99d   :  { %v6645_v2 = vld [vmem:[#allocation15 + $0x1c0] sm:$0xff]  }
 0x99e   :  { %v1582_v3 = vmax.f32 %v1581_v63, 0.0 }
 0x9a0   :  { %v1588_v4 = vadd.f32 1e-05, %v1582_v3  ;;  %v6646_v3 = vld [vmem:[#allocation15 + $0x1c8] sm:$0xff]  }
 0x9a2   :  { %6669 = vrsqrt.f32 %v1588_v4  ;;  %v6647_v4 = vld [vmem:[#allocation15 + $0x1d0] sm:$0xff]  }
 0x9ac   :  { %v6670_v6 = vpop.eup %6669 }
 0x9ad   :  { %v1593_v9 = vrot.slane %v6670_v6, %v7261_v13  ;;  %v6649_v6 = vld [vmem:[#allocation15 + $0x1e0] sm:$0xff]  }
 0x9af   :  { %v1594_v50 = vmul.f32 %v1593_v9, %v1587_v8  ;;  %v6651_v8 = vld [vmem:[#allocation15 + $0x1f0] sm:$0xff]   ;;  %v6652_v9 = vld [vmem:[#allocation15 + $0x1f8] sm:$0xff]  }
 0x9b1   :  { %v1599_v11 = vmul.f32 %v1598_v7, %v1594_v50  ;;  %v6650_v7 = vld [vmem:[#allocation15 + $0x1e8] sm:$0xff]  }
 0x9b3   :  { %v1604_v14 = vadd.f32 %v1603_v10, %v1599_v11 }
 0x9b5   :  { %v1605_v15 = vadd.f32 %v1604_v14, %v7349_v1  ;;  %v6637_v1 = vld [vmem:[#allocation15 + $0x180] sm:$0xff]  }
 0x9b7   :  { %v7404_v16 = vmax.f32 %v1605_v15, 0.0 }
 0x9b9   :  { %v1626_v17 = vpack.c.bf16 %v7404_v16, %v7404_v16 }
 0x9bb   :  { %6311 = vmatmul.mubr.bf16.vlgmr.msra.gmra.mrb[28].mxu0 %v1626_v17 }
 0x9bc   :  { %6346 = vmatprep.mubr.msk.f32.mxu0 %vm7043_vm0, %v7042_v0 }
 0xa8e   :  { %v1713_v21 = vpop.f32.mrb[28].mxu0 }
 0xa8f   :  { %v1714_v22 = vadd.f32 %v1713_v21, %v1630_v20  ;;  %v6312_v23 = vpop.f32.mrb[29].mxu0 }
 0xa90   :  { %v1716_v24 = vpop.f32.mrb[30].mxu0  ;;  %v2157_v23 = vrot.slane %v1904_v56, %v7285_v39 }
 0xa91   :  { %v1789_v25 = vmul.f32 %v1714_v22, %v1714_v22  ;;  %v6313_v26 = vpop.f32.mrb[31].mxu0  ;;  %6315 = vmatpush3.msra.mxu1 %v1714_v22 }
 0xa92   :  { %6317 = vmatmul.mubr.msk.f32.vlgmr.msra.gmra.mrb[2].mxu1 %vm318_vm1, %v7264_v19  ;;  %6319 = vmatprep.subr.mxu1 %v7042_v0  ;;  %v2162_v26 = vrot.slane %v1904_v56, %v7289_v41 }
 0xa93   :  { %6320 = vmatpush3.msra.mxu1 %v1789_v25  ;;  %6321 = vmatprep.mubr.msk.f32.mxu1 %vm7043_vm0, %v7042_v0 }
 0xa94   :  { %6324 = vmatprep.subr.bf16.mxu1 %v7042_v0 }
 0xa96   :  { %6322 = vmatmul.mubr.msk.f32.vlgmr.msra.gmra.mrb[16].mxu1 %vm318_vm1, %v7264_v19 }
 0xa97   :  { %6340 = vmatprep.mubr.msk.bf16.mxu1 %vm7043_vm0, %v7042_v0  ;;  %6325 = vmatpush3.bf16.msra.mxu1 %v6637_v1 }
 0xa98   :  { %6326 = vmatprep.subr.bf16.mxu1 %v7042_v0 }
 0xa9b   :  { %6327 = vmatpush3.bf16.msra.mxu1 %v6638_v27 }
 0xa9c   :  { %6328 = vmatprep.subr.bf16.mxu1 %v7042_v0 }
 0xa9f   :  { %6329 = vmatpush3.bf16.msra.mxu1 %v6639_v28 }
 0xaa0   :  { %6330 = vmatprep.subr.bf16.mxu1 %v7042_v0 }
 0xaa3   :  { %6331 = vmatpush3.bf16.msra.mxu1 %v6640_v29 }
 0xaa4   :  { %6332 = vmatprep.subr.bf16.mxu1 %v7042_v0 }
 0xaa7   :  { %6333 = vmatpush3.bf16.msra.mxu1 %v6641_v30 }
 0xaa8   :  { %6334 = vmatprep.subr.bf16.mxu1 %v7042_v0 }
 0xaab   :  { %6335 = vmatpush3.bf16.msra.mxu1 %v6642_v31 }
 0xaac   :  { %6336 = vmatprep.subr.bf16.mxu1 %v7042_v0 }
 0xaaf   :  { %6337 = vmatpush3.bf16.msra.mxu1 %v6643_v32  ;;  %v2184_v32 = vld [vmem:[#allocation16 + $0x1c] sm:$0x7] }
 0xab0   :  { %6338 = vmatprep.subr.bf16.mxu1 %v7042_v0 }
 0xab3   :  { %6339 = vmatpush3.bf16.msra.mxu1 %v6644_v33  ;;  %v2189_v33 = vrot.slane %v2184_v32, %v7261_v13 }
 0xab4   :  { %6374 = vmatprep.subr.mxu1 %v7042_v0 }
 0xb65   :  { %v1785_v34 = vpop.f32.mrb[2].mxu1 }
 0xb66   :  { %v6318_v35 = vpop.f32.mrb[3].mxu1  ;;  %v1860_v36 = vmul.f32 %v1785_v34, %v1785_v34  ;;  %v1866_v44 = vrot.slane %v1785_v34, %v7261_v13 }
 0xb68   :  { %v1867_v47 = vsub.f32 %v1714_v22, %v1866_v44  ;;  %v6656_v44 = vld [vmem:[#allocation15 + $0x218] sm:$0xff]  }
 0xb69   :  { %v1856_v37 = vpop.f32.mrb[16].mxu1 }
 0xb6a   :  { %v1861_v38 = vsub.f32 %v1856_v37, %v1860_v36  ;;  %v6323_v40 = vpop.f32.mrb[17].mxu1 }
 0xb6c   :  { %v1862_v42 = vmax.f32 %v1861_v38, 0.0 }
 0xb6e   :  { %v1868_v43 = vadd.f32 1e-05, %v1862_v42  ;;  %v6654_v42 = vld [vmem:[#allocation15 + $0x208] sm:$0xff]  }
 0xb70   :  { %6671 = vrsqrt.f32 %v1868_v43  ;;  %v6655_v43 = vld [vmem:[#allocation15 + $0x210] sm:$0xff]  }
 0xb7a   :  { %v6672_v45 = vpop.eup %6671 }
 0xb7b   :  { %v1873_v48 = vrot.slane %v6672_v45, %v7261_v13  ;;  %v6657_v45 = vld [vmem:[#allocation15 + $0x220] sm:$0xff]  }
 0xb7d   :  { %v1874_v51 = vmul.f32 %v1873_v48, %v1867_v47  ;;  %v6659_v47 = vld [vmem:[#allocation15 + $0x230] sm:$0xff]   ;;  %v6660_v48 = vld [vmem:[#allocation15 + $0x238] sm:$0xff]  }
 0xb7f   :  { %v1879_v52 = vmul.f32 %v1878_v46, %v1874_v51  ;;  %v6658_v46 = vld [vmem:[#allocation15 + $0x228] sm:$0xff]  }
 0xb81   :  { %v1884_v53 = vadd.f32 %v1883_v49, %v1879_v52 }
 0xb83   :  { %v1885_v54 = vmax.f32 %v1884_v53, 0.0 }
 0xb85   :  { %v1905_v55 = vpack.c.bf16 %v1885_v54, %v1885_v54 }
 0xb87   :  { %6341 = vmatmul.mubr.bf16.vlgmr.msra.gmra.mrb[20].mxu1 %v1905_v55 }
 0xb88   :  { %6376 = vmatprep.mubr.msk.f32.mxu1 %vm7043_vm0, %v7042_v0 }
 0xc5a   :  { %v1992_v58 = vpop.f32.mrb[20].mxu1 }
 0xc5b   :  { %v1993_v59 = vadd.f32 %v1992_v58, %v1909_v57  ;;  %v6342_v60 = vpop.f32.mrb[21].mxu1 }
 0xc5c   :  { %v1995_v61 = vpop.f32.mrb[22].mxu1  ;;  %v2437_v60 = vrot.slane %v2184_v32, %v7285_v39 }
 0xc5d   :  { %v2068_v62 = vmul.f32 %v1993_v59, %v1993_v59  ;;  %v6343_v63 = vpop.f32.mrb[23].mxu1  ;;  %6345 = vmatpush3.msra.mxu0 %v1993_v59 }
 0xc5e   :  { %6347 = vmatmul.mubr.msk.f32.vlgmr.msra.gmra.mrb[26].mxu0 %vm318_vm1, %v7264_v19  ;;  %6349 = vmatprep.subr.mxu0 %v7042_v0  ;;  %v2442_v63 = vrot.slane %v2184_v32, %v7289_v41 }
 0xc5f   :  { %6350 = vmatpush3.msra.mxu0 %v2068_v62  ;;  %6351 = vmatprep.mubr.msk.f32.mxu0 %vm7043_vm0, %v7042_v0 }
 0xc60   :  { %6354 = vmatprep.subr.bf16.mxu0 %v7042_v0 }
 0xc62   :  { %6352 = vmatmul.mubr.msk.f32.vlgmr.msra.gmra.mrb[32].mxu0 %vm318_vm1, %v7264_v19 }
 0xc63   :  { %6370 = vmatprep.mubr.msk.bf16.mxu0 %vm7043_vm0, %v7042_v0  ;;  %6355 = vmatpush3.bf16.msra.mxu0 %v6645_v2 }
 0xc64   :  { %6356 = vmatprep.subr.bf16.mxu0 %v7042_v0 }
 0xc67   :  { %6357 = vmatpush3.bf16.msra.mxu0 %v6646_v3 }
 0xc68   :  { %6358 = vmatprep.subr.bf16.mxu0 %v7042_v0 }
 0xc6b   :  { %6359 = vmatpush3.bf16.msra.mxu0 %v6647_v4 }
 0xc6c   :  { %6360 = vmatprep.subr.bf16.mxu0 %v7042_v0 }
 0xc6f   :  { %6361 = vmatpush3.bf16.msra.mxu0 %v6648_v5 }
 0xc70   :  { %6362 = vmatprep.subr.bf16.mxu0 %v7042_v0 }
 0xc73   :  { %6363 = vmatpush3.bf16.msra.mxu0 %v6649_v6 }
 0xc74   :  { %6364 = vmatprep.subr.bf16.mxu0 %v7042_v0 }
 0xc77   :  { %6365 = vmatpush3.bf16.msra.mxu0 %v6650_v7  ;;  %v7487_v7 = vld [vmem:[#allocation16 + $0x20] sm:$0x7] }
 0xc78   :  { %6366 = vmatprep.subr.bf16.mxu0 %v7042_v0 }
 0xc7b   :  { %6367 = vmatpush3.bf16.msra.mxu0 %v6651_v8  ;;  %v2468_v8 = vrot.slane %v7487_v7, %v7261_v13 }
 0xc7c   :  { %6368 = vmatprep.subr.bf16.mxu0 %v7042_v0 }
 0xc7f   :  { %6369 = vmatpush3.bf16.msra.mxu0 %v6652_v9 }
 0xc80   :  { %6404 = vmatprep.subr.mxu0 %v7042_v0 }
 0xd31   :  { %v2064_v10 = vpop.f32.mrb[26].mxu0 }
 0xd32   :  { %v6348_v50 = vpop.f32.mrb[27].mxu0  ;;  %v2139_v11 = vmul.f32 %v2064_v10, %v2064_v10  ;;  %v2145_v21 = vrot.slane %v2064_v10, %v7261_v13 }
 0xd34   :  { %v2146_v24 = vsub.f32 %v1993_v59, %v2145_v21 }
 0xd35   :  { %v2135_v14 = vpop.f32.mrb[32].mxu0 }
 0xd36   :  { %v2140_v15 = vsub.f32 %v2135_v14, %v2139_v11  ;;  %v6353_v17 = vpop.f32.mrb[33].mxu0 }
 0xd38   :  { %v2141_v18 = vmax.f32 %v2140_v15, 0.0 }
 0xd3a   :  { %v2147_v20 = vadd.f32 1e-05, %v2141_v18 }
 0xd3c   :  { %6673 = vrsqrt.f32 %v2147_v20 }
 0xd46   :  { %v6674_v22 = vpop.eup %6673 }
 0xd47   :  { %v2152_v25 = vrot.slane %v6674_v22, %v7261_v13 }
 0xd49   :  { %v2153_v1 = vmul.f32 %v2152_v25, %v2146_v24 }
 0xd4b   :  { %v2158_v27 = vmul.f32 %v2157_v23, %v2153_v1 }
 0xd4d   :  { %v2163_v28 = vadd.f32 %v2162_v26, %v2158_v27 }
 0xd4f   :  { %v2164_v29 = vadd.f32 %v2163_v28, %v7404_v16  ;;  %v6653_v16 = vld [vmem:[#allocation15 + $0x200] sm:$0xff]  }
 0xd51   :  { %v7459_v30 = vmax.f32 %v2164_v29, 0.0 }
 0xd53   :  { %v2185_v31 = vpack.c.bf16 %v7459_v30, %v7459_v30 }
 0xd55   :  { %6371 = vmatmul.mubr.bf16.vlgmr.msra.gmra.mrb[36].mxu0 %v2185_v31 }
 0xd56   :  { %6406 = vmatprep.mubr.msk.f32.mxu0 %vm7043_vm0, %v7042_v0 }
 0xe28   :  { %v2272_v34 = vpop.f32.mrb[36].mxu0 }
 0xe29   :  { %v2273_v35 = vadd.f32 %v2272_v34, %v2189_v33  ;;  %v6372_v36 = vpop.f32.mrb[37].mxu0 }
 0xe2a   :  { %v2275_v37 = vpop.f32.mrb[38].mxu0 }
 0xe2b   :  { %v2348_v38 = vmul.f32 %v2273_v35, %v2273_v35  ;;  %v6373_v40 = vpop.f32.mrb[39].mxu0  ;;  %6375 = vmatpush3.msra.mxu1 %v2273_v35 }
 0xe2c   :  { %6377 = vmatmul.mubr.msk.f32.vlgmr.msra.gmra.mrb[18].mxu1 %vm318_vm1, %v7264_v19  ;;  %6379 = vmatprep.subr.mxu1 %v7042_v0 }
 0xe2d   :  { %6380 = vmatpush3.msra.mxu1 %v2348_v38  ;;  %6381 = vmatprep.mubr.msk.f32.mxu1 %vm7043_vm0, %v7042_v0 }
 0xe2e   :  { %6384 = vmatprep.subr.bf16.mxu1 %v7042_v0 }
 0xe30   :  { %6382 = vmatmul.mubr.msk.f32.vlgmr.msra.gmra.mrb[24].mxu1 %vm318_vm1, %v7264_v19 }
 0xe31   :  { %6400 = vmatprep.mubr.msk.bf16.mxu1 %vm7043_vm0, %v7042_v0  ;;  %6385 = vmatpush3.bf16.msra.mxu1 %v6653_v16 }
 0xe32   :  { %6386 = vmatprep.subr.bf16.mxu1 %v7042_v0 }
 0xe35   :  { %6387 = vmatpush3.bf16.msra.mxu1 %v6654_v42 }
 0xe36   :  { %6388 = vmatprep.subr.bf16.mxu1 %v7042_v0 }
 0xe39   :  { %6389 = vmatpush3.bf16.msra.mxu1 %v6655_v43 }
 0xe3a   :  { %6390 = vmatprep.subr.bf16.mxu1 %v7042_v0 }
 0xe3d   :  { %6391 = vmatpush3.bf16.msra.mxu1 %v6656_v44 }
 0xe3e   :  { %6392 = vmatprep.subr.bf16.mxu1 %v7042_v0 }
 0xe41   :  { %6393 = vmatpush3.bf16.msra.mxu1 %v6657_v45 }
 0xe42   :  { %6394 = vmatprep.subr.bf16.mxu1 %v7042_v0 }
 0xe45   :  { %6395 = vmatpush3.bf16.msra.mxu1 %v6658_v46 }
 0xe46   :  { %6396 = vmatprep.subr.bf16.mxu1 %v7042_v0 }
 0xe49   :  { %6397 = vmatpush3.bf16.msra.mxu1 %v6659_v47 }
 0xe4a   :  { %6398 = vmatprep.subr.bf16.mxu1 %v7042_v0 }
 0xe4d   :  { %6399 = vmatpush3.bf16.msra.mxu1 %v6660_v48 }
 0xeff   :  { %v2344_v49 = vpop.f32.mrb[18].mxu1 }
 0xf00   :  { %v6378_v51 = vpop.f32.mrb[19].mxu1  ;;  %v2419_v52 = vmul.f32 %v2344_v49, %v2344_v49  ;;  %v2425_v58 = vrot.slane %v2344_v49, %v7261_v13 }
 0xf02   :  { %v2426_v61 = vsub.f32 %v2273_v35, %v2425_v58 }
 0xf03   :  { %v2415_v53 = vpop.f32.mrb[24].mxu1 }
 0xf04   :  { %v2420_v54 = vsub.f32 %v2415_v53, %v2419_v52  ;;  %v6383_v55 = vpop.f32.mrb[25].mxu1 }
 0xf06   :  { %v2421_v56 = vmax.f32 %v2420_v54, 0.0 }
 0xf08   :  { %v2427_v57 = vadd.f32 1e-05, %v2421_v56 }
 0xf0a   :  { %6675 = vrsqrt.f32 %v2427_v57 }
 0xf14   :  { %v6676_v59 = vpop.eup %6675 }
 0xf15   :  { %v2432_v62 = vrot.slane %v6676_v59, %v7261_v13 }
 0xf17   :  { %v2433_v2 = vmul.f32 %v2432_v62, %v2426_v61 }
 0xf19   :  { %v2438_v3 = vmul.f32 %v2437_v60, %v2433_v2 }
 0xf1b   :  { %v2443_v4 = vadd.f32 %v2442_v63, %v2438_v3 }
 0xf1d   :  { %v2444_v5 = vmax.f32 %v2443_v4, 0.0 }
 0xf1f   :  { %v2464_v6 = vpack.c.bf16 %v2444_v5, %v2444_v5 }
 0xf21   :  { %6401 = vmatmul.mubr.bf16.vlgmr.msra.gmra.mrb[28].mxu1 %v2464_v6 }
 0xff4   :  { %v2551_v9 = vpop.f32.mrb[28].mxu1 }
 0xff5   :  { %v7491_v10 = vadd.f32 %v2551_v9, %v2468_v8  ;;  %v6402_v50 = vpop.f32.mrb[29].mxu1 }
 0xff6   :  { %v2554_v11 = vpop.f32.mrb[30].mxu1 }
 0xff7   :  { %v2627_v14 = vmul.f32 %v7491_v10, %v7491_v10  ;;  %v6403_v15 = vpop.f32.mrb[31].mxu1  ;;  %6405 = vmatpush3.msra.mxu0 %v7491_v10 }
 0xff8   :  { %6407 = vmatmul.mubr.msk.f32.vlgmr.msra.gmra.mrb[34].mxu0 %vm318_vm1, %v7264_v19  ;;  %6409 = vmatprep.subr.mxu0 %v7042_v0 }
 0xff9   :  { %6410 = vmatpush3.msra.mxu0 %v2627_v14  ;;  %6411 = vmatprep.mubr.msk.f32.mxu0 %vm7043_vm0, %v7042_v0 }
 0xffc   :  { %6412 = vmatmul.mubr.msk.f32.vlgmr.msra.gmra.mrb[40].mxu0 %vm318_vm1, %v7264_v19 }
 0xffd   :  { %6908 = shalt.err (!%p6905_p10)  }
 0xffe   :  { %s6909_s10 = scalar_lea.vmem %s179_s28, 384  ;;  %p6914_p12 = scmp.lt.s32.totalorder %s179_s28, %s179_s28 }
 0xfff   :  { %p6910_p11 = scmp.ne.s32.totalorder %s179_s28, %s6909_s10  ;;  %p6915_p13 = scmp.lt.s32.totalorder %s6909_s10, %s6909_s10 }
0x1001   :  { %p6916_p0 = por %p6915_p13, %p6914_p12 }
0x1003   :  { %p6917_p1 = pnand %p6916_p0, %p6910_p11 }
0x1005   :  { %6920 = shalt.err (!%p6917_p1)  }
0x1006   :  { %181 = dma.hbm_to_vmem [thread:$0]  %s7871_s7, 384, %s179_s28, [#allocation6 + $0x1] }
0x1007   :  { %s6921_s1 = scalar_lea.hbm %s7872_s8, 192 }
0x1008   :  { %p6922_p2 = scmp.ne.s32.totalorder %s7872_s8, %s6921_s1  ;;  %p6925_p3 = scmp.lt.u32.totalorder %s6921_s1, %s7872_s8 }
0x100a   :  { %p6927_p4 = pnand %p6925_p3, %p6922_p2 }
0x100c   :  { %6930 = shalt.err (!%p6927_p4)  }
0x100d   :  { %s6931_s21 = scalar_lea.vmem %s191_s17, 192  ;;  %p6936_p6 = scmp.lt.s32.totalorder %s191_s17, %s191_s17 }
0x100e   :  { %p6932_p5 = scmp.ne.s32.totalorder %s191_s17, %s6931_s21  ;;  %p6937_p7 = scmp.lt.s32.totalorder %s6931_s21, %s6931_s21 }
0x1010   :  { %p6938_p8 = por %p6937_p7, %p6936_p6 }
0x1012   :  { %p6939_p9 = pnand %p6938_p8, %p6932_p5 }
0x1014   :  { %6942 = shalt.err (!%p6939_p9)  }
0x1015   :  { %193 = dma.hbm_to_vmem [thread:$0]  %s7872_s8, 192, %s191_s17, [#allocation6 + $0x2] }
0x1016   :  { %s7052_s27 = smov [#allocation5]   ;;  %s6943_s28 = scalar_lea.hbm %s7873_s9, 1024 }
0x1017   :  { %s202_s22 = sshll.u32 %s7052_s27, 4  ;;  %p6944_p10 = scmp.ne.s32.totalorder %s7873_s9, %s6943_s28  ;;  %s203_s22 = int_to_ptr.vmem [resolvable:$true] %s202_s22 }
0x1018   :  { %p6947_p11 = scmp.lt.u32.totalorder %s6943_s28, %s7873_s9 }
0x101a   :  { %p6949_p12 = pnand %p6947_p11, %p6944_p10 }
0x101c   :  { %6952 = shalt.err (!%p6949_p12)  }
0x101d   :  { %s6953_s2 = scalar_lea.vmem %s203_s22, 1024  ;;  %p6958_p0 = scmp.lt.s32.totalorder %s203_s22, %s203_s22 }
0x101e   :  { %p6954_p13 = scmp.ne.s32.totalorder %s203_s22, %s6953_s2  ;;  %p6959_p1 = scmp.lt.s32.totalorder %s6953_s2, %s6953_s2 }
0x1020   :  { %p6960_p2 = por %p6959_p1, %p6958_p0 }
0x1022   :  { %p6961_p3 = pnand %p6960_p2, %p6954_p13 }
0x1024   :  { %6964 = shalt.err (!%p6961_p3)  }
0x1025   :  { %205 = dma.hbm_to_vmem [thread:$0]  %s7873_s9, 1024, %s203_s22, [#allocation6 + $0x3]  ;;  %v2716_v27 = vrot.slane %v7487_v7, %v7285_v39  ;;  %v2721_v31 = vrot.slane %v7487_v7, %v7289_v41 }
0x10cb   :  { %v2623_v17 = vpop.f32.mrb[34].mxu0 }
0x10cc   :  { %v6408_v18 = vpop.f32.mrb[35].mxu0  ;;  %v2698_v20 = vmul.f32 %v2623_v17, %v2623_v17  ;;  %v2704_v26 = vrot.slane %v2623_v17, %v7261_v13 }
0x10ce   :  { %v2705_v28 = vsub.f32 %v7491_v10, %v2704_v26 }
0x10cf   :  { %v2694_v21 = vpop.f32.mrb[40].mxu0 }
0x10d0   :  { %v2699_v22 = vsub.f32 %v2694_v21, %v2698_v20  ;;  %v6413_v23 = vpop.f32.mrb[41].mxu0 }
0x10d2   :  { %v2700_v24 = vmax.f32 %v2699_v22, 0.0 }
0x10d4   :  { %v2706_v25 = vadd.f32 1e-05, %v2700_v24 }
0x10d6   :  { %6677 = vrsqrt.f32 %v2706_v25 }
0x10e0   :  { %v6678_v1 = vpop.eup %6677 }
0x10e1   :  { %v2711_v29 = vrot.slane %v6678_v1, %v7261_v13 }
0x10e3   :  { %v2712_v32 = vmul.f32 %v2711_v29, %v2705_v28 }
0x10e5   :  { %v2717_v33 = vmul.f32 %v2716_v27, %v2712_v32 }
0x10e7   :  { %v2722_v34 = vadd.f32 %v2721_v31, %v2717_v33 }
0x10e9   :  { %v2723_v35 = vadd.f32 %v2722_v34, %v7459_v30 }
0x10eb   :  { %v7547_v36 = vmax.f32 %v2723_v35, 0.0 }
0x10ec   :  { %7019 = dma.done.wait [#allocation6], 24576 }
0x10ed   :  { %7020 = vsyncadd [#allocation6], 4294942720 }
0x10ee   :  { %7021 = dma.done.wait [#allocation6 + $0x1], 384 }
0x10ef   :  { %7022 = vsyncadd [#allocation6 + $0x1], 4294966912 }
0x10f0   :  { %7023 = dma.done.wait [#allocation6 + $0x2], 192 }
0x10f1   :  { %7024 = vsyncadd [#allocation6 + $0x2], 4294967104  ;;  %v7053_v37 = vmov 0   ;;  %v2742_v38 = vld [vmem:[#allocation2 + $0x8] sm:$0xff]  ;;  %v2741_v40 = vld [vmem:[#allocation2] sm:$0xff]  ;;  %v2740_v55 = vpack.c.bf16 %v7547_v36, %v7547_v36 }
0x10f2   :  { %2827 = vmatprep.mubr.bf16.mxu0 %v7053_v37  ;;  %2868 = vmatprep.mubr.bf16.mxu1 %v7053_v37  ;;  %v2746_v30 = vld [vmem:[#allocation2 + $0x28] sm:$0xff]  ;;  %v2745_v16 = vld [vmem:[#allocation2 + $0x20] sm:$0xff]  ;;  %v2744_v8 = vld [vmem:[#allocation2 + $0x18] sm:$0xff] }
0x10f3   :  { %6679 = vset.pattern.permute.xlu1 %v7053_v37  ;;  %6680 = vset.pattern.permute.xlu0 %v7053_v37  ;;  %v2750_v42 = vld [vmem:[#allocation2 + $0x48] sm:$0xff]  ;;  %v2749_v43 = vld [vmem:[#allocation2 + $0x40] sm:$0xff]  ;;  %v2743_v9 = vld [vmem:[#allocation2 + $0x10] sm:$0xff] }
0x10f4   :  { %2795 = vmatprep.subr.bf16.mxu0 %v2742_v38  ;;  %v2754_v44 = vld [vmem:[#allocation2 + $0x68] sm:$0xff]  ;;  %v2753_v45 = vld [vmem:[#allocation2 + $0x60] sm:$0xff]  ;;  %v2748_v10 = vld [vmem:[#allocation2 + $0x38] sm:$0xff]  ;;  %2836 = vmatprep.subr.bf16.mxu1 %v2744_v8 }
0x10f5   :  { %2796 = vmatpush1.bf16.msra.mxu0 %v2741_v40  ;;  %v2758_v46 = vld [vmem:[#allocation2 + $0x88] sm:$0xff]  ;;  %v2757_v47 = vld [vmem:[#allocation2 + $0x80] sm:$0xff]  ;;  %2837 = vmatpush1.bf16.msra.mxu1 %v2743_v9  ;;  %v2747_v50 = vld [vmem:[#allocation2 + $0x30] sm:$0xff] }
0x10f6   :  { %2797 = vmatprep.subr.bf16.mxu0 %v2746_v30  ;;  %v2762_v48 = vld [vmem:[#allocation2 + $0xa8] sm:$0xff]  ;;  %v2761_v49 = vld [vmem:[#allocation2 + $0xa0] sm:$0xff]  ;;  %2838 = vmatprep.subr.bf16.mxu1 %v2748_v10  ;;  %v2752_v11 = vld [vmem:[#allocation2 + $0x58] sm:$0xff] }
0x10f7   :  { %v2766_v51 = vld [vmem:[#allocation2 + $0xc8] sm:$0xff]  ;;  %v2765_v52 = vld [vmem:[#allocation2 + $0xc0] sm:$0xff]  ;;  %v2751_v14 = vld [vmem:[#allocation2 + $0x50] sm:$0xff] }
0x10f8   :  { %v2770_v53 = vld [vmem:[#allocation2 + $0xe8] sm:$0xff]  ;;  %v2769_v54 = vld [vmem:[#allocation2 + $0xe0] sm:$0xff]  ;;  %v2756_v15 = vld [vmem:[#allocation2 + $0x78] sm:$0xff] }
0x10f9   :  { %2798 = vmatpush1.bf16.msra.mxu0 %v2745_v16  ;;  %v7558_v56 = vld [vmem:[#allocation3] sm:$0xf]  ;;  %v7567_v3 = vld [vmem:[#allocation12] sm:$0xff]  ;;  %2839 = vmatpush1.bf16.msra.mxu1 %v2747_v50  ;;  %v2760_v18 = vld [vmem:[#allocation2 + $0x98] sm:$0xff] }
0x10fa   :  { %2799 = vmatprep.subr.bf16.mxu0 %v2750_v42  ;;  %v2782_v57 = vrot.slane %v7558_v56, %v7285_v39  ;;  %v2778_v59 = vrot.slane %v7558_v56, %v7261_v13  ;;  %2840 = vmatprep.subr.bf16.mxu1 %v2752_v11  ;;  %v2755_v17 = vld [vmem:[#allocation2 + $0x70] sm:$0xff]  ;;  %v2764_v21 = vld [vmem:[#allocation2 + $0xb8] sm:$0xff]  ;;  %v2786_v32 = vrot.slane %v7558_v56, %v7289_v41  ;;  %v3224_v8 = vld [vmem:[#allocation2 + $0x188] sm:$0xff] }
0x10fb   :  { %v2759_v20 = vld [vmem:[#allocation2 + $0x90] sm:$0xff]  ;;  %v2768_v23 = vld [vmem:[#allocation2 + $0xd8] sm:$0xff]  ;;  %v3223_v10 = vld [vmem:[#allocation2 + $0x180] sm:$0xff] }
0x10fc   :  { %v2763_v22 = vld [vmem:[#allocation2 + $0xb0] sm:$0xff]  ;;  %v2772_v25 = vld [vmem:[#allocation2 + $0xf8] sm:$0xff]  ;;  %v3228_v11 = vld [vmem:[#allocation2 + $0x1a8] sm:$0xff] }
0x10fd   :  { %2800 = vmatpush1.bf16.msra.mxu0 %v2749_v43  ;;  %2841 = vmatpush1.bf16.msra.mxu1 %v2751_v14  ;;  %v2767_v24 = vld [vmem:[#allocation2 + $0xd0] sm:$0xff]  ;;  %v3226_v9 = vld [vmem:[#allocation2 + $0x198] sm:$0xff] }
0x10fe   :  { %2801 = vmatprep.subr.bf16.mxu0 %v2754_v44  ;;  %2842 = vmatprep.subr.bf16.mxu1 %v2756_v15  ;;  %v2771_v26 = vld [vmem:[#allocation2 + $0xf0] sm:$0xff]  ;;  %v3230_v14 = vld [vmem:[#allocation2 + $0x1b8] sm:$0xff]  ;;  %v3227_v15 = vld [vmem:[#allocation2 + $0x1a0] sm:$0xff] }
0x10ff   :  { %v7576_v16 = vld [vmem:[#allocation13] sm:$0xff] }
0x1100   :  { %v3225_v50 = vld [vmem:[#allocation2 + $0x190] sm:$0xff] }
0x1101   :  { %2802 = vmatpush1.bf16.msra.mxu0 %v2753_v45  ;;  %2843 = vmatpush1.bf16.msra.mxu1 %v2755_v17  ;;  %v3229_v17 = vld [vmem:[#allocation2 + $0x1b0] sm:$0xff] }
0x1102   :  { %2803 = vmatprep.subr.bf16.mxu0 %v2758_v46  ;;  %2844 = vmatprep.subr.bf16.mxu1 %v2760_v18  ;;  %v7586_v46 = vsub.s32 3, %v7258_v12  ;;  %v3208_v12 = vld [vmem:[#allocation2 + $0x108] sm:$0xff] }
0x1103   :  { %v3232_v18 = vld [vmem:[#allocation2 + $0x1c8] sm:$0xff] }
0x1105   :  { %2804 = vmatpush1.bf16.msra.mxu0 %v2757_v47  ;;  %2845 = vmatpush1.bf16.msra.mxu1 %v2759_v20  ;;  %v2790_v47 = vrot.slane %v7558_v56, %v7586_v46  ;;  %v3209_v56 = vld [vmem:[#allocation2 + $0x110] sm:$0xff]  ;;  %v3234_v20 = vld [vmem:[#allocation2 + $0x1d8] sm:$0xff] }
0x1106   :  { %2805 = vmatprep.subr.bf16.mxu0 %v2762_v48  ;;  %2846 = vmatprep.subr.bf16.mxu1 %v2764_v21  ;;  %v3231_v21 = vld [vmem:[#allocation2 + $0x1c0] sm:$0xff] }
0x1109   :  { %2806 = vmatpush1.bf16.msra.mxu0 %v2761_v49  ;;  %2847 = vmatpush1.bf16.msra.mxu1 %v2763_v22  ;;  %v3233_v22 = vld [vmem:[#allocation2 + $0x1d0] sm:$0xff] }
0x110a   :  { %2807 = vmatprep.subr.bf16.mxu0 %v2766_v51  ;;  %2848 = vmatprep.subr.bf16.mxu1 %v2768_v23  ;;  %v3236_v23 = vld [vmem:[#allocation2 + $0x1e8] sm:$0xff] }
0x110d   :  { %2808 = vmatpush1.bf16.msra.mxu0 %v2765_v52  ;;  %2849 = vmatpush1.bf16.msra.mxu1 %v2767_v24  ;;  %v3238_v24 = vld [vmem:[#allocation2 + $0x1f8] sm:$0xff] }
0x110e   :  { %2809 = vmatprep.subr.bf16.mxu0 %v2770_v53  ;;  %2850 = vmatprep.subr.bf16.mxu1 %v2772_v25  ;;  %v3235_v25 = vld [vmem:[#allocation2 + $0x1e0] sm:$0xff] }
0x1111   :  { %2810 = vmatpush1.bf16.msra.mxu0 %v2769_v54  ;;  %2851 = vmatpush1.bf16.msra.mxu1 %v2771_v26  ;;  %v3210_v54 = vld [vmem:[#allocation2 + $0x118] sm:$0xff]  ;;  %v3237_v26 = vld [vmem:[#allocation2 + $0x1f0] sm:$0xff] }
0x1112   :  { %6414 = vmatprep.subr.mxu0 %v7042_v0  ;;  %3262 = vmatprep.subr.bf16.mxu1 %v3208_v12 }
0x1114   :  { %2828 = vmatmul.mubr.bf16.vlgmr.msra.gmra.mrb[44].mxu0 %v2740_v55  ;;  %2869 = vmatmul.mubr.bf16.vlgmr.msra.gmra.mrb[32].mxu1 %v2740_v55  ;;  %v3207_v55 = vld [vmem:[#allocation2 + $0x100] sm:$0xff] }
0x1115   :  { %6416 = vmatprep.mubr.msk.f32.mxu0 %vm7043_vm0, %v7042_v0  ;;  %3294 = vmatprep.mubr.bf16.mxu1 %v7053_v37 }
0x1116   :  { %3263 = vmatpush1.bf16.msra.mxu1 %v3207_v55 }
0x11e7   :  { %v2829_v58 = vpop.f32.mrb[44].mxu0  ;;  %v2870_v33 = vpop.f32.mrb[32].mxu1 }
0x11e8   :  { %v2831_v60 = vpop.f32.mrb[45].mxu0  ;;  %v2830_v2 = vadd.f32 %v2829_v58, %v2778_v59  ;;  %v2871_v34 = vadd.f32 %v2870_v33, %v2786_v32  ;;  %v2872_v35 = vpop.f32.mrb[33].mxu1  ;;  %v3214_v58 = vld [vmem:[#allocation2 + $0x138] sm:$0xff]  ;;  %v3211_v59 = vld [vmem:[#allocation2 + $0x120] sm:$0xff] }
0x11e9   :  { %v2832_v61 = vadd.f32 %v2831_v60, %v2782_v57  ;;  %v2833_v62 = vpop.f32.mrb[46].mxu0  ;;  %v2874_v38 = vpop.f32.mrb[34].mxu1  ;;  %v2873_v48 = vadd.f32 %v2872_v35, %v2790_v47  ;;  %v3212_v57 = vld [vmem:[#allocation2 + $0x128] sm:$0xff]  ;;  %v3213_v60 = vld [vmem:[#allocation2 + $0x130] sm:$0xff] }
0x11ea   :  { %v2834_v63 = vpop.f32.mrb[47].mxu0  ;;  %v2875_v40 = vpop.f32.mrb[35].mxu1  ;;  %3264 = vmatprep.subr.bf16.mxu1 %v3212_v57  ;;  %v3218_v62 = vld [vmem:[#allocation2 + $0x158] sm:$0xff] }
0x11eb   :  { %6415 = vmatpush3.xpose.msra.mxu0 %v2832_v61  ;;  %3265 = vmatpush1.bf16.msra.mxu1 %v3211_v59  ;;  %v3216_v61 = vld [vmem:[#allocation2 + $0x148] sm:$0xff]  ;;  %v3215_v63 = vld [vmem:[#allocation2 + $0x140] sm:$0xff]  ;;  %v3037_v38 = vld [vmem:[#allocation4] sm:$0x3] }
0x11ec   :  { %6419 = vmatprep.subr.mxu0 %v7042_v0  ;;  %3266 = vmatprep.subr.bf16.mxu1 %v3216_v61  ;;  %v3202_v47 = vrot.slane %v3037_v38, %v7285_v39 }
0x11ee   :  { %6417 = vmatmul.mubr.f32.vlgmr.msra.gmra.mrb[42].mxu0 %v2830_v2  ;;  %v3217_v2 = vld [vmem:[#allocation2 + $0x150] sm:$0xff] }
0x11ef   :  { %6421 = vmatprep.mubr.msk.f32.mxu0 %vm7043_vm0, %v7042_v0  ;;  %6420 = vmatpush3.msra.mxu0 %v2871_v34 }
0x11f0   :  { %6424 = vmatprep.subr.mxu0 %v7042_v0  ;;  %3267 = vmatpush1.bf16.msra.mxu1 %v3215_v63 }
0x12c1   :  { %v2943_v4 = vpop.f32.mrb[42].mxu0 }
0x12c2   :  { %v2944_v5 = vadd.f32 %v2943_v4, %v7567_v3  ;;  %v6418_v6 = vpop.f32.mrb[43].mxu0  ;;  %v3220_v4 = vld [vmem:[#allocation2 + $0x168] sm:$0xff] }
0x12c3   :  { %3268 = vmatprep.subr.bf16.mxu1 %v3220_v4  ;;  %v3219_v6 = vld [vmem:[#allocation2 + $0x160] sm:$0xff] }
0x12c4   :  { %v2947_v7 = vsel %vm318_vm1, %v2944_v5, -inf  ;;  %3269 = vmatpush1.bf16.msra.mxu1 %v3219_v6 }
0x12c5   :  { %2948 = vmax.xlane.f32.xlu0 %v2947_v7  ;;  %v3221_v7 = vld [vmem:[#allocation2 + $0x170] sm:$0xff]  ;;  %3270 = vmatprep.subr.bf16.mxu1 %v3224_v8 }
0x12c8   :  { %3271 = vmatpush1.bf16.msra.mxu1 %v3223_v10 }
0x12c9   :  { %3272 = vmatprep.subr.bf16.mxu1 %v3228_v11 }
0x12cc   :  { %3273 = vmatpush1.bf16.msra.mxu1 %v3227_v15 }
0x12cd   :  { %3274 = vmatprep.subr.bf16.mxu1 %v3232_v18 }
0x12d0   :  { %3275 = vmatpush1.bf16.msra.mxu1 %v3231_v21 }
0x12d1   :  { %3276 = vmatprep.subr.bf16.mxu1 %v3236_v23 }
0x12d4   :  { %3277 = vmatpush1.bf16.msra.mxu1 %v3235_v25 }
0x12d5   :  { %6434 = vmatprep.subr.mxu1 %v7042_v0 }
0x1352   :  { %v2949_v1 = vpop.xlane.xlu0 %2948 }
0x1353   :  { %v2950_v27 = vsub.f32 %v2944_v5, %v2949_v1  ;;  %v3222_v5 = vld [vmem:[#allocation2 + $0x178] sm:$0xff] }
0x1355   :  { %v2951_v28 = vmul.f32 1.442695, %v2950_v27 }
0x1357   :  { %6681 = vpow2.f32 %v2951_v28 }
0x1361   :  { %v6682_v29 = vpop.eup %6681 }
0x1362   :  { %v2953_v31 = vsel %vm318_vm1, %v6682_v29, 0.0 }
0x1363   :  { %2954 = vadd.xlane.f32.xlu0 %v2953_v31 }
0x13f0   :  { %v2955_v30 = vpop.xlane.xlu0 %2954 }
0x13f1   :  { %6683 = vrcp.f32 %v2955_v30 }
0x13fb   :  { %v6684_v42 = vpop.eup %6683 }
0x13fc   :  { %v2957_v43 = vmul.f32 %v6684_v42, %v7576_v16 }
0x13fe   :  { %2960 = vperm.xlu1 %6679, %v2957_v43   ;;  %v3197_v43 = vrot.slane %v3037_v38, %v7261_v13  ;;  %v3684_v38 = vld [vmem:[#allocation2 + $0x230] sm:$0xff] }
0x147d   :  { %v2961_v44 = vpop.permute.xlu1 %2960 }
0x147e   :  { %v7579_v45 = vmul.f32 %v6682_v29, %v2961_v44 }
0x1480   :  { %6422 = vmatmul.mubr.msk.f32.vlgmr.msra.gmra.mrb[48].mxu0 %vm318_vm1, %v7579_v45 }
0x1481   :  { %6426 = vmatprep.mubr.msk.f32.mxu0 %vm7043_vm0, %v7042_v0 }
0x1553   :  { %v3033_v49 = vpop.f32.mrb[48].mxu0 }
0x1554   :  { %v7590_v51 = vadd.f32 %v3033_v49, %v2873_v48  ;;  %v6423_v52 = vpop.f32.mrb[49].mxu0 }
0x1556   :  { %v3108_v53 = vmul.f32 %v7590_v51, %v7590_v51  ;;  %6425 = vmatpush3.msra.mxu0 %v7590_v51 }
0x1557   :  { %6427 = vmatmul.mubr.msk.f32.vlgmr.msra.gmra.mrb[50].mxu0 %vm318_vm1, %v7264_v19  ;;  %6429 = vmatprep.subr.mxu0 %v7042_v0 }
0x1558   :  { %6430 = vmatpush3.msra.mxu0 %v3108_v53  ;;  %6431 = vmatprep.mubr.msk.f32.mxu0 %vm7043_vm0, %v7042_v0 }
0x1559   :  { %3303 = vmatprep.subr.bf16.mxu0 %v3210_v54 }
0x155b   :  { %6432 = vmatmul.mubr.msk.f32.vlgmr.msra.gmra.mrb[52].mxu0 %vm318_vm1, %v7264_v19 }
0x155c   :  { %3335 = vmatprep.mubr.bf16.mxu0 %v7053_v37  ;;  %3304 = vmatpush1.bf16.msra.mxu0 %v3209_v56 }
0x155d   :  { %3305 = vmatprep.subr.bf16.mxu0 %v3214_v58 }
0x1560   :  { %3306 = vmatpush1.bf16.msra.mxu0 %v3213_v60 }
0x1561   :  { %3307 = vmatprep.subr.bf16.mxu0 %v3218_v62 }
0x1564   :  { %3308 = vmatpush1.bf16.msra.mxu0 %v3217_v2 }
0x1565   :  { %3309 = vmatprep.subr.bf16.mxu0 %v3222_v5 }
0x1568   :  { %3310 = vmatpush1.bf16.msra.mxu0 %v3221_v7 }
0x1569   :  { %3311 = vmatprep.subr.bf16.mxu0 %v3226_v9 }
0x156c   :  { %3312 = vmatpush1.bf16.msra.mxu0 %v3225_v50 }
0x156d   :  { %3313 = vmatprep.subr.bf16.mxu0 %v3230_v14 }
0x1570   :  { %3314 = vmatpush1.bf16.msra.mxu0 %v3229_v17 }
0x1571   :  { %3315 = vmatprep.subr.bf16.mxu0 %v3234_v20 }
0x1574   :  { %3316 = vmatpush1.bf16.msra.mxu0 %v3233_v22 }
0x1575   :  { %3317 = vmatprep.subr.bf16.mxu0 %v3238_v24 }
0x1578   :  { %3318 = vmatpush1.bf16.msra.mxu0 %v3237_v26 }
0x1579   :  { %6439 = vmatprep.subr.mxu0 %v7042_v0 }
0x162a   :  { %v3104_v1 = vpop.f32.mrb[50].mxu0 }
0x162b   :  { %v6428_v27 = vpop.f32.mrb[51].mxu0  ;;  %v3179_v28 = vmul.f32 %v3104_v1, %v3104_v1  ;;  %v3185_v35 = vrot.slane %v3104_v1, %v7261_v13 }
0x162d   :  { %v3186_v30 = vsub.f32 %v7590_v51, %v3185_v35  ;;  %v3240_v51 = vld [vmem:[#allocation3 + $0x4] sm:$0xf] }
0x162e   :  { %v3175_v29 = vpop.f32.mrb[52].mxu0  ;;  %v3253_v12 = vrot.slane %v3240_v51, %v7289_v41  ;;  %v3249_v54 = vrot.slane %v3240_v51, %v7285_v39  ;;  %v3245_v57 = vrot.slane %v3240_v51, %v7261_v13  ;;  %v3257_v23 = vrot.slane %v3240_v51, %v7586_v46  ;;  %v3682_v35 = vld [vmem:[#allocation2 + $0x220] sm:$0xff] }
0x162f   :  { %v3180_v31 = vsub.f32 %v3175_v29, %v3179_v28  ;;  %v6433_v32 = vpop.f32.mrb[53].mxu0  ;;  %v3679_v28 = vld [vmem:[#allocation2 + $0x208] sm:$0xff]  ;;  %v3681_v29 = vld [vmem:[#allocation2 + $0x218] sm:$0xff]  ;;  %v3694_v51 = vld [vmem:[#allocation2 + $0x280] sm:$0xff] }
0x1630   :  { %v3680_v32 = vld [vmem:[#allocation2 + $0x210] sm:$0xff] }
0x1631   :  { %v3181_v33 = vmax.f32 %v3180_v31, 0.0  ;;  %v3678_v31 = vld [vmem:[#allocation2 + $0x200] sm:$0xff] }
0x1633   :  { %v3187_v34 = vadd.f32 1e-05, %v3181_v33  ;;  %v3683_v33 = vld [vmem:[#allocation2 + $0x228] sm:$0xff] }
0x1635   :  { %6685 = vrsqrt.f32 %v3187_v34  ;;  %v3685_v34 = vld [vmem:[#allocation2 + $0x238] sm:$0xff] }
0x163f   :  { %v6686_v40 = vpop.eup %6685 }
0x1640   :  { %v3192_v42 = vrot.slane %v6686_v40, %v7261_v13  ;;  %v3687_v40 = vld [vmem:[#allocation2 + $0x248] sm:$0xff] }
0x1642   :  { %v3193_v44 = vmul.f32 %v3192_v42, %v3186_v30  ;;  %v3689_v30 = vld [vmem:[#allocation2 + $0x258] sm:$0xff]  ;;  %v3686_v42 = vld [vmem:[#allocation2 + $0x240] sm:$0xff] }
0x1644   :  { %v3198_v48 = vmul.f32 %v3197_v43, %v3193_v44  ;;  %v3688_v43 = vld [vmem:[#allocation2 + $0x250] sm:$0xff]  ;;  %v3691_v44 = vld [vmem:[#allocation2 + $0x268] sm:$0xff] }
0x1646   :  { %v3203_v49 = vadd.f32 %v3202_v47, %v3198_v48  ;;  %v3693_v47 = vld [vmem:[#allocation2 + $0x278] sm:$0xff]  ;;  %v3690_v48 = vld [vmem:[#allocation2 + $0x260] sm:$0xff] }
0x1648   :  { %v3204_v52 = vmax.f32 %v3203_v49, 0.0  ;;  %v3692_v49 = vld [vmem:[#allocation2 + $0x270] sm:$0xff] }
0x164a   :  { %v3205_v53 = vpack.c.bf16 %v3204_v52, %v3204_v52  ;;  %v3695_v52 = vld [vmem:[#allocation2 + $0x288] sm:$0xff] }
0x164c   :  { %3295 = vmatmul.mubr.bf16.vlgmr.msra.gmra.mrb[36].mxu1 %v3205_v53  ;;  %3336 = vmatmul.mubr.bf16.vlgmr.msra.gmra.mrb[56].mxu0 %v3205_v53  ;;  %v3697_v53 = vld [vmem:[#allocation2 + $0x298] sm:$0xff] }
0x164d   :  { %6436 = vmatprep.mubr.msk.f32.mxu1 %vm7043_vm0, %v7042_v0  ;;  %6441 = vmatprep.mubr.msk.f32.mxu0 %vm7043_vm0, %v7042_v0 }
0x171f   :  { %v3296_v55 = vpop.f32.mrb[36].mxu1  ;;  %v3337_v56 = vpop.f32.mrb[56].mxu0 }
0x1720   :  { %v3338_v58 = vadd.f32 %v3337_v56, %v3253_v12  ;;  %v3298_v59 = vpop.f32.mrb[37].mxu1  ;;  %v3339_v60 = vpop.f32.mrb[57].mxu0  ;;  %v3297_v5 = vadd.f32 %v3296_v55, %v3245_v57  ;;  %v3696_v12 = vld [vmem:[#allocation2 + $0x290] sm:$0xff]  ;;  %v3701_v55 = vld [vmem:[#allocation2 + $0x2b8] sm:$0xff]  ;;  %v3698_v56 = vld [vmem:[#allocation2 + $0x2a0] sm:$0xff] }
0x1721   :  { %v3299_v61 = vadd.f32 %v3298_v59, %v3249_v54  ;;  %v3300_v62 = vpop.f32.mrb[38].mxu1  ;;  %v3341_v63 = vpop.f32.mrb[58].mxu0  ;;  %v3340_v24 = vadd.f32 %v3339_v60, %v3257_v23  ;;  %v3699_v54 = vld [vmem:[#allocation2 + $0x2a8] sm:$0xff]  ;;  %v3700_v57 = vld [vmem:[#allocation2 + $0x2b0] sm:$0xff]  ;;  %v3705_v59 = vld [vmem:[#allocation2 + $0x2d8] sm:$0xff] }
0x1722   :  { %v3301_v2 = vpop.f32.mrb[39].mxu1  ;;  %v3342_v4 = vpop.f32.mrb[59].mxu0  ;;  %6440 = vmatpush3.msra.mxu0 %v3338_v58  ;;  %v3703_v58 = vld [vmem:[#allocation2 + $0x2c8] sm:$0xff]  ;;  %v3702_v60 = vld [vmem:[#allocation2 + $0x2c0] sm:$0xff]  ;;  %v3709_v63 = vld [vmem:[#allocation2 + $0x2f8] sm:$0xff] }
0x1723   :  { %6435 = vmatpush3.xpose.msra.mxu1 %v3299_v61  ;;  %6449 = vmatprep.subr.mxu0 %v7042_v0  ;;  %v3704_v61 = vld [vmem:[#allocation2 + $0x2d0] sm:$0xff]  ;;  %v3707_v62 = vld [vmem:[#allocation2 + $0x2e8] sm:$0xff]  ;;  %v3706_v2 = vld [vmem:[#allocation2 + $0x2e0] sm:$0xff] }
0x1724   :  { %6444 = vmatprep.subr.mxu1 %v7042_v0  ;;  %v3708_v4 = vld [vmem:[#allocation2 + $0x2f0] sm:$0xff] }
0x1726   :  { %6437 = vmatmul.mubr.f32.vlgmr.msra.gmra.mrb[26].mxu1 %v3297_v5 }
0x1727   :  { %6446 = vmatprep.mubr.msk.f32.mxu1 %vm7043_vm0, %v7042_v0 }
0x17f9   :  { %v3410_v6 = vpop.f32.mrb[26].mxu1 }
0x17fa   :  { %v3411_v7 = vadd.f32 %v3410_v6, %v7567_v3  ;;  %v6438_v8 = vpop.f32.mrb[27].mxu1 }
0x17fc   :  { %v3414_v9 = vsel %vm318_vm1, %v3411_v7, -inf }
0x17fd   :  { %3415 = vmax.xlane.f32.xlu1 %v3414_v9 }
0x188a   :  { %v3416_v10 = vpop.xlane.xlu1 %3415 }
0x188b   :  { %v3417_v50 = vsub.f32 %v3411_v7, %v3416_v10 }
0x188d   :  { %v3418_v11 = vmul.f32 1.442695, %v3417_v50 }
0x188f   :  { %6687 = vpow2.f32 %v3418_v11 }
0x1899   :  { %v6688_v14 = vpop.eup %6687 }
0x189a   :  { %v3420_v15 = vsel %vm318_vm1, %v6688_v14, 0.0 }
0x189b   :  { %3421 = vadd.xlane.f32.xlu0 %v3420_v15  ;;  %v3505_v15 = vld [vmem:[#allocation4 + $0x2] sm:$0x3] }
0x1928   :  { %v3422_v17 = vpop.xlane.xlu0 %3421 }
0x1929   :  { %6689 = vrcp.f32 %v3422_v17 }
0x1933   :  { %v6690_v18 = vpop.eup %6689 }
0x1934   :  { %v3424_v20 = vmul.f32 %v6690_v18, %v7576_v16 }
0x1936   :  { %3427 = vperm.xlu0 %6680, %v3424_v20  }
0x19b5   :  { %v3428_v21 = vpop.permute.xlu0 %3427 }
0x19b6   :  { %v7625_v22 = vmul.f32 %v6688_v14, %v3428_v21  ;;  %v3665_v21 = vrot.slane %v3505_v15, %v7261_v13 }
0x19b8   :  { %6442 = vmatmul.mubr.msk.f32.vlgmr.msra.gmra.mrb[54].mxu0 %vm318_vm1, %v7625_v22 }
0x19b9   :  { %6451 = vmatprep.mubr.msk.f32.mxu0 %vm7043_vm0, %v7042_v0 }
0x1a8b   :  { %v3500_v25 = vpop.f32.mrb[54].mxu0 }
0x1a8c   :  { %v7632_v26 = vadd.f32 %v3500_v25, %v3340_v24  ;;  %v6443_v1 = vpop.f32.mrb[55].mxu0  ;;  %v3670_v24 = vrot.slane %v3505_v15, %v7285_v39  ;;  %v4150_v15 = vld [vmem:[#allocation2 + $0x320] sm:$0xff] }
0x1a8e   :  { %v3576_v27 = vmul.f32 %v7632_v26, %v7632_v26  ;;  %6445 = vmatpush3.msra.mxu1 %v7632_v26 }
0x1a8f   :  { %6447 = vmatmul.mubr.msk.f32.vlgmr.msra.gmra.mrb[40].mxu1 %vm318_vm1, %v7264_v19  ;;  %3733 = vmatprep.subr.bf16.mxu1 %v3679_v28 }
0x1a90   :  { %6450 = vmatpush3.msra.mxu0 %v3576_v27  ;;  %3765 = vmatprep.mubr.bf16.mxu1 %v7053_v37 }
0x1a91   :  { %6452 = vmatmul.mubr.msk.f32.vlgmr.msra.gmra.mrb[60].mxu0 %vm318_vm1, %v7264_v19  ;;  %3774 = vmatprep.subr.bf16.mxu0 %v3681_v29 }
0x1a92   :  { %3806 = vmatprep.mubr.bf16.mxu0 %v7053_v37  ;;  %3734 = vmatpush1.bf16.msra.mxu1 %v3678_v31 }
0x1a93   :  { %3775 = vmatpush1.bf16.msra.mxu0 %v3680_v32  ;;  %3735 = vmatprep.subr.bf16.mxu1 %v3683_v33 }
0x1a94   :  { %3776 = vmatprep.subr.bf16.mxu0 %v3685_v34 }
0x1a96   :  { %3736 = vmatpush1.bf16.msra.mxu1 %v3682_v35 }
0x1a97   :  { %3777 = vmatpush1.bf16.msra.mxu0 %v3684_v38  ;;  %3737 = vmatprep.subr.bf16.mxu1 %v3687_v40 }
0x1a98   :  { %3778 = vmatprep.subr.bf16.mxu0 %v3689_v30 }
0x1a9a   :  { %3738 = vmatpush1.bf16.msra.mxu1 %v3686_v42 }
0x1a9b   :  { %3779 = vmatpush1.bf16.msra.mxu0 %v3688_v43  ;;  %3739 = vmatprep.subr.bf16.mxu1 %v3691_v44 }
0x1a9c   :  { %3780 = vmatprep.subr.bf16.mxu0 %v3693_v47 }
0x1a9e   :  { %3740 = vmatpush1.bf16.msra.mxu1 %v3690_v48 }
0x1a9f   :  { %3781 = vmatpush1.bf16.msra.mxu0 %v3692_v49  ;;  %3741 = vmatprep.subr.bf16.mxu1 %v3695_v52 }
0x1aa0   :  { %3782 = vmatprep.subr.bf16.mxu0 %v3697_v53 }
0x1aa2   :  { %3742 = vmatpush1.bf16.msra.mxu1 %v3694_v51 }
0x1aa3   :  { %3783 = vmatpush1.bf16.msra.mxu0 %v3696_v12  ;;  %3743 = vmatprep.subr.bf16.mxu1 %v3699_v54 }
0x1aa4   :  { %3784 = vmatprep.subr.bf16.mxu0 %v3701_v55 }
0x1aa6   :  { %3744 = vmatpush1.bf16.msra.mxu1 %v3698_v56 }
0x1aa7   :  { %3785 = vmatpush1.bf16.msra.mxu0 %v3700_v57  ;;  %3745 = vmatprep.subr.bf16.mxu1 %v3703_v58 }
0x1aa8   :  { %3786 = vmatprep.subr.bf16.mxu0 %v3705_v59 }
0x1aaa   :  { %3746 = vmatpush1.bf16.msra.mxu1 %v3702_v60 }
0x1aab   :  { %3787 = vmatpush1.bf16.msra.mxu0 %v3704_v61  ;;  %3747 = vmatprep.subr.bf16.mxu1 %v3707_v62  ;;  %v3675_v62 = vadd.f32 %v7625_v22, %v7579_v45  ;;  %v4147_v45 = vld [vmem:[#allocation2 + $0x308] sm:$0xff]  ;;  %v4149_v22 = vld [vmem:[#allocation2 + $0x318] sm:$0xff] }
0x1aac   :  { %3788 = vmatprep.subr.bf16.mxu0 %v3709_v63 }
0x1aae   :  { %3748 = vmatpush1.bf16.msra.mxu1 %v3706_v2 }
0x1aaf   :  { %3789 = vmatpush1.bf16.msra.mxu0 %v3708_v4  ;;  %6454 = vmatprep.subr.mxu1 %v7042_v0 }
0x1ab0   :  { %6459 = vmatprep.subr.mxu0 %v7042_v0 }
0x1b62   :  { %v3572_v5 = vpop.f32.mrb[40].mxu1 }
0x1b63   :  { %v3647_v6 = vmul.f32 %v3572_v5, %v3572_v5  ;;  %v6448_v7 = vpop.f32.mrb[41].mxu1  ;;  %v3653_v14 = vrot.slane %v3572_v5, %v7261_v13 }
0x1b64   :  { %v3643_v8 = vpop.f32.mrb[60].mxu0 }
0x1b65   :  { %v3648_v9 = vsub.f32 %v3643_v8, %v3647_v6  ;;  %v6453_v10 = vpop.f32.mrb[61].mxu0  ;;  %v3654_v18 = vsub.f32 %v7632_v26, %v3653_v14  ;;  %v3711_v26 = vld [vmem:[#allocation3 + $0x8] sm:$0xf]  ;;  %v4153_v14 = vld [vmem:[#allocation2 + $0x338] sm:$0xff] }
0x1b66   :  { %v3724_v31 = vrot.slane %v3711_v26, %v7289_v41  ;;  %v3720_v32 = vrot.slane %v3711_v26, %v7285_v39  ;;  %v3716_v34 = vrot.slane %v3711_v26, %v7261_v13  ;;  %v3728_v4 = vrot.slane %v3711_v26, %v7586_v46  ;;  %v4146_v10 = vld [vmem:[#allocation2 + $0x300] sm:$0xff]  ;;  %v4165_v26 = vld [vmem:[#allocation2 + $0x398] sm:$0xff] }
0x1b67   :  { %v3649_v50 = vmax.f32 %v3648_v9, 0.0 }
0x1b69   :  { %v3655_v11 = vadd.f32 1e-05, %v3649_v50  ;;  %v4148_v50 = vld [vmem:[#allocation2 + $0x310] sm:$0xff] }
0x1b6b   :  { %6691 = vrsqrt.f32 %v3655_v11  ;;  %v4151_v11 = vld [vmem:[#allocation2 + $0x328] sm:$0xff] }
0x1b75   :  { %v6692_v17 = vpop.eup %6691 }
0x1b76   :  { %v3660_v20 = vrot.slane %v6692_v17, %v7261_v13  ;;  %v4152_v17 = vld [vmem:[#allocation2 + $0x330] sm:$0xff] }
0x1b78   :  { %v3661_v23 = vmul.f32 %v3660_v20, %v3654_v18  ;;  %v4155_v18 = vld [vmem:[#allocation2 + $0x348] sm:$0xff]  ;;  %v4157_v20 = vld [vmem:[#allocation2 + $0x358] sm:$0xff] }
0x1b7a   :  { %v3666_v25 = vmul.f32 %v3665_v21, %v3661_v23  ;;  %v4154_v21 = vld [vmem:[#allocation2 + $0x340] sm:$0xff]  ;;  %v4156_v23 = vld [vmem:[#allocation2 + $0x350] sm:$0xff] }
0x1b7c   :  { %v3671_v1 = vadd.f32 %v3670_v24, %v3666_v25  ;;  %v4159_v24 = vld [vmem:[#allocation2 + $0x368] sm:$0xff]  ;;  %v4161_v25 = vld [vmem:[#allocation2 + $0x378] sm:$0xff] }
0x1b7e   :  { %v3672_v27 = vadd.f32 %v3671_v1, %v7547_v36  ;;  %v4158_v1 = vld [vmem:[#allocation2 + $0x360] sm:$0xff] }
0x1b80   :  { %v7651_v28 = vmax.f32 %v3672_v27, 0.0  ;;  %v4160_v27 = vld [vmem:[#allocation2 + $0x370] sm:$0xff] }
0x1b82   :  { %v3676_v29 = vpack.c.bf16 %v7651_v28, %v7651_v28 }
0x1b84   :  { %3766 = vmatmul.mubr.bf16.vlgmr.msra.gmra.mrb[44].mxu1 %v3676_v29  ;;  %3807 = vmatmul.mubr.bf16.vlgmr.msra.gmra.mrb[64].mxu0 %v3676_v29  ;;  %v4163_v29 = vld [vmem:[#allocation2 + $0x388] sm:$0xff] }
0x1b85   :  { %6456 = vmatprep.mubr.msk.f32.mxu1 %vm7043_vm0, %v7042_v0  ;;  %6461 = vmatprep.mubr.msk.f32.mxu0 %vm7043_vm0, %v7042_v0 }
0x1c57   :  { %v3767_v33 = vpop.f32.mrb[44].mxu1  ;;  %v3808_v36 = vpop.f32.mrb[64].mxu0 }
0x1c58   :  { %v3809_v35 = vadd.f32 %v3808_v36, %v3724_v31  ;;  %v3769_v38 = vpop.f32.mrb[45].mxu1  ;;  %v3810_v40 = vpop.f32.mrb[65].mxu0  ;;  %v3768_v48 = vadd.f32 %v3767_v33, %v3716_v34  ;;  %v4162_v31 = vld [vmem:[#allocation2 + $0x380] sm:$0xff]  ;;  %v4167_v33 = vld [vmem:[#allocation2 + $0x3a8] sm:$0xff]  ;;  %v4169_v36 = vld [vmem:[#allocation2 + $0x3b8] sm:$0xff] }
0x1c59   :  { %v3770_v30 = vadd.f32 %v3769_v38, %v3720_v32  ;;  %v3771_v42 = vpop.f32.mrb[46].mxu1  ;;  %v3812_v43 = vpop.f32.mrb[66].mxu0  ;;  %v3811_v5 = vadd.f32 %v3810_v40, %v3728_v4  ;;  %v4164_v32 = vld [vmem:[#allocation2 + $0x390] sm:$0xff]  ;;  %v4166_v34 = vld [vmem:[#allocation2 + $0x3a0] sm:$0xff]  ;;  %v4171_v38 = vld [vmem:[#allocation2 + $0x3c8] sm:$0xff] }
0x1c5a   :  { %v3772_v44 = vpop.f32.mrb[47].mxu1  ;;  %v3813_v47 = vpop.f32.mrb[67].mxu0  ;;  %6460 = vmatpush3.msra.mxu0 %v3809_v35  ;;  %v4168_v35 = vld [vmem:[#allocation2 + $0x3b0] sm:$0xff]  ;;  %v4173_v40 = vld [vmem:[#allocation2 + $0x3d8] sm:$0xff]  ;;  %v4175_v43 = vld [vmem:[#allocation2 + $0x3e8] sm:$0xff] }
0x1c5b   :  { %6455 = vmatpush3.xpose.msra.mxu1 %v3770_v30  ;;  %6469 = vmatprep.subr.mxu0 %v7042_v0  ;;  %v4170_v30 = vld [vmem:[#allocation2 + $0x3c0] sm:$0xff]  ;;  %v4172_v42 = vld [vmem:[#allocation2 + $0x3d0] sm:$0xff]  ;;  %v4177_v44 = vld [vmem:[#allocation2 + $0x3f8] sm:$0xff] }
0x1c5c   :  { %6464 = vmatprep.subr.mxu1 %v7042_v0  ;;  %v4174_v47 = vld [vmem:[#allocation2 + $0x3e0] sm:$0xff] }
0x1c5e   :  { %6457 = vmatmul.mubr.f32.vlgmr.msra.gmra.mrb[42].mxu1 %v3768_v48  ;;  %v4176_v48 = vld [vmem:[#allocation2 + $0x3f0] sm:$0xff] }
0x1c5f   :  { %6466 = vmatprep.mubr.msk.f32.mxu1 %vm7043_vm0, %v7042_v0 }
0x1d31   :  { %v3881_v49 = vpop.f32.mrb[42].mxu1 }
0x1d32   :  { %v3882_v52 = vadd.f32 %v3881_v49, %v7567_v3  ;;  %v6458_v53 = vpop.f32.mrb[43].mxu1 }
0x1d34   :  { %v3885_v51 = vsel %vm318_vm1, %v3882_v52, -inf }
0x1d35   :  { %3886 = vmax.xlane.f32.xlu1 %v3885_v51 }
0x1dc2   :  { %v3887_v12 = vpop.xlane.xlu1 %3886 }
0x1dc3   :  { %v3888_v54 = vsub.f32 %v3882_v52, %v3887_v12 }
0x1dc5   :  { %v3889_v55 = vmul.f32 1.442695, %v3888_v54 }
0x1dc7   :  { %6693 = vpow2.f32 %v3889_v55 }
0x1dd1   :  { %v6694_v56 = vpop.eup %6693 }
0x1dd2   :  { %v3891_v57 = vsel %vm318_vm1, %v6694_v56, 0.0 }
0x1dd3   :  { %3892 = vadd.xlane.f32.xlu1 %v3891_v57 }
0x1e60   :  { %v3893_v58 = vpop.xlane.xlu1 %3892 }
0x1e61   :  { %6695 = vrcp.f32 %v3893_v58  ;;  %v3976_v58 = vld [vmem:[#allocation4 + $0x4] sm:$0x3] }
0x1e62   :  { %v4141_v4 = vrot.slane %v3976_v58, %v7285_v39 }
0x1e6b   :  { %v6696_v59 = vpop.eup %6695 }
0x1e6c   :  { %v3895_v60 = vmul.f32 %v6696_v59, %v7576_v16 }
0x1e6e   :  { %3898 = vperm.xlu1 %6679, %v3895_v60  }
0x1eed   :  { %v3899_v61 = vpop.permute.xlu1 %3898 }
0x1eee   :  { %v3901_v63 = vmul.f32 %v6694_v56, %v3899_v61 }
0x1ef0   :  { %v7672_v2 = vadd.f32 %v3901_v63, %v3675_v62  ;;  %6462 = vmatmul.mubr.msk.f32.vlgmr.msra.gmra.mrb[62].mxu0 %vm318_vm1, %v3901_v63  ;;  %v4136_v62 = vrot.slane %v3976_v58, %v7261_v13  ;;  %v4628_v58 = vld [vmem:[#allocation2 + $0x458] sm:$0xff] }
0x1ef1   :  { %6471 = vmatprep.mubr.msk.f32.mxu0 %vm7043_vm0, %v7042_v0 }
0x1fc3   :  { %v3971_v6 = vpop.f32.mrb[62].mxu0 }
0x1fc4   :  { %v7678_v7 = vadd.f32 %v3971_v6, %v3811_v5  ;;  %v6463_v8 = vpop.f32.mrb[63].mxu0 }
0x1fc6   :  { %v4047_v9 = vmul.f32 %v7678_v7, %v7678_v7  ;;  %6465 = vmatpush3.msra.mxu1 %v7678_v7 }
0x1fc7   :  { %6467 = vmatmul.mubr.msk.f32.vlgmr.msra.gmra.mrb[48].mxu1 %vm318_vm1, %v7264_v19  ;;  %4201 = vmatprep.subr.bf16.mxu1 %v4147_v45 }
0x1fc8   :  { %6470 = vmatpush3.msra.mxu0 %v4047_v9  ;;  %4233 = vmatprep.mubr.bf16.mxu1 %v7053_v37 }
0x1fc9   :  { %6472 = vmatmul.mubr.msk.f32.vlgmr.msra.gmra.mrb[68].mxu0 %vm318_vm1, %v7264_v19  ;;  %4242 = vmatprep.subr.bf16.mxu0 %v4149_v22 }
0x1fca   :  { %4274 = vmatprep.mubr.bf16.mxu0 %v7053_v37  ;;  %4202 = vmatpush1.bf16.msra.mxu1 %v4146_v10 }
0x1fcb   :  { %4243 = vmatpush1.bf16.msra.mxu0 %v4148_v50  ;;  %4203 = vmatprep.subr.bf16.mxu1 %v4151_v11 }
0x1fcc   :  { %4244 = vmatprep.subr.bf16.mxu0 %v4153_v14 }
0x1fce   :  { %4204 = vmatpush1.bf16.msra.mxu1 %v4150_v15 }
0x1fcf   :  { %4245 = vmatpush1.bf16.msra.mxu0 %v4152_v17  ;;  %4205 = vmatprep.subr.bf16.mxu1 %v4155_v18 }
0x1fd0   :  { %4246 = vmatprep.subr.bf16.mxu0 %v4157_v20 }
0x1fd2   :  { %4206 = vmatpush1.bf16.msra.mxu1 %v4154_v21 }
0x1fd3   :  { %4247 = vmatpush1.bf16.msra.mxu0 %v4156_v23  ;;  %4207 = vmatprep.subr.bf16.mxu1 %v4159_v24 }
0x1fd4   :  { %4248 = vmatprep.subr.bf16.mxu0 %v4161_v25 }
0x1fd6   :  { %4208 = vmatpush1.bf16.msra.mxu1 %v4158_v1 }
0x1fd7   :  { %4249 = vmatpush1.bf16.msra.mxu0 %v4160_v27  ;;  %4209 = vmatprep.subr.bf16.mxu1 %v4163_v29 }
0x1fd8   :  { %4250 = vmatprep.subr.bf16.mxu0 %v4165_v26 }
0x1fda   :  { %4210 = vmatpush1.bf16.msra.mxu1 %v4162_v31 }
0x1fdb   :  { %4251 = vmatpush1.bf16.msra.mxu0 %v4164_v32  ;;  %4211 = vmatprep.subr.bf16.mxu1 %v4167_v33 }
0x1fdc   :  { %4252 = vmatprep.subr.bf16.mxu0 %v4169_v36 }
0x1fde   :  { %4212 = vmatpush1.bf16.msra.mxu1 %v4166_v34 }
0x1fdf   :  { %4253 = vmatpush1.bf16.msra.mxu0 %v4168_v35  ;;  %4213 = vmatprep.subr.bf16.mxu1 %v4171_v38 }
0x1fe0   :  { %4254 = vmatprep.subr.bf16.mxu0 %v4173_v40 }
0x1fe2   :  { %4214 = vmatpush1.bf16.msra.mxu1 %v4170_v30 }
0x1fe3   :  { %4255 = vmatpush1.bf16.msra.mxu0 %v4172_v42  ;;  %4215 = vmatprep.subr.bf16.mxu1 %v4175_v43 }
0x1fe4   :  { %4256 = vmatprep.subr.bf16.mxu0 %v4177_v44 }
0x1fe6   :  { %4216 = vmatpush1.bf16.msra.mxu1 %v4174_v47 }
0x1fe7   :  { %4257 = vmatpush1.bf16.msra.mxu0 %v4176_v48  ;;  %6474 = vmatprep.subr.mxu1 %v7042_v0 }
0x1fe8   :  { %6479 = vmatprep.subr.mxu0 %v7042_v0 }
0x209a   :  { %v4043_v49 = vpop.f32.mrb[48].mxu1 }
0x209b   :  { %v4118_v52 = vmul.f32 %v4043_v49, %v4043_v49  ;;  %v6468_v53 = vpop.f32.mrb[49].mxu1  ;;  %v4124_v57 = vrot.slane %v4043_v49, %v7261_v13 }
0x209c   :  { %v4114_v51 = vpop.f32.mrb[68].mxu0  ;;  %v4617_v53 = vld [vmem:[#allocation2 + $0x400] sm:$0xff] }
0x209d   :  { %v4119_v12 = vsub.f32 %v4114_v51, %v4118_v52  ;;  %v6473_v54 = vpop.f32.mrb[69].mxu0  ;;  %v4125_v60 = vsub.f32 %v7678_v7, %v4124_v57  ;;  %v4179_v7 = vld [vmem:[#allocation3 + $0xc] sm:$0xf]  ;;  %v4620_v52 = vld [vmem:[#allocation2 + $0x418] sm:$0xff]  ;;  %v4619_v51 = vld [vmem:[#allocation2 + $0x410] sm:$0xff] }
0x209e   :  { %v4192_v45 = vrot.slane %v4179_v7, %v7289_v41  ;;  %v4188_v22 = vrot.slane %v4179_v7, %v7285_v39  ;;  %v4184_v11 = vrot.slane %v4179_v7, %v7261_v13  ;;  %v4196_v43 = vrot.slane %v4179_v7, %v7586_v46  ;;  %v4624_v54 = vld [vmem:[#allocation2 + $0x438] sm:$0xff]  ;;  %v4626_v57 = vld [vmem:[#allocation2 + $0x448] sm:$0xff] }
0x209f   :  { %v4120_v55 = vmax.f32 %v4119_v12, 0.0  ;;  %v4622_v12 = vld [vmem:[#allocation2 + $0x428] sm:$0xff] }
0x20a0   :  { %v4638_v7 = vld [vmem:[#allocation2 + $0x4a8] sm:$0xff] }
0x20a1   :  { %v4126_v56 = vadd.f32 1e-05, %v4120_v55  ;;  %v4621_v55 = vld [vmem:[#allocation2 + $0x420] sm:$0xff] }
0x20a3   :  { %6697 = vrsqrt.f32 %v4126_v56  ;;  %v4623_v56 = vld [vmem:[#allocation2 + $0x430] sm:$0xff] }
0x20ad   :  { %v6698_v59 = vpop.eup %6697 }
0x20ae   :  { %v4131_v61 = vrot.slane %v6698_v59, %v7261_v13  ;;  %v4625_v59 = vld [vmem:[#allocation2 + $0x440] sm:$0xff] }
0x20b0   :  { %v4132_v63 = vmul.f32 %v4131_v61, %v4125_v60  ;;  %v4627_v60 = vld [vmem:[#allocation2 + $0x450] sm:$0xff]  ;;  %v4630_v61 = vld [vmem:[#allocation2 + $0x468] sm:$0xff] }
0x20b2   :  { %v4137_v5 = vmul.f32 %v4136_v62, %v4132_v63  ;;  %v4632_v62 = vld [vmem:[#allocation2 + $0x478] sm:$0xff]  ;;  %v4629_v63 = vld [vmem:[#allocation2 + $0x460] sm:$0xff] }
0x20b4   :  { %v4142_v6 = vadd.f32 %v4141_v4, %v4137_v5  ;;  %v4631_v4 = vld [vmem:[#allocation2 + $0x470] sm:$0xff]  ;;  %v4634_v5 = vld [vmem:[#allocation2 + $0x488] sm:$0xff] }
0x20b6   :  { %v4143_v8 = vmax.f32 %v4142_v6, 0.0  ;;  %v4636_v6 = vld [vmem:[#allocation2 + $0x498] sm:$0xff] }
0x20b8   :  { %v4144_v9 = vpack.c.bf16 %v4143_v8, %v4143_v8  ;;  %v4633_v8 = vld [vmem:[#allocation2 + $0x480] sm:$0xff] }
0x20ba   :  { %4234 = vmatmul.mubr.bf16.vlgmr.msra.gmra.mrb[52].mxu1 %v4144_v9  ;;  %4275 = vmatmul.mubr.bf16.vlgmr.msra.gmra.mrb[72].mxu0 %v4144_v9  ;;  %v4635_v9 = vld [vmem:[#allocation2 + $0x490] sm:$0xff] }
0x20bb   :  { %6476 = vmatprep.mubr.msk.f32.mxu1 %vm7043_vm0, %v7042_v0  ;;  %6481 = vmatprep.mubr.msk.f32.mxu0 %vm7043_vm0, %v7042_v0 }
0x218d   :  { %v4235_v10 = vpop.f32.mrb[52].mxu1  ;;  %v4276_v50 = vpop.f32.mrb[72].mxu0 }
0x218e   :  { %v4277_v14 = vadd.f32 %v4276_v50, %v4192_v45  ;;  %v4237_v15 = vpop.f32.mrb[53].mxu1  ;;  %v4278_v17 = vpop.f32.mrb[73].mxu0  ;;  %v4236_v25 = vadd.f32 %v4235_v10, %v4184_v11  ;;  %v4640_v45 = vld [vmem:[#allocation2 + $0x4b8] sm:$0xff]  ;;  %v4639_v10 = vld [vmem:[#allocation2 + $0x4b0] sm:$0xff]  ;;  %v4642_v50 = vld [vmem:[#allocation2 + $0x4c8] sm:$0xff] }
0x218f   :  { %v4238_v18 = vadd.f32 %v4237_v15, %v4188_v22  ;;  %v4239_v20 = vpop.f32.mrb[54].mxu1  ;;  %v4280_v21 = vpop.f32.mrb[74].mxu0  ;;  %v4279_v44 = vadd.f32 %v4278_v17, %v4196_v43  ;;  %v4637_v22 = vld [vmem:[#allocation2 + $0x4a0] sm:$0xff]  ;;  %v4644_v11 = vld [vmem:[#allocation2 + $0x4d8] sm:$0xff]  ;;  %v4643_v15 = vld [vmem:[#allocation2 + $0x4d0] sm:$0xff] }
0x2190   :  { %v4240_v23 = vpop.f32.mrb[55].mxu1  ;;  %v4281_v24 = vpop.f32.mrb[75].mxu0  ;;  %6480 = vmatpush3.msra.mxu0 %v4277_v14  ;;  %v4641_v14 = vld [vmem:[#allocation2 + $0x4c0] sm:$0xff]  ;;  %v4646_v17 = vld [vmem:[#allocation2 + $0x4e8] sm:$0xff]  ;;  %v4647_v21 = vld [vmem:[#allocation2 + $0x4f0] sm:$0xff] }
0x2191   :  { %6475 = vmatpush3.xpose.msra.mxu1 %v4238_v18  ;;  %6489 = vmatprep.subr.mxu0 %v7042_v0  ;;  %v4648_v18 = vld [vmem:[#allocation2 + $0x4f8] sm:$0xff]  ;;  %v4645_v20 = vld [vmem:[#allocation2 + $0x4e0] sm:$0xff] }
0x2192   :  { %6484 = vmatprep.subr.mxu1 %v7042_v0 }
0x2194   :  { %6477 = vmatmul.mubr.f32.vlgmr.msra.gmra.mrb[50].mxu1 %v4236_v25 }
0x2195   :  { %6486 = vmatprep.mubr.msk.f32.mxu1 %vm7043_vm0, %v7042_v0 }
0x2267   :  { %v4349_v1 = vpop.f32.mrb[50].mxu1 }
0x2268   :  { %v4350_v27 = vadd.f32 %v4349_v1, %v7567_v3  ;;  %v6478_v29 = vpop.f32.mrb[51].mxu1 }
0x226a   :  { %v4353_v26 = vsel %vm318_vm1, %v4350_v27, -inf }
0x226b   :  { %4354 = vmax.xlane.f32.xlu0 %v4353_v26 }
0x22f8   :  { %v4355_v31 = vpop.xlane.xlu0 %4354 }
0x22f9   :  { %v4356_v32 = vsub.f32 %v4350_v27, %v4355_v31 }
0x22fb   :  { %v4357_v33 = vmul.f32 1.442695, %v4356_v32 }
0x22fd   :  { %6699 = vpow2.f32 %v4357_v33  ;;  %v4444_v33 = vld [vmem:[#allocation4 + $0x6] sm:$0x3] }
0x2307   :  { %v6700_v36 = vpop.eup %6699 }
0x2308   :  { %v4359_v34 = vsel %vm318_vm1, %v6700_v36, 0.0 }
0x2309   :  { %4360 = vadd.xlane.f32.xlu1 %v4359_v34 }
0x2396   :  { %v4361_v35 = vpop.xlane.xlu1 %4360 }
0x2397   :  { %6701 = vrcp.f32 %v4361_v35 }
0x23a1   :  { %v6702_v38 = vpop.eup %6701 }
0x23a2   :  { %v4363_v40 = vmul.f32 %v6702_v38, %v7576_v16  ;;  %v4604_v38 = vrot.slane %v4444_v33, %v7261_v13 }
0x23a4   :  { %4366 = vperm.xlu0 %6680, %v4363_v40  }
0x2423   :  { %v4367_v30 = vpop.permute.xlu0 %4366 }
0x2424   :  { %v4369_v3 = vmul.f32 %v6700_v36, %v4367_v30  ;;  %v4609_v30 = vrot.slane %v4444_v33, %v7285_v39  ;;  %v5091_v33 = vld [vmem:[#allocation2 + $0x530] sm:$0xff] }
0x2426   :  { %v7712_v42 = vadd.f32 %v7672_v2, %v4369_v3  ;;  %6482 = vmatmul.mubr.msk.f32.vlgmr.msra.gmra.mrb[70].mxu0 %vm318_vm1, %v4369_v3  ;;  %v4618_v2 = vld [vmem:[#allocation2 + $0x408] sm:$0xff] }
0x2427   :  { %6491 = vmatprep.mubr.msk.f32.mxu0 %vm7043_vm0, %v7042_v0 }
0x24f9   :  { %v4439_v47 = vpop.f32.mrb[70].mxu0 }
0x24fa   :  { %v7718_v48 = vadd.f32 %v4439_v47, %v4279_v44  ;;  %v6483_v49 = vpop.f32.mrb[71].mxu0 }
0x24fc   :  { %v4515_v16 = vmul.f32 %v7718_v48, %v7718_v48  ;;  %6485 = vmatpush3.msra.mxu1 %v7718_v48 }
0x24fd   :  { %6487 = vmatmul.mubr.msk.f32.vlgmr.msra.gmra.mrb[56].mxu1 %vm318_vm1, %v7264_v19  ;;  %4672 = vmatprep.subr.bf16.mxu1 %v4618_v2 }
0x24fe   :  { %6490 = vmatpush3.msra.mxu0 %v4515_v16  ;;  %4704 = vmatprep.mubr.bf16.mxu1 %v7053_v37 }
0x24ff   :  { %6492 = vmatmul.mubr.msk.f32.vlgmr.msra.gmra.mrb[76].mxu0 %vm318_vm1, %v7264_v19  ;;  %4713 = vmatprep.subr.bf16.mxu0 %v4620_v52 }
0x2500   :  { %4745 = vmatprep.mubr.bf16.mxu0 %v7053_v37  ;;  %4673 = vmatpush1.bf16.msra.mxu1 %v4617_v53 }
0x2501   :  { %4714 = vmatpush1.bf16.msra.mxu0 %v4619_v51  ;;  %4674 = vmatprep.subr.bf16.mxu1 %v4622_v12 }
0x2502   :  { %4715 = vmatprep.subr.bf16.mxu0 %v4624_v54 }
0x2504   :  { %4675 = vmatpush1.bf16.msra.mxu1 %v4621_v55 }
0x2505   :  { %4716 = vmatpush1.bf16.msra.mxu0 %v4623_v56  ;;  %4676 = vmatprep.subr.bf16.mxu1 %v4626_v57 }
0x2506   :  { %4717 = vmatprep.subr.bf16.mxu0 %v4628_v58 }
0x2508   :  { %4677 = vmatpush1.bf16.msra.mxu1 %v4625_v59 }
0x2509   :  { %4718 = vmatpush1.bf16.msra.mxu0 %v4627_v60  ;;  %4678 = vmatprep.subr.bf16.mxu1 %v4630_v61 }
0x250a   :  { %4719 = vmatprep.subr.bf16.mxu0 %v4632_v62  ;;  %v7752_v62 = vld [vmem:[#allocation12] sm:$0xff] }
0x250c   :  { %4679 = vmatpush1.bf16.msra.mxu1 %v4629_v63 }
0x250d   :  { %4720 = vmatpush1.bf16.msra.mxu0 %v4631_v4  ;;  %4680 = vmatprep.subr.bf16.mxu1 %v4634_v5 }
0x250e   :  { %4721 = vmatprep.subr.bf16.mxu0 %v4636_v6 }
0x2510   :  { %4681 = vmatpush1.bf16.msra.mxu1 %v4633_v8 }
0x2511   :  { %4722 = vmatpush1.bf16.msra.mxu0 %v4635_v9  ;;  %4682 = vmatprep.subr.bf16.mxu1 %v4638_v7 }
0x2512   :  { %4723 = vmatprep.subr.bf16.mxu0 %v4640_v45 }
0x2514   :  { %4683 = vmatpush1.bf16.msra.mxu1 %v4637_v22 }
0x2515   :  { %4724 = vmatpush1.bf16.msra.mxu0 %v4639_v10  ;;  %4684 = vmatprep.subr.bf16.mxu1 %v4642_v50  ;;  %v7757_v50 = vld [vmem:[#allocation13] sm:$0xff] }
0x2516   :  { %4725 = vmatprep.subr.bf16.mxu0 %v4644_v11 }
0x2518   :  { %4685 = vmatpush1.bf16.msra.mxu1 %v4641_v14 }
0x2519   :  { %4726 = vmatpush1.bf16.msra.mxu0 %v4643_v15  ;;  %4686 = vmatprep.subr.bf16.mxu1 %v4646_v17 }
0x251a   :  { %4727 = vmatprep.subr.bf16.mxu0 %v4648_v18 }
0x251c   :  { %4687 = vmatpush1.bf16.msra.mxu1 %v4645_v20 }
0x251d   :  { %4728 = vmatpush1.bf16.msra.mxu0 %v4647_v21  ;;  %6494 = vmatprep.subr.mxu1 %v7042_v0 }
0x251e   :  { %6499 = vmatprep.subr.mxu0 %v7042_v0 }
0x25d0   :  { %v4511_v23 = vpop.f32.mrb[56].mxu1 }
0x25d1   :  { %v4586_v24 = vmul.f32 %v4511_v23, %v4511_v23  ;;  %v6488_v25 = vpop.f32.mrb[57].mxu1  ;;  %v4592_v32 = vrot.slane %v4511_v23, %v7261_v13 }
0x25d2   :  { %v4582_v1 = vpop.f32.mrb[76].mxu0 }
0x25d3   :  { %v4587_v27 = vsub.f32 %v4582_v1, %v4586_v24  ;;  %v6493_v29 = vpop.f32.mrb[77].mxu0  ;;  %v4593_v34 = vsub.f32 %v7718_v48, %v4592_v32  ;;  %v4650_v48 = vld [vmem:[#allocation3 + $0x10] sm:$0xf]  ;;  %v5088_v1 = vld [vmem:[#allocation2 + $0x518] sm:$0xff]  ;;  %v5089_v32 = vld [vmem:[#allocation2 + $0x520] sm:$0xff] }
0x25d4   :  { %v4663_v16 = vrot.slane %v4650_v48, %v7289_v41  ;;  %v4659_v2 = vrot.slane %v4650_v48, %v7285_v39  ;;  %v4655_v53 = vrot.slane %v4650_v48, %v7261_v13  ;;  %v4667_v18 = vrot.slane %v4650_v48, %v7586_v46  ;;  %v5087_v29 = vld [vmem:[#allocation2 + $0x510] sm:$0xff] }
0x25d5   :  { %v4588_v26 = vmax.f32 %v4587_v27, 0.0  ;;  %v5085_v27 = vld [vmem:[#allocation2 + $0x500] sm:$0xff]  ;;  %v5103_v48 = vld [vmem:[#allocation2 + $0x590] sm:$0xff] }
0x25d7   :  { %v4594_v31 = vadd.f32 1e-05, %v4588_v26  ;;  %v5090_v26 = vld [vmem:[#allocation2 + $0x528] sm:$0xff] }
0x25d9   :  { %6703 = vrsqrt.f32 %v4594_v31  ;;  %v5092_v31 = vld [vmem:[#allocation2 + $0x538] sm:$0xff] }
0x25e3   :  { %v6704_v36 = vpop.eup %6703 }
0x25e4   :  { %v4599_v35 = vrot.slane %v6704_v36, %v7261_v13  ;;  %v5094_v36 = vld [vmem:[#allocation2 + $0x548] sm:$0xff] }
0x25e6   :  { %v4600_v40 = vmul.f32 %v4599_v35, %v4593_v34  ;;  %v5096_v34 = vld [vmem:[#allocation2 + $0x558] sm:$0xff]  ;;  %v5095_v35 = vld [vmem:[#allocation2 + $0x550] sm:$0xff] }
0x25e8   :  { %v4605_v3 = vmul.f32 %v4604_v38, %v4600_v40  ;;  %v5098_v38 = vld [vmem:[#allocation2 + $0x568] sm:$0xff]  ;;  %v5100_v40 = vld [vmem:[#allocation2 + $0x578] sm:$0xff] }
0x25ea   :  { %v4610_v43 = vadd.f32 %v4609_v30, %v4605_v3  ;;  %v5097_v30 = vld [vmem:[#allocation2 + $0x560] sm:$0xff]  ;;  %v5099_v3 = vld [vmem:[#allocation2 + $0x570] sm:$0xff] }
0x25ec   :  { %v4611_v44 = vadd.f32 %v4610_v43, %v7651_v28  ;;  %v5102_v43 = vld [vmem:[#allocation2 + $0x588] sm:$0xff] }
0x25ee   :  { %v7737_v47 = vmax.f32 %v4611_v44, 0.0  ;;  %v5104_v44 = vld [vmem:[#allocation2 + $0x598] sm:$0xff] }
0x25f0   :  { %v4615_v49 = vpack.c.bf16 %v7737_v47, %v7737_v47 }
0x25f2   :  { %4705 = vmatmul.mubr.bf16.vlgmr.msra.gmra.mrb[60].mxu1 %v4615_v49  ;;  %4746 = vmatmul.mubr.bf16.vlgmr.msra.gmra.mrb[80].mxu0 %v4615_v49  ;;  %v5101_v49 = vld [vmem:[#allocation2 + $0x580] sm:$0xff] }
0x25f3   :  { %6496 = vmatprep.mubr.msk.f32.mxu1 %vm7043_vm0, %v7042_v0  ;;  %6501 = vmatprep.mubr.msk.f32.mxu0 %vm7043_vm0, %v7042_v0 }
0x26c5   :  { %v4706_v52 = vpop.f32.mrb[60].mxu1  ;;  %v4747_v28 = vpop.f32.mrb[80].mxu0 }
0x26c6   :  { %v4748_v51 = vadd.f32 %v4747_v28, %v4663_v16  ;;  %v4708_v12 = vpop.f32.mrb[61].mxu1  ;;  %v4749_v54 = vpop.f32.mrb[81].mxu0  ;;  %v4707_v60 = vadd.f32 %v4706_v52, %v4655_v53  ;;  %v5106_v16 = vld [vmem:[#allocation2 + $0x5a8] sm:$0xff]  ;;  %v5105_v52 = vld [vmem:[#allocation2 + $0x5a0] sm:$0xff]  ;;  %v5107_v28 = vld [vmem:[#allocation2 + $0x5b0] sm:$0xff] }
0x26c7   :  { %v4709_v55 = vadd.f32 %v4708_v12, %v4659_v2  ;;  %v4710_v56 = vpop.f32.mrb[62].mxu1  ;;  %v4751_v57 = vpop.f32.mrb[82].mxu0  ;;  %v4750_v20 = vadd.f32 %v4749_v54, %v4667_v18  ;;  %v5108_v2 = vld [vmem:[#allocation2 + $0x5b8] sm:$0xff]  ;;  %v5110_v53 = vld [vmem:[#allocation2 + $0x5c8] sm:$0xff]  ;;  %v5109_v12 = vld [vmem:[#allocation2 + $0x5c0] sm:$0xff] }
0x26c8   :  { %v4711_v58 = vpop.f32.mrb[63].mxu1  ;;  %v4752_v59 = vpop.f32.mrb[83].mxu0  ;;  %6500 = vmatpush3.msra.mxu0 %v4748_v51  ;;  %v5112_v51 = vld [vmem:[#allocation2 + $0x5d8] sm:$0xff]  ;;  %v5111_v54 = vld [vmem:[#allocation2 + $0x5d0] sm:$0xff]  ;;  %v5113_v57 = vld [vmem:[#allocation2 + $0x5e0] sm:$0xff] }
0x26c9   :  { %6495 = vmatpush3.xpose.msra.mxu1 %v4709_v55  ;;  %6509 = vmatprep.subr.mxu0 %v7042_v0  ;;  %v5114_v55 = vld [vmem:[#allocation2 + $0x5e8] sm:$0xff]  ;;  %v5116_v56 = vld [vmem:[#allocation2 + $0x5f8] sm:$0xff]  ;;  %v5115_v58 = vld [vmem:[#allocation2 + $0x5f0] sm:$0xff] }
0x26ca   :  { %6504 = vmatprep.subr.mxu1 %v7042_v0 }
0x26cc   :  { %6497 = vmatmul.mubr.f32.vlgmr.msra.gmra.mrb[58].mxu1 %v4707_v60 }
0x26cd   :  { %6506 = vmatprep.mubr.msk.f32.mxu1 %vm7043_vm0, %v7042_v0 }
0x279f   :  { %v4820_v61 = vpop.f32.mrb[58].mxu1 }
0x27a0   :  { %v4821_v63 = vadd.f32 %v7752_v62, %v4820_v61  ;;  %v6498_v4 = vpop.f32.mrb[59].mxu1 }
0x27a2   :  { %v4824_v5 = vsel %vm318_vm1, %v4821_v63, -inf }
0x27a3   :  { %4825 = vmax.xlane.f32.xlu1 %v4824_v5 }
0x2830   :  { %v4826_v6 = vpop.xlane.xlu1 %4825 }
0x2831   :  { %v4827_v8 = vsub.f32 %v4821_v63, %v4826_v6 }
0x2833   :  { %v4828_v9 = vmul.f32 1.442695, %v4827_v8 }
0x2835   :  { %6705 = vpow2.f32 %v4828_v9 }
0x283f   :  { %v6706_v7 = vpop.eup %6705 }
0x2840   :  { %v4830_v45 = vsel %vm318_vm1, %v6706_v7, 0.0 }
0x2841   :  { %4831 = vadd.xlane.f32.xlu1 %v4830_v45 }
0x28ce   :  { %v4832_v22 = vpop.xlane.xlu1 %4831 }
0x28cf   :  { %6707 = vrcp.f32 %v4832_v22 }
0x28d9   :  { %v6708_v10 = vpop.eup %6707 }
0x28da   :  { %v4834_v11 = vmul.f32 %v7757_v50, %v6708_v10 }
0x28dc   :  { %4837 = vperm.xlu0 %6680, %v4834_v11  }
0x295b   :  { %v4838_v14 = vpop.permute.xlu0 %4837 }
0x295c   :  { %v4840_v15 = vmul.f32 %v6706_v7, %v4838_v14  ;;  %v4915_v7 = vld [vmem:[#allocation4 + $0x8] sm:$0x3] }
0x295d   :  { %v5075_v11 = vrot.slane %v4915_v7, %v7261_v13 }
0x295e   :  { %v7761_v17 = vadd.f32 %v4840_v15, %v7712_v42  ;;  %6502 = vmatmul.mubr.msk.f32.vlgmr.msra.gmra.mrb[78].mxu0 %vm318_vm1, %v4840_v15  ;;  %v5086_v42 = vld [vmem:[#allocation2 + $0x508] sm:$0xff]  ;;  %v5080_v15 = vrot.slane %v4915_v7, %v7285_v39 }
0x295f   :  { %6511 = vmatprep.mubr.msk.f32.mxu0 %vm7043_vm0, %v7042_v0 }
0x2a31   :  { %v4910_v21 = vpop.f32.mrb[78].mxu0 }
0x2a32   :  { %v7767_v23 = vadd.f32 %v4910_v21, %v4750_v20  ;;  %v6503_v24 = vpop.f32.mrb[79].mxu0 }
0x2a34   :  { %v4986_v25 = vmul.f32 %v7767_v23, %v7767_v23  ;;  %6505 = vmatpush3.msra.mxu1 %v7767_v23 }
0x2a35   :  { %6507 = vmatmul.mubr.msk.f32.vlgmr.msra.gmra.mrb[64].mxu1 %vm318_vm1, %v7264_v19  ;;  %5140 = vmatprep.subr.bf16.mxu1 %v5086_v42 }
0x2a36   :  { %6510 = vmatpush3.msra.mxu0 %v4986_v25  ;;  %5172 = vmatprep.mubr.bf16.mxu1 %v7053_v37 }
0x2a37   :  { %6512 = vmatmul.mubr.msk.f32.vlgmr.msra.gmra.mrb[84].mxu0 %vm318_vm1, %v7264_v19  ;;  %5181 = vmatprep.subr.bf16.mxu0 %v5088_v1 }
0x2a38   :  { %5213 = vmatprep.mubr.bf16.mxu0 %v7053_v37  ;;  %5141 = vmatpush1.bf16.msra.mxu1 %v5085_v27  ;;  %v5093_v37 = vld [vmem:[#allocation2 + $0x540] sm:$0xff] }
0x2a39   :  { %5182 = vmatpush1.bf16.msra.mxu0 %v5087_v29  ;;  %5142 = vmatprep.subr.bf16.mxu1 %v5090_v26 }
0x2a3a   :  { %5183 = vmatprep.subr.bf16.mxu0 %v5092_v31 }
0x2a3c   :  { %5143 = vmatpush1.bf16.msra.mxu1 %v5089_v32 }
0x2a3d   :  { %5184 = vmatpush1.bf16.msra.mxu0 %v5091_v33  ;;  %5144 = vmatprep.subr.bf16.mxu1 %v5094_v36 }
0x2a3e   :  { %5185 = vmatprep.subr.bf16.mxu0 %v5096_v34 }
0x2a40   :  { %5145 = vmatpush1.bf16.msra.mxu1 %v5093_v37 }
0x2a41   :  { %5186 = vmatpush1.bf16.msra.mxu0 %v5095_v35  ;;  %5146 = vmatprep.subr.bf16.mxu1 %v5098_v38 }
0x2a42   :  { %5187 = vmatprep.subr.bf16.mxu0 %v5100_v40 }
0x2a44   :  { %5147 = vmatpush1.bf16.msra.mxu1 %v5097_v30 }
0x2a45   :  { %5188 = vmatpush1.bf16.msra.mxu0 %v5099_v3  ;;  %5148 = vmatprep.subr.bf16.mxu1 %v5102_v43 }
0x2a46   :  { %5189 = vmatprep.subr.bf16.mxu0 %v5104_v44 }
0x2a48   :  { %5149 = vmatpush1.bf16.msra.mxu1 %v5101_v49 }
0x2a49   :  { %5190 = vmatpush1.bf16.msra.mxu0 %v5103_v48  ;;  %5150 = vmatprep.subr.bf16.mxu1 %v5106_v16 }
0x2a4a   :  { %5191 = vmatprep.subr.bf16.mxu0 %v5108_v2 }
0x2a4c   :  { %5151 = vmatpush1.bf16.msra.mxu1 %v5105_v52 }
0x2a4d   :  { %5192 = vmatpush1.bf16.msra.mxu0 %v5107_v28  ;;  %5152 = vmatprep.subr.bf16.mxu1 %v5110_v53 }
0x2a4e   :  { %5193 = vmatprep.subr.bf16.mxu0 %v5112_v51 }
0x2a50   :  { %5153 = vmatpush1.bf16.msra.mxu1 %v5109_v12 }
0x2a51   :  { %5194 = vmatpush1.bf16.msra.mxu0 %v5111_v54  ;;  %5154 = vmatprep.subr.bf16.mxu1 %v5114_v55 }
0x2a52   :  { %5195 = vmatprep.subr.bf16.mxu0 %v5116_v56 }
0x2a54   :  { %5155 = vmatpush1.bf16.msra.mxu1 %v5113_v57 }
0x2a55   :  { %5196 = vmatpush1.bf16.msra.mxu0 %v5115_v58  ;;  %6514 = vmatprep.subr.mxu1 %v7042_v0 }
0x2a56   :  { %6519 = vmatprep.subr.mxu0 %v7042_v0 }
0x2b08   :  { %v4982_v59 = vpop.f32.mrb[64].mxu1 }
0x2b09   :  { %v5057_v60 = vmul.f32 %v4982_v59, %v4982_v59  ;;  %v6508_v61 = vpop.f32.mrb[65].mxu1  ;;  %v5063_v9 = vrot.slane %v4982_v59, %v7261_v13 }
0x2b0a   :  { %v5053_v63 = vpop.f32.mrb[84].mxu0 }
0x2b0b   :  { %v5058_v4 = vsub.f32 %v5053_v63, %v5057_v60  ;;  %v6513_v5 = vpop.f32.mrb[85].mxu0  ;;  %v5064_v22 = vsub.f32 %v7767_v23, %v5063_v9  ;;  %v5118_v23 = vld [vmem:[#allocation3 + $0x14] sm:$0xf] }
0x2b0c   :  { %v5131_v25 = vrot.slane %v5118_v23, %v7289_v41  ;;  %v5127_v42 = vrot.slane %v5118_v23, %v7285_v39  ;;  %v5123_v29 = vrot.slane %v5118_v23, %v7261_v13  ;;  %v5135_v54 = vrot.slane %v5118_v23, %v7586_v46 }
0x2b0d   :  { %v5059_v6 = vmax.f32 %v5058_v4, 0.0 }
0x2b0f   :  { %v5065_v8 = vadd.f32 1e-05, %v5059_v6 }
0x2b11   :  { %6709 = vrsqrt.f32 %v5065_v8  ;;  %v5383_v8 = vld [vmem:[#allocation4 + $0xa] sm:$0x3] }
0x2b1b   :  { %v6710_v45 = vpop.eup %6709 }
0x2b1c   :  { %v5070_v10 = vrot.slane %v6710_v45, %v7261_v13 }
0x2b1e   :  { %v5071_v14 = vmul.f32 %v5070_v10, %v5064_v22  ;;  %v5543_v22 = vrot.slane %v5383_v8, %v7261_v13 }
0x2b20   :  { %v5076_v18 = vmul.f32 %v5075_v11, %v5071_v14  ;;  %v5548_v11 = vrot.slane %v5383_v8, %v7285_v39 }
0x2b22   :  { %v5081_v20 = vadd.f32 %v5080_v15, %v5076_v18 }
0x2b24   :  { %v5082_v21 = vmax.f32 %v5081_v20, 0.0 }
0x2b26   :  { %v5083_v24 = vpack.c.bf16 %v5082_v21, %v5082_v21 }
0x2b28   :  { %5173 = vmatmul.mubr.bf16.vlgmr.msra.gmra.mrb[68].mxu1 %v5083_v24  ;;  %5214 = vmatmul.mubr.bf16.vlgmr.msra.gmra.mrb[88].mxu0 %v5083_v24 }
0x2b29   :  { %6516 = vmatprep.mubr.msk.f32.mxu1 %vm7043_vm0, %v7042_v0  ;;  %6521 = vmatprep.mubr.msk.f32.mxu0 %vm7043_vm0, %v7042_v0 }
0x2bfb   :  { %v5174_v1 = vpop.f32.mrb[68].mxu1  ;;  %v5215_v27 = vpop.f32.mrb[88].mxu0 }
0x2bfc   :  { %v5216_v26 = vadd.f32 %v5215_v27, %v5131_v25  ;;  %v5176_v31 = vpop.f32.mrb[69].mxu1  ;;  %v5217_v32 = vpop.f32.mrb[89].mxu0  ;;  %v5175_v38 = vadd.f32 %v5174_v1, %v5123_v29 }
0x2bfd   :  { %v5177_v33 = vadd.f32 %v5176_v31, %v5127_v42  ;;  %v5178_v36 = vpop.f32.mrb[70].mxu1  ;;  %v5219_v34 = vpop.f32.mrb[90].mxu0  ;;  %v5218_v55 = vadd.f32 %v5217_v32, %v5135_v54 }
0x2bfe   :  { %v5179_v37 = vpop.f32.mrb[71].mxu1  ;;  %v5220_v35 = vpop.f32.mrb[91].mxu0  ;;  %6520 = vmatpush3.msra.mxu0 %v5216_v26 }
0x2bff   :  { %6515 = vmatpush3.xpose.msra.mxu1 %v5177_v33  ;;  %6529 = vmatprep.subr.mxu0 %v7042_v0 }
0x2c00   :  { %6524 = vmatprep.subr.mxu1 %v7042_v0 }
0x2c02   :  { %6517 = vmatmul.mubr.f32.vlgmr.msra.gmra.mrb[66].mxu1 %v5175_v38 }
0x2c03   :  { %6526 = vmatprep.mubr.msk.f32.mxu1 %vm7043_vm0, %v7042_v0 }
0x2cd5   :  { %v5288_v40 = vpop.f32.mrb[66].mxu1 }
0x2cd6   :  { %v5289_v30 = vadd.f32 %v7752_v62, %v5288_v40  ;;  %v6518_v3 = vpop.f32.mrb[67].mxu1 }
0x2cd8   :  { %v5292_v43 = vsel %vm318_vm1, %v5289_v30, -inf }
0x2cd9   :  { %5293 = vmax.xlane.f32.xlu1 %v5292_v43 }
0x2d66   :  { %v5294_v44 = vpop.xlane.xlu1 %5293 }
0x2d67   :  { %v5295_v49 = vsub.f32 %v5289_v30, %v5294_v44 }
0x2d69   :  { %v5296_v48 = vmul.f32 1.442695, %v5295_v49 }
0x2d6b   :  { %6711 = vpow2.f32 %v5296_v48 }
0x2d75   :  { %v6712_v16 = vpop.eup %6711 }
0x2d76   :  { %v5298_v2 = vsel %vm318_vm1, %v6712_v16, 0.0 }
0x2d77   :  { %5299 = vadd.xlane.f32.xlu0 %v5298_v2 }
0x2e04   :  { %v5300_v52 = vpop.xlane.xlu0 %5299 }
0x2e05   :  { %6713 = vrcp.f32 %v5300_v52 }
0x2e0f   :  { %v6714_v28 = vpop.eup %6713 }
0x2e10   :  { %v5302_v53 = vmul.f32 %v7757_v50, %v6714_v28 }
0x2e12   :  { %5305 = vperm.xlu1 %6679, %v5302_v53  }
0x2e91   :  { %v5306_v51 = vpop.permute.xlu1 %5305 }
0x2e92   :  { %v5308_v62 = vmul.f32 %v6712_v16, %v5306_v51 }
0x2e94   :  { %v5553_v12 = vadd.f32 %v7761_v17, %v5308_v62  ;;  %6522 = vmatmul.mubr.msk.f32.vlgmr.msra.gmra.mrb[86].mxu0 %vm318_vm1, %v5308_v62 }
0x2e95   :  { %6531 = vmatprep.mubr.msk.f32.mxu0 %vm7043_vm0, %v7042_v0 }
0x2f67   :  { %v5378_v56 = vpop.f32.mrb[86].mxu0 }
0x2f68   :  { %v5379_v57 = vadd.f32 %v5378_v56, %v5218_v55  ;;  %v6523_v58 = vpop.f32.mrb[87].mxu0 }
0x2f6a   :  { %v5454_v59 = vmul.f32 %v5379_v57, %v5379_v57  ;;  %6525 = vmatpush3.msra.mxu1 %v5379_v57 }
0x2f6b   :  { %6527 = vmatmul.mubr.msk.f32.vlgmr.msra.gmra.mrb[72].mxu1 %vm318_vm1, %v7264_v19 }
0x2f6c   :  { %6530 = vmatpush3.msra.mxu0 %v5454_v59 }
0x2f6d   :  { %6532 = vmatmul.mubr.msk.f32.vlgmr.msra.gmra.mrb[92].mxu0 %vm318_vm1, %v7264_v19 }
0x303e   :  { %v5450_v50 = vpop.f32.mrb[72].mxu1 }
0x303f   :  { %v5525_v17 = vmul.f32 %v5450_v50, %v5450_v50  ;;  %v6528_v60 = vpop.f32.mrb[73].mxu1  ;;  %v5531_v6 = vrot.slane %v5450_v50, %v7261_v13 }
0x3040   :  { %v5521_v61 = vpop.f32.mrb[92].mxu0 }
0x3041   :  { %v5526_v63 = vsub.f32 %v5521_v61, %v5525_v17  ;;  %v6533_v4 = vpop.f32.mrb[93].mxu0  ;;  %v5532_v7 = vsub.f32 %v5379_v57, %v5531_v6 }
0x3043   :  { %v5527_v46 = vmax.f32 %v5526_v63, 0.0 }
0x3045   :  { %v5533_v5 = vadd.f32 1e-05, %v5527_v46 }
0x3047   :  { %6715 = vrsqrt.f32 %v5533_v5 }
0x3051   :  { %v6716_v9 = vpop.eup %6715 }
0x3052   :  { %v5538_v45 = vrot.slane %v6716_v9, %v7261_v13 }
0x3054   :  { %v5539_v10 = vmul.f32 %v5538_v45, %v5532_v7 }
0x3056   :  { %v5544_v14 = vmul.f32 %v5543_v22, %v5539_v10 }
0x3058   :  { %v5549_v15 = vadd.f32 %v5548_v11, %v5544_v14 }
0x305a   :  { %v5550_v18 = vadd.f32 %v5549_v15, %v7737_v47 }
0x305c   :  { %v5551_v20 = vmax.f32 %v5550_v18, 0.0 }
0x305d   :  { %7025 = dma.done.wait [#allocation6 + $0x3], 1024 }
0x305e   :  { %7026 = vsyncadd [#allocation6 + $0x3], 4294966272  ;;  %6534 = vmatprep.subr.bf16.mxu1 %v7042_v0  ;;  %6550 = vmatprep.mubr.msk.bf16.mxu1 %vm7043_vm0, %v7042_v0  ;;  %5788 = vst.msk [vmem:[#allocation22] sm:$0xff] %vm318_vm1, %v5553_v12  ;;  %v5560_v21 = vld [vmem:[#allocation5] sm:$0xff]  ;;  %v5561_v47 = vld [vmem:[#allocation5 + $0x8] sm:$0xff]  ;;  %v5559_v29 = vpack.c.bf16 %v5551_v20, %v5551_v20  ;;  %s7054_s9 = smov [#allocation22]  }
0x305f   :  { %6554 = vmatprep.subr.mxu0 %v7042_v0  ;;  %6556 = vmatprep.mubr.msk.f32.mxu0 %vm7043_vm0, %v7042_v0  ;;  %v5562_v24 = vld [vmem:[#allocation5 + $0x10] sm:$0xff]  ;;  %v5563_v23 = vld [vmem:[#allocation5 + $0x18] sm:$0xff]  ;;  %v5564_v25 = vld [vmem:[#allocation5 + $0x20] sm:$0xff]  ;;  %s5805_s24 = sshll.u32 %s7054_s9, 4  ;;  %s5806_s24 = int_to_ptr.vmem [resolvable:$true] %s5805_s24 }
0x3060   :  { %6535 = vmatpush3.bf16.msra.mxu1 %v5560_v21  ;;  %v5565_v42 = vld [vmem:[#allocation5 + $0x28] sm:$0xff]  ;;  %v5566_v1 = vld [vmem:[#allocation5 + $0x30] sm:$0xff]  ;;  %v5567_v27 = vld [vmem:[#allocation5 + $0x38] sm:$0xff]  ;;  %s6965_s30 = scalar_lea.vmem %s5806_s24, 128  ;;  %p6970_p5 = scmp.lt.s32.totalorder %s5806_s24, %s5806_s24 }
0x3061   :  { %6536 = vmatprep.subr.bf16.mxu1 %v7042_v0  ;;  %v5558_v26 = vld [vmem:[#allocation18] sm:$0x7]  ;;  %p6966_p4 = scmp.ne.s32.totalorder %s5806_s24, %s6965_s30  ;;  %p6971_p6 = scmp.lt.s32.totalorder %s6965_s30, %s6965_s30 }
0x3062   :  { %v5571_v31 = vrot.slane %v5558_v26, %v7261_v13 }
0x3063   :  { %p6972_p7 = por %p6971_p6, %p6970_p5 }
0x3064   :  { %6537 = vmatpush3.bf16.msra.mxu1 %v5561_v47 }
0x3065   :  { %6538 = vmatprep.subr.bf16.mxu1 %v7042_v0  ;;  %p6973_p8 = pnand %p6972_p7, %p6966_p4 }
0x3068   :  { %6539 = vmatpush3.bf16.msra.mxu1 %v5562_v24 }
0x3069   :  { %6540 = vmatprep.subr.bf16.mxu1 %v7042_v0 }
0x306c   :  { %6541 = vmatpush3.bf16.msra.mxu1 %v5563_v23 }
0x306d   :  { %6542 = vmatprep.subr.bf16.mxu1 %v7042_v0 }
0x3070   :  { %6543 = vmatpush3.bf16.msra.mxu1 %v5564_v25 }
0x3071   :  { %6544 = vmatprep.subr.bf16.mxu1 %v7042_v0 }
0x3074   :  { %6545 = vmatpush3.bf16.msra.mxu1 %v5565_v42 }
0x3075   :  { %6546 = vmatprep.subr.bf16.mxu1 %v7042_v0 }
0x3078   :  { %6547 = vmatpush3.bf16.msra.mxu1 %v5566_v1 }
0x3079   :  { %6548 = vmatprep.subr.bf16.mxu1 %v7042_v0 }
0x307c   :  { %6549 = vmatpush3.bf16.msra.mxu1 %v5567_v27 }
0x307f   :  { %6551 = vmatmul.mubr.bf16.vlgmr.msra.gmra.mrb[76].mxu1 %v5559_v29 }
0x3152   :  { %v5606_v32 = vpop.f32.mrb[76].mxu1 }
0x3153   :  { %v5607_v33 = vadd.f32 %v5606_v32, %v5571_v31  ;;  %v6552_v36 = vpop.f32.mrb[77].mxu1 }
0x3154   :  { %v5609_v34 = vpop.f32.mrb[78].mxu1 }
0x3155   :  { %v5682_v37 = vmul.f32 %v5607_v33, %v5607_v33  ;;  %v6553_v35 = vpop.f32.mrb[79].mxu1  ;;  %6555 = vmatpush3.msra.mxu0 %v5607_v33 }
0x3156   :  { %6557 = vmatmul.mubr.msk.f32.vlgmr.msra.gmra.mrb[94].mxu0 %vm318_vm1, %v7264_v19  ;;  %6559 = vmatprep.subr.mxu0 %v7042_v0 }
0x3157   :  { %6560 = vmatpush3.msra.mxu0 %v5682_v37  ;;  %6561 = vmatprep.mubr.msk.f32.mxu0 %vm7043_vm0, %v7042_v0 }
0x315a   :  { %6562 = vmatmul.mubr.msk.f32.vlgmr.msra.gmra.mrb[96].mxu0 %vm318_vm1, %v7264_v19 }
0x315b   :  { %6976 = shalt.err (!%p6973_p8)
}
0x315c   :  { %s6977_s14 = scalar_lea.hbm %s7877_s13, 128 }
0x315d   :  { %p6978_p9 = scmp.ne.s32.totalorder %s7877_s13, %s6977_s14  ;;  %p6981_p10 = scmp.lt.u32.totalorder %s6977_s14, %s7877_s13 }
0x315f   :  { %p6983_p11 = pnand %p6981_p10, %p6978_p9 }
0x3161   :  { %6986 = shalt.err (!%p6983_p11)
}
0x3162   :  { %5808 = dma.vmem_to_hbm [thread:$0]  %s5806_s24, 128, %s7877_s13, [#allocation23]   ;;  %v5771_v16 = vrot.slane %v5558_v26, %v7285_v39  ;;  %v5776_v28 = vrot.slane %v5558_v26, %v7289_v41  ;;  %v5961_v12 = vld [vmem:[#allocation19] ss:$0 sm:$0xff] }
0x3163   :  { %s7055_s13 = smov [#allocation21]  }
0x3164   :  { %s5795_s18 = sshll.u32 %s7055_s13, 4  ;;  %s5796_s18 = int_to_ptr.vmem [resolvable:$true] %s5795_s18 }
0x3165   :  { %s6987_s20 = scalar_lea.vmem %s5796_s18, 128  ;;  %p6992_p13 = scmp.lt.s32.totalorder %s5796_s18, %s5796_s18 }
0x3166   :  { %p6988_p12 = scmp.ne.s32.totalorder %s5796_s18, %s6987_s20  ;;  %p6993_p0 = scmp.lt.s32.totalorder %s6987_s20, %s6987_s20 }
0x3168   :  { %p6994_p1 = por %p6993_p0, %p6992_p13 }
0x316a   :  { %p6995_p2 = pnand %p6994_p1, %p6988_p12 }
0x3229   :  { %v5678_v0 = vpop.f32.mrb[94].mxu0 }
0x322a   :  { %v6558_v19 = vpop.f32.mrb[95].mxu0  ;;  %v5753_v38 = vmul.f32 %v5678_v0, %v5678_v0  ;;  %v5759_v49 = vrot.slane %v5678_v0, %v7261_v13 }
0x322c   :  { %v5760_v2 = vsub.f32 %v5607_v33, %v5759_v49 }
0x322d   :  { %v5749_v40 = vpop.f32.mrb[96].mxu0 }
0x322e   :  { %v5754_v30 = vsub.f32 %v5749_v40, %v5753_v38  ;;  %v6563_v3 = vpop.f32.mrb[97].mxu0 }
0x3230   :  { %v5755_v43 = vmax.f32 %v5754_v30, 0.0 }
0x3232   :  { %v5761_v44 = vadd.f32 1e-05, %v5755_v43 }
0x3234   :  { %6719 = vrsqrt.f32 %v5761_v44 }
0x323e   :  { %v6720_v48 = vpop.eup %6719 }
0x323f   :  { %v5766_v52 = vrot.slane %v6720_v48, %v7261_v13 }
0x3241   :  { %v5767_v53 = vmul.f32 %v5766_v52, %v5760_v2 }
0x3243   :  { %v5772_v51 = vmul.f32 %v5771_v16, %v5767_v53 }
0x3245   :  { %v5777_v62 = vadd.f32 %v5776_v28, %v5772_v51 }
0x3247   :  { %6721 = vtanh.f32 %v5777_v62 }
0x3251   :  { %v6722_v54 = vpop.eup %6721 }
0x3252   :  { %v5786_v55 = vmul.f32 %v6722_v54, %v5961_v12 }
0x3254   :  { %5787 = vst [vmem:[#allocation21] sm:$0xff] %v5786_v55 }
0x3255   :  { %6998 = shalt.err (!%p6995_p2)
}
0x3256   :  { %s6999_s4 = scalar_lea.hbm %s7876_s12, 128 }
0x3257   :  { %p7000_p3 = scmp.ne.s32.totalorder %s7876_s12, %s6999_s4  ;;  %p7003_p4 = scmp.lt.u32.totalorder %s6999_s4, %s7876_s12 }
0x3259   :  { %p7005_p5 = pnand %p7003_p4, %p7000_p3 }
0x325b   :  { %7008 = shalt.err (!%p7005_p5)
}
0x325c   :  { %5798 = dma.vmem_to_hbm [thread:$0]  %s5796_s18, 128, %s7876_s12, [#allocation9]  }
0x325d   :  { %7027 = dma.done.wait [#allocation9], 128  }
0x325e   :  { %7028 = vsyncadd [#allocation9], 4294967168 }
0x325f   :  { %7029 = dma.done.wait [#allocation23], 128  }
0x3260   :  { %7030 = vsyncadd [#allocation23], 4294967168 }
0x3261   :  { %5815 = vsyncpa [#allocation8], 1 }
0x3262   :  { %5816 = vsyncpa [#allocation11], 1 }
0x3263   :  { %5817 = vsyncpa [#allocation14], 1 }
0x3264   :  { %5818 = vsyncpa [#allocation17], 1 }
0x3265   :  { %5819 = vsyncpa [#allocation20], 1 }
0x3266   :  { %5820 = vsyncpa [#allocation9], 1 }
0x3267   :  { %5821 = vsyncpa [#allocation23], 1 }
0x3268   :  { %5822 = vsyncmov [#allocation6] }
0x326b   :  { %s5823_s23 = vpop.sfrf %5822 }
0x326c   :  { %p5962_p6 = scmp.ne.s32.totalorder %s5823_s23, 0 }
0x326e   :  { %5827 = shalt.err (%p5962_p6)  }
0x326f   :  { %5829 = vsyncmov [#allocation6 + $0x1] }
0x3272   :  { %s5830_s25 = vpop.sfrf %5829 }
0x3273   :  { %p5963_p7 = scmp.ne.s32.totalorder %s5830_s25, 0 }
0x3275   :  { %5834 = shalt.err (%p5963_p7)  }
0x3276   :  { %5836 = vsyncmov [#allocation6 + $0x2] }
0x3279   :  { %s5837_s12 = vpop.sfrf %5836 }
0x327a   :  { %p5964_p8 = scmp.ne.s32.totalorder %s5837_s12, 0 }
0x327c   :  { %5841 = shalt.err (%p5964_p8)  }
0x327d   :  { %5843 = vsyncmov [#allocation6 + $0x3] }
0x3280   :  { %s5844_s3 = vpop.sfrf %5843 }
0x3281   :  { %p5965_p9 = scmp.ne.s32.totalorder %s5844_s3, 0 }
0x3283   :  { %5848 = shalt.err (%p5965_p9)  }

</bundles_post_ra>
